<compile_context>
chip_gen: v7x
topology: tpu7x:2x2x1
jax: 0.10.0
libtpu: 0.0.40
codegen_flags: <defaults>
</compile_context>

<pallas_src>
import numpy as np
import jax
import jax.numpy as jnp
from jax.experimental import pallas as pl
from jax.experimental.pallas import tpu as pltpu

EPS = 1e-5
K = 5              # conv kernel size ('same' padding = 2)
M = 6              # coarse positions per sample surviving all three pools
SEG = 8            # per-sample lane segment: m in [0, 8); m >= 6 are zero pads
P1, P2, P3 = 27, 9, 3   # phase counts per conv layer (162 = 27*6, 54 = 9*6, 18 = 3*6)


# ---------------------------------------------------------------------------
# In-kernel helpers (traced inside the Pallas kernel body)
# ---------------------------------------------------------------------------
def _lane_shift(x, s):
    """out[:, i] = x[:, i + s], zero-filled at the array edges (static s)."""
    if s == 0:
        return x
    r = x.shape[0]
    z = jnp.zeros((r, abs(s)), x.dtype)
    if s > 0:
        return jnp.concatenate([x[:, s:], z], axis=1)
    return jnp.concatenate([z, x[:, :s]], axis=1)


def _phase_rhs(slab, P, Ci, p):
    """(Ci*5, N*SEG) stacked-tap rhs for output phase p of a factored slab.

    slab: (P*Ci, N*SEG), rows = phase*Ci + c.  Tap k reads input phase
    (p + k - 2) mod P with a +/-1 coarse-position (lane) carry when it wraps;
    the zero pad lanes (and zero-filled shifts) supply the conv's 'same' pads.
    """
    if 2 <= p <= P - 3:                                  # no wrap: 5 consecutive phases
        return slab[(p - 2) * Ci:(p + 3) * Ci, :]
    pieces = []
    for k in range(K):
        t = p + k - 2
        if t < 0:
            pieces.append(_lane_shift(slab[(t + P) * Ci:(t + P + 1) * Ci, :], -1))
        elif t >= P:
            pieces.append(_lane_shift(slab[(t - P) * Ci:(t - P + 1) * Ci, :], +1))
        else:
            pieces.append(slab[t * Ci:(t + 1) * Ci, :])
    return jnp.concatenate(pieces, axis=0)


def _conv_bn_pool(slab, P, Ci, wflat, bias, gamma, beta, mask, n):
    """conv(k=5,'same') + bias + ReLU + BatchNorm(train) + AvgPool1d(3).

    slab:  (P*Ci, N*SEG)   factored input (pad lanes are exactly zero)
    wflat: (Co, Ci*5)      conv weight, taps stacked along the contraction dim
    bias/gamma/beta: (Co, 1)
    mask:  (1, N*SEG)      1.0 where the coarse position is valid (m < 6)
    returns (P//3 * Co, N*SEG) factored slab for the next layer.
    """
    Co = wflat.shape[0]
    ssum = jnp.zeros((Co, 1), jnp.float32)
    ssq = jnp.zeros((Co, 1), jnp.float32)
    ys = []
    for p in range(P):
        x = _phase_rhs(slab, P, Ci, p)
        y = jnp.dot(wflat, x, preferred_element_type=jnp.float32) + bias
        ym = jnp.maximum(y, 0.0) * mask                  # garbage/pad lanes -> 0
        ys.append(ym)
        ssum = ssum + jnp.sum(ym, axis=1, keepdims=True)
        ssq = ssq + jnp.sum(ym * ym, axis=1, keepdims=True)
    cnt = float(n * M * P)                               # = N * L_layer valid positions
    mean = ssum / cnt
    var = jnp.maximum(ssq / cnt - mean * mean, 0.0)      # one-pass var, clamped >= 0
    scale = gamma * jax.lax.rsqrt(var + EPS)
    shift = beta - mean * scale
    # AvgPool1d(3) = mean of three consecutive phase planes; the BN affine is
    # applied after the pool on the 3x-narrower result (pool is linear -> exact).
    out = []
    for q in range(P // 3):
        pooled = (ys[3 * q] + ys[3 * q + 1] + ys[3 * q + 2]) * (1.0 / 3.0)
        out.append((scale * pooled + shift) * mask)      # keep pad lanes exactly 0
    return jnp.concatenate(out, axis=0)


def _fc_bn(f, gamma, beta, mask_fc, n):
    """BatchNorm1d (training mode) over the batch; stats from valid lanes only."""
    fm = f * mask_fc
    mean = jnp.sum(fm, axis=1, keepdims=True) / n
    var = jnp.maximum(jnp.sum(fm * fm, axis=1, keepdims=True) / n - mean * mean, 0.0)
    scale = gamma * jax.lax.rsqrt(var + EPS)
    return f * scale + (beta - mean * scale)


# ---------------------------------------------------------------------------
# Pallas kernel: whole forward pass, whole batch, everything resident in VMEM
# ---------------------------------------------------------------------------
def rdp_kernel(a_ref, w1_ref, w2_ref, w3_ref, fw1_ref, fw2_ref, fw3_ref, pv_ref,
               out_ref):
    NW = a_ref.shape[1]
    n = NW // SEG
    cin = a_ref.shape[0] // P1
    co1, co2, co3 = w1_ref.shape[0], w2_ref.shape[0], w3_ref.shape[0]
    d1, d2 = fw1_ref.shape[0], fw2_ref.shape[0]
    ncls = out_ref.shape[0]

    lane_m = jax.lax.broadcasted_iota(jnp.int32, (1, NW), 1) % SEG
    mask = (lane_m < M).astype(jnp.float32)      # valid coarse positions
    mask_fc = (lane_m == 0).astype(jnp.float32)  # one lane per sample (FC stats)

    # Unpack the single consolidated per-channel parameter vector.
    pv = pv_ref[...]
    off = [0]

    def take(c):
        v = pv[off[0]:off[0] + c, :]
        off[0] += c
        return v

    b1, g1, be1 = take(co1), take(co1), take(co1)
    b2, g2, be2 = take(co2), take(co2), take(co2)
    b3, g3, be3 = take(co3), take(co3), take(co3)
    fb1, fg1, fbe1 = take(d1), take(d1), take(d1)
    fb2, fg2, fbe2 = take(d2), take(d2), take(d2)
    fb3 = take(ncls)

    slab = _conv_bn_pool(a_ref[...], P1, cin, w1_ref[...], b1, g1, be1, mask, n)
    slab = _conv_bn_pool(slab, P2, co1, w2_ref[...], b2, g2, be2, mask, n)
    h = _conv_bn_pool(slab, P3, co2, w3_ref[...], b3, g3, be3, mask, n)   # (32, NW)

    # Flatten: rows of hs are (m, channel)-major; fc1 weights host-permuted to
    # match.  Lane n*SEG of the shift-by-m copy holds h[:, n*SEG + m].
    hs = jnp.concatenate([_lane_shift(h, mm) for mm in range(M)], axis=0)  # (192, NW)

    f = jnp.dot(fw1_ref[...], hs, preferred_element_type=jnp.float32) + fb1
    f = _fc_bn(jnp.maximum(f, 0.0), fg1, fbe1, mask_fc, float(n))
    f = jnp.dot(fw2_ref[...], f, preferred_element_type=jnp.float32) + fb2
    f = _fc_bn(jnp.maximum(f, 0.0), fg2, fbe2, mask_fc, float(n))

    w3 = fw3_ref[...]                                    # (32, n_class)
    if ncls == 1:
        # a 1-row MXU result is pure push/pop latency -> VPU multiply + sublane reduce
        out = jnp.sum(w3 * f, axis=0, keepdims=True) + fb3
    else:
        out = jax.lax.dot_general(w3, f, (((0,), (0,)), ((), ())),
                                  preferred_element_type=jnp.float32) + fb3
    out_ref[...] = out                                   # (n_class, N*SEG), lane-dense


# ---------------------------------------------------------------------------
# Parameter init (deterministic, synthetic) + wrapper
# ---------------------------------------------------------------------------
def init_params(key, input_channel=1, n_class=1):
    ks = jax.random.split(key, 12)
    rnd = lambda k, s, sc: jax.random.normal(k, s, jnp.float32) * sc
    p = {
        "conv1_w": rnd(ks[0], (8, input_channel, 5), 0.3),
        "conv1_b": rnd(ks[1], (8,), 0.1),
        "conv2_w": rnd(ks[2], (16, 8, 5), 0.2),
        "conv2_b": rnd(ks[3], (16,), 0.1),
        "conv3_w": rnd(ks[4], (32, 16, 5), 0.15),
        "conv3_b": rnd(ks[5], (32,), 0.1),
        "fc1_w": rnd(ks[6], (64, 192), 0.1),
        "fc1_b": rnd(ks[7], (64,), 0.05),
        "fc2_w": rnd(ks[8], (32, 64), 0.1),
        "fc2_b": rnd(ks[9], (32,), 0.05),
        "fc3_w": rnd(ks[10], (n_class, 32), 0.1),
        "fc3_b": rnd(ks[11], (n_class,), 0.05),
    }
    # BatchNorm affine params: PyTorch default init (weight=1, bias=0)
    for name, c in (("conv1_bn", 8), ("conv2_bn", 16), ("conv3_bn", 32),
                    ("fc1_bn", 64), ("fc2_bn", 32)):
        p[name + "_g"] = jnp.ones((c,), jnp.float32)
        p[name + "_b"] = jnp.zeros((c,), jnp.float32)
    return p


def rdp_1d_cnn_forward(x, p):
    """x: (N, input_channel, 162) float32 -> (N, n_class) float32."""
    N, cin, L = x.shape
    assert L == P1 * M, "rdp_1dCNN requires L == 162 (fc1 expects 32*6 features)"
    n_class = p["fc3_w"].shape[0]
    NW = N * SEG

    # Factored input slab: plane p, lane n*SEG + m holds x[n, c, 27*m + p]; the
    # pad lanes (m >= 6) are zero and double as the conv 'same' padding.
    xr = x.astype(jnp.float32).reshape(N, cin, M, P1)        # [n, c, m, p]
    xr = jnp.transpose(xr, (3, 1, 0, 2))                      # [p, c, n, m]
    xr = jnp.pad(xr, ((0, 0), (0, 0), (0, 0), (0, SEG - M)))
    a_slab = xr.reshape(P1 * cin, NW)

    wflat = lambda w: jnp.transpose(w, (0, 2, 1)).reshape(w.shape[0], -1).astype(jnp.float32)
    col = lambda v: v.astype(jnp.float32).reshape(-1, 1)

    # fc1 weight permuted for the (m, channel)-major flatten rows used in-kernel.
    fw1p = p["fc1_w"].reshape(64, 32, M).transpose(0, 2, 1).reshape(64, 192).astype(jnp.float32)

    # All per-channel bias/gamma/beta vectors packed into ONE operand
    # (previously 20 separate (C,1) arrays -> 20 DMA descriptors / padded tiles).
    pvec = jnp.concatenate([
        col(p["conv1_b"]), col(p["conv1_bn_g"]), col(p["conv1_bn_b"]),
        col(p["conv2_b"]), col(p["conv2_bn_g"]), col(p["conv2_bn_b"]),
        col(p["conv3_b"]), col(p["conv3_bn_g"]), col(p["conv3_bn_b"]),
        col(p["fc1_b"]), col(p["fc1_bn_g"]), col(p["fc1_bn_b"]),
        col(p["fc2_b"]), col(p["fc2_bn_g"]), col(p["fc2_bn_b"]),
        col(p["fc3_b"]),
    ], axis=0)

    inputs = [a_slab, wflat(p["conv1_w"]), wflat(p["conv2_w"]), wflat(p["conv3_w"]),
              fw1p, p["fc2_w"].astype(jnp.float32), p["fc3_w"].T.astype(jnp.float32),
              pvec]

    # Whole batch in one gridless call: training-mode BatchNorm couples all
    # samples through the batch statistics, and the O(N) working set fits VMEM
    # up to N ~ 1-2K samples (raise vmem_limit_bytes via CompilerParams beyond).
    out = pl.pallas_call(
        rdp_kernel,
        out_shape=jax.ShapeDtypeStruct((n_class, NW), jnp.float32),
        in_specs=[pl.BlockSpec(memory_space=pltpu.MemorySpace.VMEM)] * len(inputs),
        out_specs=pl.BlockSpec(memory_space=pltpu.MemorySpace.VMEM),
    )(*inputs)
    return out[:, ::SEG].T                                   # (N, n_class)


# ---------------------------------------------------------------------------
# Pure-JAX f32 reference (PyTorch training-mode semantics) for validation
# ---------------------------------------------------------------------------
def ref_forward(x, p):
    hi = jax.lax.Precision.HIGHEST

    def conv(y, w, b):
        y = jax.lax.conv_general_dilated(
            y, w, window_strides=(1,), padding=((2, 2),),
            dimension_numbers=("NCH", "OIH", "NCH"), precision=hi)
        return y + b[None, :, None]

    def bn_ncl(y, g, b):
        mean = jnp.mean(y, axis=(0, 2), keepdims=True)
        var = jnp.mean((y - mean) ** 2, axis=(0, 2), keepdims=True)
        return (y - mean) * jax.lax.rsqrt(var + EPS) * g[None, :, None] + b[None, :, None]

    def pool(y):
        nb, c, l = y.shape
        return y.reshape(nb, c, l // 3, 3).mean(-1)

    def bn_nc(f, g, b):
        mean = jnp.mean(f, axis=0, keepdims=True)
        var = jnp.mean((f - mean) ** 2, axis=0, keepdims=True)
        return (f - mean) * jax.lax.rsqrt(var + EPS) * g[None, :] + b[None, :]

    y = pool(bn_ncl(jax.nn.relu(conv(x, p["conv1_w"], p["conv1_b"])),
                    p["conv1_bn_g"], p["conv1_bn_b"]))
    y = pool(bn_ncl(jax.nn.relu(conv(y, p["conv2_w"], p["conv2_b"])),
                    p["conv2_bn_g"], p["conv2_bn_b"]))
    y = pool(bn_ncl(jax.nn.relu(conv(y, p["conv3_w"], p["conv3_b"])),
                    p["conv3_bn_g"], p["conv3_bn_b"]))
    f = y.reshape(y.shape[0], -1)
    f = bn_nc(jax.nn.relu(jnp.dot(f, p["fc1_w"].T, precision=hi) + p["fc1_b"]),
              p["fc1_bn_g"], p["fc1_bn_b"])
    f = bn_nc(jax.nn.relu(jnp.dot(f, p["fc2_w"].T, precision=hi) + p["fc2_b"]),
              p["fc2_bn_g"], p["fc2_bn_b"])
    return jnp.dot(f, p["fc3_w"].T, precision=hi) + p["fc3_b"]


if __name__ == "__main__":
    key = jax.random.PRNGKey(0)
    k_param, k_x = jax.random.split(key)
    params = init_params(k_param, input_channel=1, n_class=1)
    # L = 162 so that 162 -> 54 -> 18 -> 6 after the three AvgPool1d(3): 32*6 = 192 for fc1.
    x = jax.random.normal(k_x, (4, 1, 162), jnp.float32)

    y = rdp_1d_cnn_forward(x, params)
    jax.block_until_ready(y)
    assert y.shape == (4, 1)

    # Tolerance covers MXU f32 rounding; a phase/mask bug would blow way past it.
    y_ref = ref_forward(x, params)
    np.testing.assert_allclose(np.asarray(y), np.asarray(y_ref), rtol=2e-2, atol=2e-2)
    print("KERNEL_OK")
</pallas_src>

<mosaic_0001>
module attributes {stable_mosaic.version = 11 : i64} {
  func.func @rdp_kernel(%arg0: memref<27x32xf32, #tpu.memory_space<vmem>>, %arg1: memref<8x5xf32, #tpu.memory_space<vmem>>, %arg2: memref<16x40xf32, #tpu.memory_space<vmem>>, %arg3: memref<32x80xf32, #tpu.memory_space<vmem>>, %arg4: memref<64x192xf32, #tpu.memory_space<vmem>>, %arg5: memref<32x64xf32, #tpu.memory_space<vmem>>, %arg6: memref<32x1xf32, #tpu.memory_space<vmem>>, %arg7: memref<457x1xf32, #tpu.memory_space<vmem>>, %arg8: memref<1x32xf32, #tpu.memory_space<vmem>>) attributes {dimension_semantics = [], scalar_prefetch = 0 : i64, scratch_operands = 0 : i64, tpu.core_type = #tpu.core_type<tc>} {
    %0 = tpu.iota {dimensions = array<i32: 1>} : vector<1x32xi32>
    %c8_i32 = arith.constant 8 : i32
    %c0_i32 = arith.constant 0 : i32
    %1 = arith.cmpi eq, %c8_i32, %c0_i32 : i32
    %c1_i32 = arith.constant 1 : i32
    %2 = arith.select %1, %c1_i32, %c8_i32 : i32
    %3 = vector.broadcast %2 : i32 to vector<1x32xi32>
    %4 = arith.remsi %0, %3 : vector<1x32xi32>
    %c0_i32_0 = arith.constant 0 : i32
    %5 = vector.broadcast %c0_i32_0 : i32 to vector<1x32xi32>
    %6 = arith.cmpi ne, %4, %5 : vector<1x32xi32>
    %c0_i32_1 = arith.constant 0 : i32
    %7 = vector.broadcast %c0_i32_1 : i32 to vector<1x32xi32>
    %8 = arith.cmpi slt, %4, %7 : vector<1x32xi32>
    %c0_i32_2 = arith.constant 0 : i32
    %9 = arith.cmpi slt, %2, %c0_i32_2 : i32
    %10 = vector.broadcast %9 : i1 to vector<1x32xi1>
    %11 = vector.broadcast %10 : vector<1x32xi1> to vector<1x32xi1>
    %12 = arith.xori %8, %11 : vector<1x32xi1>
    %13 = arith.andi %12, %6 : vector<1x32xi1>
    %14 = vector.broadcast %2 : i32 to vector<1x32xi32>
    %15 = arith.addi %4, %14 : vector<1x32xi32>
    %16 = arith.select %13, %15, %4 : vector<1x32xi1>, vector<1x32xi32>
    %c6_i32 = arith.constant 6 : i32
    %17 = vector.broadcast %c6_i32 : i32 to vector<1x32xi32>
    %18 = arith.cmpi slt, %16, %17 : vector<1x32xi32>
    %19 = arith.extui %18 : vector<1x32xi1> to vector<1x32xi32>
    %20 = arith.sitofp %19 : vector<1x32xi32> to vector<1x32xf32>
    %c0_i32_3 = arith.constant 0 : i32
    %21 = vector.broadcast %c0_i32_3 : i32 to vector<1x32xi32>
    %22 = arith.cmpi eq, %16, %21 : vector<1x32xi32>
    %23 = arith.extui %22 : vector<1x32xi1> to vector<1x32xi32>
    %24 = arith.sitofp %23 : vector<1x32xi32> to vector<1x32xf32>
    %c0 = arith.constant 0 : index
    %c0_4 = arith.constant 0 : index
    %25 = vector.load %arg7[%c0, %c0_4] : memref<457x1xf32, #tpu.memory_space<vmem>>, vector<457x1xf32>
    %26 = vector.extract_strided_slice %25 {offsets = [0, 0], sizes = [8, 1], strides = [1, 1]} : vector<457x1xf32> to vector<8x1xf32>
    %27 = vector.extract_strided_slice %25 {offsets = [8, 0], sizes = [8, 1], strides = [1, 1]} : vector<457x1xf32> to vector<8x1xf32>
    %28 = vector.extract_strided_slice %25 {offsets = [16, 0], sizes = [8, 1], strides = [1, 1]} : vector<457x1xf32> to vector<8x1xf32>
    %29 = vector.extract_strided_slice %25 {offsets = [24, 0], sizes = [16, 1], strides = [1, 1]} : vector<457x1xf32> to vector<16x1xf32>
    %30 = vector.extract_strided_slice %25 {offsets = [40, 0], sizes = [16, 1], strides = [1, 1]} : vector<457x1xf32> to vector<16x1xf32>
    %31 = vector.extract_strided_slice %25 {offsets = [56, 0], sizes = [16, 1], strides = [1, 1]} : vector<457x1xf32> to vector<16x1xf32>
    %32 = vector.extract_strided_slice %25 {offsets = [72, 0], sizes = [32, 1], strides = [1, 1]} : vector<457x1xf32> to vector<32x1xf32>
    %33 = vector.extract_strided_slice %25 {offsets = [104, 0], sizes = [32, 1], strides = [1, 1]} : vector<457x1xf32> to vector<32x1xf32>
    %34 = vector.extract_strided_slice %25 {offsets = [136, 0], sizes = [32, 1], strides = [1, 1]} : vector<457x1xf32> to vector<32x1xf32>
    %35 = vector.extract_strided_slice %25 {offsets = [168, 0], sizes = [64, 1], strides = [1, 1]} : vector<457x1xf32> to vector<64x1xf32>
    %36 = vector.extract_strided_slice %25 {offsets = [232, 0], sizes = [64, 1], strides = [1, 1]} : vector<457x1xf32> to vector<64x1xf32>
    %37 = vector.extract_strided_slice %25 {offsets = [296, 0], sizes = [64, 1], strides = [1, 1]} : vector<457x1xf32> to vector<64x1xf32>
    %38 = vector.extract_strided_slice %25 {offsets = [360, 0], sizes = [32, 1], strides = [1, 1]} : vector<457x1xf32> to vector<32x1xf32>
    %39 = vector.extract_strided_slice %25 {offsets = [392, 0], sizes = [32, 1], strides = [1, 1]} : vector<457x1xf32> to vector<32x1xf32>
    %40 = vector.extract_strided_slice %25 {offsets = [424, 0], sizes = [32, 1], strides = [1, 1]} : vector<457x1xf32> to vector<32x1xf32>
    %41 = vector.extract_strided_slice %25 {offsets = [456, 0], sizes = [1, 1], strides = [1, 1]} : vector<457x1xf32> to vector<1x1xf32>
    %c0_5 = arith.constant 0 : index
    %c0_6 = arith.constant 0 : index
    %42 = vector.load %arg0[%c0_5, %c0_6] : memref<27x32xf32, #tpu.memory_space<vmem>>, vector<27x32xf32>
    %c0_7 = arith.constant 0 : index
    %c0_8 = arith.constant 0 : index
    %43 = vector.load %arg1[%c0_7, %c0_8] : memref<8x5xf32, #tpu.memory_space<vmem>>, vector<8x5xf32>
    %cst = arith.constant 0.000000e+00 : f32
    %44 = vector.broadcast %cst : f32 to vector<8x1xf32>
    %cst_9 = arith.constant 0.000000e+00 : f32
    %45 = vector.broadcast %cst_9 : f32 to vector<8x1xf32>
    %46 = vector.extract_strided_slice %42 {offsets = [25, 0], sizes = [1, 32], strides = [1, 1]} : vector<27x32xf32> to vector<1x32xf32>
    %cst_10 = arith.constant 0.000000e+00 : f32
    %47 = vector.broadcast %cst_10 : f32 to vector<1x1xf32>
    %48 = vector.extract_strided_slice %46 {offsets = [0, 0], sizes = [1, 31], strides = [1, 1]} : vector<1x32xf32> to vector<1x31xf32>
    %49 = tpu.concatenate %47, %48 in 1 : vector<1x1xf32>, vector<1x31xf32> -> vector<1x32xf32>
    %50 = vector.extract_strided_slice %42 {offsets = [26, 0], sizes = [1, 32], strides = [1, 1]} : vector<27x32xf32> to vector<1x32xf32>
    %cst_11 = arith.constant 0.000000e+00 : f32
    %51 = vector.broadcast %cst_11 : f32 to vector<1x1xf32>
    %52 = vector.extract_strided_slice %50 {offsets = [0, 0], sizes = [1, 31], strides = [1, 1]} : vector<1x32xf32> to vector<1x31xf32>
    %53 = tpu.concatenate %51, %52 in 1 : vector<1x1xf32>, vector<1x31xf32> -> vector<1x32xf32>
    %54 = vector.extract_strided_slice %42 {offsets = [0, 0], sizes = [1, 32], strides = [1, 1]} : vector<27x32xf32> to vector<1x32xf32>
    %55 = vector.extract_strided_slice %42 {offsets = [1, 0], sizes = [1, 32], strides = [1, 1]} : vector<27x32xf32> to vector<1x32xf32>
    %56 = vector.extract_strided_slice %42 {offsets = [2, 0], sizes = [1, 32], strides = [1, 1]} : vector<27x32xf32> to vector<1x32xf32>
    %57 = tpu.concatenate %49, %53, %54, %55, %56 in 0 : vector<1x32xf32>, vector<1x32xf32>, vector<1x32xf32>, vector<1x32xf32>, vector<1x32xf32> -> vector<5x32xf32>
    %cst_12 = arith.constant dense<0.000000e+00> : vector<8x32xf32>
    %58 = tpu.matmul %43, %57, %cst_12 {dimension_numbers = #tpu.dot_dimension_numbers<[1], [0], [0], [1], [0, 0, 1, 1], [], []>} : vector<8x5xf32>, vector<5x32xf32>, vector<8x32xf32> -> vector<8x32xf32>
    %59 = vector.broadcast %26 : vector<8x1xf32> to vector<8x32xf32>
    %60 = arith.addf %58, %59 : vector<8x32xf32>
    %cst_13 = arith.constant 0.000000e+00 : f32
    %61 = vector.broadcast %cst_13 : f32 to vector<8x32xf32>
    %62 = arith.maximumf %60, %61 : vector<8x32xf32>
    %63 = vector.broadcast %20 : vector<1x32xf32> to vector<8x32xf32>
    %64 = arith.mulf %62, %63 : vector<8x32xf32>
    %cst_14 = arith.constant dense<0.000000e+00> : vector<8xf32>
    %65 = vector.multi_reduction <add>, %64, %cst_14 [1] : vector<8x32xf32> to vector<8xf32>
    %66 = vector.shape_cast %65 : vector<8xf32> to vector<8x1xf32>
    %67 = arith.addf %44, %66 : vector<8x1xf32>
    %68 = arith.mulf %64, %64 : vector<8x32xf32>
    %cst_15 = arith.constant dense<0.000000e+00> : vector<8xf32>
    %69 = vector.multi_reduction <add>, %68, %cst_15 [1] : vector<8x32xf32> to vector<8xf32>
    %70 = vector.shape_cast %69 : vector<8xf32> to vector<8x1xf32>
    %71 = arith.addf %45, %70 : vector<8x1xf32>
    %72 = vector.extract_strided_slice %42 {offsets = [26, 0], sizes = [1, 32], strides = [1, 1]} : vector<27x32xf32> to vector<1x32xf32>
    %cst_16 = arith.constant 0.000000e+00 : f32
    %73 = vector.broadcast %cst_16 : f32 to vector<1x1xf32>
    %74 = vector.extract_strided_slice %72 {offsets = [0, 0], sizes = [1, 31], strides = [1, 1]} : vector<1x32xf32> to vector<1x31xf32>
    %75 = tpu.concatenate %73, %74 in 1 : vector<1x1xf32>, vector<1x31xf32> -> vector<1x32xf32>
    %76 = vector.extract_strided_slice %42 {offsets = [0, 0], sizes = [1, 32], strides = [1, 1]} : vector<27x32xf32> to vector<1x32xf32>
    %77 = vector.extract_strided_slice %42 {offsets = [1, 0], sizes = [1, 32], strides = [1, 1]} : vector<27x32xf32> to vector<1x32xf32>
    %78 = vector.extract_strided_slice %42 {offsets = [2, 0], sizes = [1, 32], strides = [1, 1]} : vector<27x32xf32> to vector<1x32xf32>
    %79 = vector.extract_strided_slice %42 {offsets = [3, 0], sizes = [1, 32], strides = [1, 1]} : vector<27x32xf32> to vector<1x32xf32>
    %80 = tpu.concatenate %75, %76, %77, %78, %79 in 0 : vector<1x32xf32>, vector<1x32xf32>, vector<1x32xf32>, vector<1x32xf32>, vector<1x32xf32> -> vector<5x32xf32>
    %cst_17 = arith.constant dense<0.000000e+00> : vector<8x32xf32>
    %81 = tpu.matmul %43, %80, %cst_17 {dimension_numbers = #tpu.dot_dimension_numbers<[1], [0], [0], [1], [0, 0, 1, 1], [], []>} : vector<8x5xf32>, vector<5x32xf32>, vector<8x32xf32> -> vector<8x32xf32>
    %82 = vector.broadcast %26 : vector<8x1xf32> to vector<8x32xf32>
    %83 = arith.addf %81, %82 : vector<8x32xf32>
    %cst_18 = arith.constant 0.000000e+00 : f32
    %84 = vector.broadcast %cst_18 : f32 to vector<8x32xf32>
    %85 = arith.maximumf %83, %84 : vector<8x32xf32>
    %86 = vector.broadcast %20 : vector<1x32xf32> to vector<8x32xf32>
    %87 = arith.mulf %85, %86 : vector<8x32xf32>
    %cst_19 = arith.constant dense<0.000000e+00> : vector<8xf32>
    %88 = vector.multi_reduction <add>, %87, %cst_19 [1] : vector<8x32xf32> to vector<8xf32>
    %89 = vector.shape_cast %88 : vector<8xf32> to vector<8x1xf32>
    %90 = arith.addf %67, %89 : vector<8x1xf32>
    %91 = arith.mulf %87, %87 : vector<8x32xf32>
    %cst_20 = arith.constant dense<0.000000e+00> : vector<8xf32>
    %92 = vector.multi_reduction <add>, %91, %cst_20 [1] : vector<8x32xf32> to vector<8xf32>
    %93 = vector.shape_cast %92 : vector<8xf32> to vector<8x1xf32>
    %94 = arith.addf %71, %93 : vector<8x1xf32>
    %95 = vector.extract_strided_slice %42 {offsets = [0, 0], sizes = [5, 32], strides = [1, 1]} : vector<27x32xf32> to vector<5x32xf32>
    %cst_21 = arith.constant dense<0.000000e+00> : vector<8x32xf32>
    %96 = tpu.matmul %43, %95, %cst_21 {dimension_numbers = #tpu.dot_dimension_numbers<[1], [0], [0], [1], [0, 0, 1, 1], [], []>} : vector<8x5xf32>, vector<5x32xf32>, vector<8x32xf32> -> vector<8x32xf32>
    %97 = vector.broadcast %26 : vector<8x1xf32> to vector<8x32xf32>
    %98 = arith.addf %96, %97 : vector<8x32xf32>
    %cst_22 = arith.constant 0.000000e+00 : f32
    %99 = vector.broadcast %cst_22 : f32 to vector<8x32xf32>
    %100 = arith.maximumf %98, %99 : vector<8x32xf32>
    %101 = vector.broadcast %20 : vector<1x32xf32> to vector<8x32xf32>
    %102 = arith.mulf %100, %101 : vector<8x32xf32>
    %cst_23 = arith.constant dense<0.000000e+00> : vector<8xf32>
    %103 = vector.multi_reduction <add>, %102, %cst_23 [1] : vector<8x32xf32> to vector<8xf32>
    %104 = vector.shape_cast %103 : vector<8xf32> to vector<8x1xf32>
    %105 = arith.addf %90, %104 : vector<8x1xf32>
    %106 = arith.mulf %102, %102 : vector<8x32xf32>
    %cst_24 = arith.constant dense<0.000000e+00> : vector<8xf32>
    %107 = vector.multi_reduction <add>, %106, %cst_24 [1] : vector<8x32xf32> to vector<8xf32>
    %108 = vector.shape_cast %107 : vector<8xf32> to vector<8x1xf32>
    %109 = arith.addf %94, %108 : vector<8x1xf32>
    %110 = vector.extract_strided_slice %42 {offsets = [1, 0], sizes = [5, 32], strides = [1, 1]} : vector<27x32xf32> to vector<5x32xf32>
    %cst_25 = arith.constant dense<0.000000e+00> : vector<8x32xf32>
    %111 = tpu.matmul %43, %110, %cst_25 {dimension_numbers = #tpu.dot_dimension_numbers<[1], [0], [0], [1], [0, 0, 1, 1], [], []>} : vector<8x5xf32>, vector<5x32xf32>, vector<8x32xf32> -> vector<8x32xf32>
    %112 = vector.broadcast %26 : vector<8x1xf32> to vector<8x32xf32>
    %113 = arith.addf %111, %112 : vector<8x32xf32>
    %cst_26 = arith.constant 0.000000e+00 : f32
    %114 = vector.broadcast %cst_26 : f32 to vector<8x32xf32>
    %115 = arith.maximumf %113, %114 : vector<8x32xf32>
    %116 = vector.broadcast %20 : vector<1x32xf32> to vector<8x32xf32>
    %117 = arith.mulf %115, %116 : vector<8x32xf32>
    %cst_27 = arith.constant dense<0.000000e+00> : vector<8xf32>
    %118 = vector.multi_reduction <add>, %117, %cst_27 [1] : vector<8x32xf32> to vector<8xf32>
    %119 = vector.shape_cast %118 : vector<8xf32> to vector<8x1xf32>
    %120 = arith.addf %105, %119 : vector<8x1xf32>
    %121 = arith.mulf %117, %117 : vector<8x32xf32>
    %cst_28 = arith.constant dense<0.000000e+00> : vector<8xf32>
    %122 = vector.multi_reduction <add>, %121, %cst_28 [1] : vector<8x32xf32> to vector<8xf32>
    %123 = vector.shape_cast %122 : vector<8xf32> to vector<8x1xf32>
    %124 = arith.addf %109, %123 : vector<8x1xf32>
    %125 = vector.extract_strided_slice %42 {offsets = [2, 0], sizes = [5, 32], strides = [1, 1]} : vector<27x32xf32> to vector<5x32xf32>
    %cst_29 = arith.constant dense<0.000000e+00> : vector<8x32xf32>
    %126 = tpu.matmul %43, %125, %cst_29 {dimension_numbers = #tpu.dot_dimension_numbers<[1], [0], [0], [1], [0, 0, 1, 1], [], []>} : vector<8x5xf32>, vector<5x32xf32>, vector<8x32xf32> -> vector<8x32xf32>
    %127 = vector.broadcast %26 : vector<8x1xf32> to vector<8x32xf32>
    %128 = arith.addf %126, %127 : vector<8x32xf32>
    %cst_30 = arith.constant 0.000000e+00 : f32
    %129 = vector.broadcast %cst_30 : f32 to vector<8x32xf32>
    %130 = arith.maximumf %128, %129 : vector<8x32xf32>
    %131 = vector.broadcast %20 : vector<1x32xf32> to vector<8x32xf32>
    %132 = arith.mulf %130, %131 : vector<8x32xf32>
    %cst_31 = arith.constant dense<0.000000e+00> : vector<8xf32>
    %133 = vector.multi_reduction <add>, %132, %cst_31 [1] : vector<8x32xf32> to vector<8xf32>
    %134 = vector.shape_cast %133 : vector<8xf32> to vector<8x1xf32>
    %135 = arith.addf %120, %134 : vector<8x1xf32>
    %136 = arith.mulf %132, %132 : vector<8x32xf32>
    %cst_32 = arith.constant dense<0.000000e+00> : vector<8xf32>
    %137 = vector.multi_reduction <add>, %136, %cst_32 [1] : vector<8x32xf32> to vector<8xf32>
    %138 = vector.shape_cast %137 : vector<8xf32> to vector<8x1xf32>
    %139 = arith.addf %124, %138 : vector<8x1xf32>
    %140 = vector.extract_strided_slice %42 {offsets = [3, 0], sizes = [5, 32], strides = [1, 1]} : vector<27x32xf32> to vector<5x32xf32>
    %cst_33 = arith.constant dense<0.000000e+00> : vector<8x32xf32>
    %141 = tpu.matmul %43, %140, %cst_33 {dimension_numbers = #tpu.dot_dimension_numbers<[1], [0], [0], [1], [0, 0, 1, 1], [], []>} : vector<8x5xf32>, vector<5x32xf32>, vector<8x32xf32> -> vector<8x32xf32>
    %142 = vector.broadcast %26 : vector<8x1xf32> to vector<8x32xf32>
    %143 = arith.addf %141, %142 : vector<8x32xf32>
    %cst_34 = arith.constant 0.000000e+00 : f32
    %144 = vector.broadcast %cst_34 : f32 to vector<8x32xf32>
    %145 = arith.maximumf %143, %144 : vector<8x32xf32>
    %146 = vector.broadcast %20 : vector<1x32xf32> to vector<8x32xf32>
    %147 = arith.mulf %145, %146 : vector<8x32xf32>
    %cst_35 = arith.constant dense<0.000000e+00> : vector<8xf32>
    %148 = vector.multi_reduction <add>, %147, %cst_35 [1] : vector<8x32xf32> to vector<8xf32>
    %149 = vector.shape_cast %148 : vector<8xf32> to vector<8x1xf32>
    %150 = arith.addf %135, %149 : vector<8x1xf32>
    %151 = arith.mulf %147, %147 : vector<8x32xf32>
    %cst_36 = arith.constant dense<0.000000e+00> : vector<8xf32>
    %152 = vector.multi_reduction <add>, %151, %cst_36 [1] : vector<8x32xf32> to vector<8xf32>
    %153 = vector.shape_cast %152 : vector<8xf32> to vector<8x1xf32>
    %154 = arith.addf %139, %153 : vector<8x1xf32>
    %155 = vector.extract_strided_slice %42 {offsets = [4, 0], sizes = [5, 32], strides = [1, 1]} : vector<27x32xf32> to vector<5x32xf32>
    %cst_37 = arith.constant dense<0.000000e+00> : vector<8x32xf32>
    %156 = tpu.matmul %43, %155, %cst_37 {dimension_numbers = #tpu.dot_dimension_numbers<[1], [0], [0], [1], [0, 0, 1, 1], [], []>} : vector<8x5xf32>, vector<5x32xf32>, vector<8x32xf32> -> vector<8x32xf32>
    %157 = vector.broadcast %26 : vector<8x1xf32> to vector<8x32xf32>
    %158 = arith.addf %156, %157 : vector<8x32xf32>
    %cst_38 = arith.constant 0.000000e+00 : f32
    %159 = vector.broadcast %cst_38 : f32 to vector<8x32xf32>
    %160 = arith.maximumf %158, %159 : vector<8x32xf32>
    %161 = vector.broadcast %20 : vector<1x32xf32> to vector<8x32xf32>
    %162 = arith.mulf %160, %161 : vector<8x32xf32>
    %cst_39 = arith.constant dense<0.000000e+00> : vector<8xf32>
    %163 = vector.multi_reduction <add>, %162, %cst_39 [1] : vector<8x32xf32> to vector<8xf32>
    %164 = vector.shape_cast %163 : vector<8xf32> to vector<8x1xf32>
    %165 = arith.addf %150, %164 : vector<8x1xf32>
    %166 = arith.mulf %162, %162 : vector<8x32xf32>
    %cst_40 = arith.constant dense<0.000000e+00> : vector<8xf32>
    %167 = vector.multi_reduction <add>, %166, %cst_40 [1] : vector<8x32xf32> to vector<8xf32>
    %168 = vector.shape_cast %167 : vector<8xf32> to vector<8x1xf32>
    %169 = arith.addf %154, %168 : vector<8x1xf32>
    %170 = vector.extract_strided_slice %42 {offsets = [5, 0], sizes = [5, 32], strides = [1, 1]} : vector<27x32xf32> to vector<5x32xf32>
    %cst_41 = arith.constant dense<0.000000e+00> : vector<8x32xf32>
    %171 = tpu.matmul %43, %170, %cst_41 {dimension_numbers = #tpu.dot_dimension_numbers<[1], [0], [0], [1], [0, 0, 1, 1], [], []>} : vector<8x5xf32>, vector<5x32xf32>, vector<8x32xf32> -> vector<8x32xf32>
    %172 = vector.broadcast %26 : vector<8x1xf32> to vector<8x32xf32>
    %173 = arith.addf %171, %172 : vector<8x32xf32>
    %cst_42 = arith.constant 0.000000e+00 : f32
    %174 = vector.broadcast %cst_42 : f32 to vector<8x32xf32>
    %175 = arith.maximumf %173, %174 : vector<8x32xf32>
    %176 = vector.broadcast %20 : vector<1x32xf32> to vector<8x32xf32>
    %177 = arith.mulf %175, %176 : vector<8x32xf32>
    %cst_43 = arith.constant dense<0.000000e+00> : vector<8xf32>
    %178 = vector.multi_reduction <add>, %177, %cst_43 [1] : vector<8x32xf32> to vector<8xf32>
    %179 = vector.shape_cast %178 : vector<8xf32> to vector<8x1xf32>
    %180 = arith.addf %165, %179 : vector<8x1xf32>
    %181 = arith.mulf %177, %177 : vector<8x32xf32>
    %cst_44 = arith.constant dense<0.000000e+00> : vector<8xf32>
    %182 = vector.multi_reduction <add>, %181, %cst_44 [1] : vector<8x32xf32> to vector<8xf32>
    %183 = vector.shape_cast %182 : vector<8xf32> to vector<8x1xf32>
    %184 = arith.addf %169, %183 : vector<8x1xf32>
    %185 = vector.extract_strided_slice %42 {offsets = [6, 0], sizes = [5, 32], strides = [1, 1]} : vector<27x32xf32> to vector<5x32xf32>
    %cst_45 = arith.constant dense<0.000000e+00> : vector<8x32xf32>
    %186 = tpu.matmul %43, %185, %cst_45 {dimension_numbers = #tpu.dot_dimension_numbers<[1], [0], [0], [1], [0, 0, 1, 1], [], []>} : vector<8x5xf32>, vector<5x32xf32>, vector<8x32xf32> -> vector<8x32xf32>
    %187 = vector.broadcast %26 : vector<8x1xf32> to vector<8x32xf32>
    %188 = arith.addf %186, %187 : vector<8x32xf32>
    %cst_46 = arith.constant 0.000000e+00 : f32
    %189 = vector.broadcast %cst_46 : f32 to vector<8x32xf32>
    %190 = arith.maximumf %188, %189 : vector<8x32xf32>
    %191 = vector.broadcast %20 : vector<1x32xf32> to vector<8x32xf32>
    %192 = arith.mulf %190, %191 : vector<8x32xf32>
    %cst_47 = arith.constant dense<0.000000e+00> : vector<8xf32>
    %193 = vector.multi_reduction <add>, %192, %cst_47 [1] : vector<8x32xf32> to vector<8xf32>
    %194 = vector.shape_cast %193 : vector<8xf32> to vector<8x1xf32>
    %195 = arith.addf %180, %194 : vector<8x1xf32>
    %196 = arith.mulf %192, %192 : vector<8x32xf32>
    %cst_48 = arith.constant dense<0.000000e+00> : vector<8xf32>
    %197 = vector.multi_reduction <add>, %196, %cst_48 [1] : vector<8x32xf32> to vector<8xf32>
    %198 = vector.shape_cast %197 : vector<8xf32> to vector<8x1xf32>
    %199 = arith.addf %184, %198 : vector<8x1xf32>
    %200 = vector.extract_strided_slice %42 {offsets = [7, 0], sizes = [5, 32], strides = [1, 1]} : vector<27x32xf32> to vector<5x32xf32>
    %cst_49 = arith.constant dense<0.000000e+00> : vector<8x32xf32>
    %201 = tpu.matmul %43, %200, %cst_49 {dimension_numbers = #tpu.dot_dimension_numbers<[1], [0], [0], [1], [0, 0, 1, 1], [], []>} : vector<8x5xf32>, vector<5x32xf32>, vector<8x32xf32> -> vector<8x32xf32>
    %202 = vector.broadcast %26 : vector<8x1xf32> to vector<8x32xf32>
    %203 = arith.addf %201, %202 : vector<8x32xf32>
    %cst_50 = arith.constant 0.000000e+00 : f32
    %204 = vector.broadcast %cst_50 : f32 to vector<8x32xf32>
    %205 = arith.maximumf %203, %204 : vector<8x32xf32>
    %206 = vector.broadcast %20 : vector<1x32xf32> to vector<8x32xf32>
    %207 = arith.mulf %205, %206 : vector<8x32xf32>
    %cst_51 = arith.constant dense<0.000000e+00> : vector<8xf32>
    %208 = vector.multi_reduction <add>, %207, %cst_51 [1] : vector<8x32xf32> to vector<8xf32>
    %209 = vector.shape_cast %208 : vector<8xf32> to vector<8x1xf32>
    %210 = arith.addf %195, %209 : vector<8x1xf32>
    %211 = arith.mulf %207, %207 : vector<8x32xf32>
    %cst_52 = arith.constant dense<0.000000e+00> : vector<8xf32>
    %212 = vector.multi_reduction <add>, %211, %cst_52 [1] : vector<8x32xf32> to vector<8xf32>
    %213 = vector.shape_cast %212 : vector<8xf32> to vector<8x1xf32>
    %214 = arith.addf %199, %213 : vector<8x1xf32>
    %215 = vector.extract_strided_slice %42 {offsets = [8, 0], sizes = [5, 32], strides = [1, 1]} : vector<27x32xf32> to vector<5x32xf32>
    %cst_53 = arith.constant dense<0.000000e+00> : vector<8x32xf32>
    %216 = tpu.matmul %43, %215, %cst_53 {dimension_numbers = #tpu.dot_dimension_numbers<[1], [0], [0], [1], [0, 0, 1, 1], [], []>} : vector<8x5xf32>, vector<5x32xf32>, vector<8x32xf32> -> vector<8x32xf32>
    %217 = vector.broadcast %26 : vector<8x1xf32> to vector<8x32xf32>
    %218 = arith.addf %216, %217 : vector<8x32xf32>
    %cst_54 = arith.constant 0.000000e+00 : f32
    %219 = vector.broadcast %cst_54 : f32 to vector<8x32xf32>
    %220 = arith.maximumf %218, %219 : vector<8x32xf32>
    %221 = vector.broadcast %20 : vector<1x32xf32> to vector<8x32xf32>
    %222 = arith.mulf %220, %221 : vector<8x32xf32>
    %cst_55 = arith.constant dense<0.000000e+00> : vector<8xf32>
    %223 = vector.multi_reduction <add>, %222, %cst_55 [1] : vector<8x32xf32> to vector<8xf32>
    %224 = vector.shape_cast %223 : vector<8xf32> to vector<8x1xf32>
    %225 = arith.addf %210, %224 : vector<8x1xf32>
    %226 = arith.mulf %222, %222 : vector<8x32xf32>
    %cst_56 = arith.constant dense<0.000000e+00> : vector<8xf32>
    %227 = vector.multi_reduction <add>, %226, %cst_56 [1] : vector<8x32xf32> to vector<8xf32>
    %228 = vector.shape_cast %227 : vector<8xf32> to vector<8x1xf32>
    %229 = arith.addf %214, %228 : vector<8x1xf32>
    %230 = vector.extract_strided_slice %42 {offsets = [9, 0], sizes = [5, 32], strides = [1, 1]} : vector<27x32xf32> to vector<5x32xf32>
    %cst_57 = arith.constant dense<0.000000e+00> : vector<8x32xf32>
    %231 = tpu.matmul %43, %230, %cst_57 {dimension_numbers = #tpu.dot_dimension_numbers<[1], [0], [0], [1], [0, 0, 1, 1], [], []>} : vector<8x5xf32>, vector<5x32xf32>, vector<8x32xf32> -> vector<8x32xf32>
    %232 = vector.broadcast %26 : vector<8x1xf32> to vector<8x32xf32>
    %233 = arith.addf %231, %232 : vector<8x32xf32>
    %cst_58 = arith.constant 0.000000e+00 : f32
    %234 = vector.broadcast %cst_58 : f32 to vector<8x32xf32>
    %235 = arith.maximumf %233, %234 : vector<8x32xf32>
    %236 = vector.broadcast %20 : vector<1x32xf32> to vector<8x32xf32>
    %237 = arith.mulf %235, %236 : vector<8x32xf32>
    %cst_59 = arith.constant dense<0.000000e+00> : vector<8xf32>
    %238 = vector.multi_reduction <add>, %237, %cst_59 [1] : vector<8x32xf32> to vector<8xf32>
    %239 = vector.shape_cast %238 : vector<8xf32> to vector<8x1xf32>
    %240 = arith.addf %225, %239 : vector<8x1xf32>
    %241 = arith.mulf %237, %237 : vector<8x32xf32>
    %cst_60 = arith.constant dense<0.000000e+00> : vector<8xf32>
    %242 = vector.multi_reduction <add>, %241, %cst_60 [1] : vector<8x32xf32> to vector<8xf32>
    %243 = vector.shape_cast %242 : vector<8xf32> to vector<8x1xf32>
    %244 = arith.addf %229, %243 : vector<8x1xf32>
    %245 = vector.extract_strided_slice %42 {offsets = [10, 0], sizes = [5, 32], strides = [1, 1]} : vector<27x32xf32> to vector<5x32xf32>
    %cst_61 = arith.constant dense<0.000000e+00> : vector<8x32xf32>
    %246 = tpu.matmul %43, %245, %cst_61 {dimension_numbers = #tpu.dot_dimension_numbers<[1], [0], [0], [1], [0, 0, 1, 1], [], []>} : vector<8x5xf32>, vector<5x32xf32>, vector<8x32xf32> -> vector<8x32xf32>
    %247 = vector.broadcast %26 : vector<8x1xf32> to vector<8x32xf32>
    %248 = arith.addf %246, %247 : vector<8x32xf32>
    %cst_62 = arith.constant 0.000000e+00 : f32
    %249 = vector.broadcast %cst_62 : f32 to vector<8x32xf32>
    %250 = arith.maximumf %248, %249 : vector<8x32xf32>
    %251 = vector.broadcast %20 : vector<1x32xf32> to vector<8x32xf32>
    %252 = arith.mulf %250, %251 : vector<8x32xf32>
    %cst_63 = arith.constant dense<0.000000e+00> : vector<8xf32>
    %253 = vector.multi_reduction <add>, %252, %cst_63 [1] : vector<8x32xf32> to vector<8xf32>
    %254 = vector.shape_cast %253 : vector<8xf32> to vector<8x1xf32>
    %255 = arith.addf %240, %254 : vector<8x1xf32>
    %256 = arith.mulf %252, %252 : vector<8x32xf32>
    %cst_64 = arith.constant dense<0.000000e+00> : vector<8xf32>
    %257 = vector.multi_reduction <add>, %256, %cst_64 [1] : vector<8x32xf32> to vector<8xf32>
    %258 = vector.shape_cast %257 : vector<8xf32> to vector<8x1xf32>
    %259 = arith.addf %244, %258 : vector<8x1xf32>
    %260 = vector.extract_strided_slice %42 {offsets = [11, 0], sizes = [5, 32], strides = [1, 1]} : vector<27x32xf32> to vector<5x32xf32>
    %cst_65 = arith.constant dense<0.000000e+00> : vector<8x32xf32>
    %261 = tpu.matmul %43, %260, %cst_65 {dimension_numbers = #tpu.dot_dimension_numbers<[1], [0], [0], [1], [0, 0, 1, 1], [], []>} : vector<8x5xf32>, vector<5x32xf32>, vector<8x32xf32> -> vector<8x32xf32>
    %262 = vector.broadcast %26 : vector<8x1xf32> to vector<8x32xf32>
    %263 = arith.addf %261, %262 : vector<8x32xf32>
    %cst_66 = arith.constant 0.000000e+00 : f32
    %264 = vector.broadcast %cst_66 : f32 to vector<8x32xf32>
    %265 = arith.maximumf %263, %264 : vector<8x32xf32>
    %266 = vector.broadcast %20 : vector<1x32xf32> to vector<8x32xf32>
    %267 = arith.mulf %265, %266 : vector<8x32xf32>
    %cst_67 = arith.constant dense<0.000000e+00> : vector<8xf32>
    %268 = vector.multi_reduction <add>, %267, %cst_67 [1] : vector<8x32xf32> to vector<8xf32>
    %269 = vector.shape_cast %268 : vector<8xf32> to vector<8x1xf32>
    %270 = arith.addf %255, %269 : vector<8x1xf32>
    %271 = arith.mulf %267, %267 : vector<8x32xf32>
    %cst_68 = arith.constant dense<0.000000e+00> : vector<8xf32>
    %272 = vector.multi_reduction <add>, %271, %cst_68 [1] : vector<8x32xf32> to vector<8xf32>
    %273 = vector.shape_cast %272 : vector<8xf32> to vector<8x1xf32>
    %274 = arith.addf %259, %273 : vector<8x1xf32>
    %275 = vector.extract_strided_slice %42 {offsets = [12, 0], sizes = [5, 32], strides = [1, 1]} : vector<27x32xf32> to vector<5x32xf32>
    %cst_69 = arith.constant dense<0.000000e+00> : vector<8x32xf32>
    %276 = tpu.matmul %43, %275, %cst_69 {dimension_numbers = #tpu.dot_dimension_numbers<[1], [0], [0], [1], [0, 0, 1, 1], [], []>} : vector<8x5xf32>, vector<5x32xf32>, vector<8x32xf32> -> vector<8x32xf32>
    %277 = vector.broadcast %26 : vector<8x1xf32> to vector<8x32xf32>
    %278 = arith.addf %276, %277 : vector<8x32xf32>
    %cst_70 = arith.constant 0.000000e+00 : f32
    %279 = vector.broadcast %cst_70 : f32 to vector<8x32xf32>
    %280 = arith.maximumf %278, %279 : vector<8x32xf32>
    %281 = vector.broadcast %20 : vector<1x32xf32> to vector<8x32xf32>
    %282 = arith.mulf %280, %281 : vector<8x32xf32>
    %cst_71 = arith.constant dense<0.000000e+00> : vector<8xf32>
    %283 = vector.multi_reduction <add>, %282, %cst_71 [1] : vector<8x32xf32> to vector<8xf32>
    %284 = vector.shape_cast %283 : vector<8xf32> to vector<8x1xf32>
    %285 = arith.addf %270, %284 : vector<8x1xf32>
    %286 = arith.mulf %282, %282 : vector<8x32xf32>
    %cst_72 = arith.constant dense<0.000000e+00> : vector<8xf32>
    %287 = vector.multi_reduction <add>, %286, %cst_72 [1] : vector<8x32xf32> to vector<8xf32>
    %288 = vector.shape_cast %287 : vector<8xf32> to vector<8x1xf32>
    %289 = arith.addf %274, %288 : vector<8x1xf32>
    %290 = vector.extract_strided_slice %42 {offsets = [13, 0], sizes = [5, 32], strides = [1, 1]} : vector<27x32xf32> to vector<5x32xf32>
    %cst_73 = arith.constant dense<0.000000e+00> : vector<8x32xf32>
    %291 = tpu.matmul %43, %290, %cst_73 {dimension_numbers = #tpu.dot_dimension_numbers<[1], [0], [0], [1], [0, 0, 1, 1], [], []>} : vector<8x5xf32>, vector<5x32xf32>, vector<8x32xf32> -> vector<8x32xf32>
    %292 = vector.broadcast %26 : vector<8x1xf32> to vector<8x32xf32>
    %293 = arith.addf %291, %292 : vector<8x32xf32>
    %cst_74 = arith.constant 0.000000e+00 : f32
    %294 = vector.broadcast %cst_74 : f32 to vector<8x32xf32>
    %295 = arith.maximumf %293, %294 : vector<8x32xf32>
    %296 = vector.broadcast %20 : vector<1x32xf32> to vector<8x32xf32>
    %297 = arith.mulf %295, %296 : vector<8x32xf32>
    %cst_75 = arith.constant dense<0.000000e+00> : vector<8xf32>
    %298 = vector.multi_reduction <add>, %297, %cst_75 [1] : vector<8x32xf32> to vector<8xf32>
    %299 = vector.shape_cast %298 : vector<8xf32> to vector<8x1xf32>
    %300 = arith.addf %285, %299 : vector<8x1xf32>
    %301 = arith.mulf %297, %297 : vector<8x32xf32>
    %cst_76 = arith.constant dense<0.000000e+00> : vector<8xf32>
    %302 = vector.multi_reduction <add>, %301, %cst_76 [1] : vector<8x32xf32> to vector<8xf32>
    %303 = vector.shape_cast %302 : vector<8xf32> to vector<8x1xf32>
    %304 = arith.addf %289, %303 : vector<8x1xf32>
    %305 = vector.extract_strided_slice %42 {offsets = [14, 0], sizes = [5, 32], strides = [1, 1]} : vector<27x32xf32> to vector<5x32xf32>
    %cst_77 = arith.constant dense<0.000000e+00> : vector<8x32xf32>
    %306 = tpu.matmul %43, %305, %cst_77 {dimension_numbers = #tpu.dot_dimension_numbers<[1], [0], [0], [1], [0, 0, 1, 1], [], []>} : vector<8x5xf32>, vector<5x32xf32>, vector<8x32xf32> -> vector<8x32xf32>
    %307 = vector.broadcast %26 : vector<8x1xf32> to vector<8x32xf32>
    %308 = arith.addf %306, %307 : vector<8x32xf32>
    %cst_78 = arith.constant 0.000000e+00 : f32
    %309 = vector.broadcast %cst_78 : f32 to vector<8x32xf32>
    %310 = arith.maximumf %308, %309 : vector<8x32xf32>
    %311 = vector.broadcast %20 : vector<1x32xf32> to vector<8x32xf32>
    %312 = arith.mulf %310, %311 : vector<8x32xf32>
    %cst_79 = arith.constant dense<0.000000e+00> : vector<8xf32>
    %313 = vector.multi_reduction <add>, %312, %cst_79 [1] : vector<8x32xf32> to vector<8xf32>
    %314 = vector.shape_cast %313 : vector<8xf32> to vector<8x1xf32>
    %315 = arith.addf %300, %314 : vector<8x1xf32>
    %316 = arith.mulf %312, %312 : vector<8x32xf32>
    %cst_80 = arith.constant dense<0.000000e+00> : vector<8xf32>
    %317 = vector.multi_reduction <add>, %316, %cst_80 [1] : vector<8x32xf32> to vector<8xf32>
    %318 = vector.shape_cast %317 : vector<8xf32> to vector<8x1xf32>
    %319 = arith.addf %304, %318 : vector<8x1xf32>
    %320 = vector.extract_strided_slice %42 {offsets = [15, 0], sizes = [5, 32], strides = [1, 1]} : vector<27x32xf32> to vector<5x32xf32>
    %cst_81 = arith.constant dense<0.000000e+00> : vector<8x32xf32>
    %321 = tpu.matmul %43, %320, %cst_81 {dimension_numbers = #tpu.dot_dimension_numbers<[1], [0], [0], [1], [0, 0, 1, 1], [], []>} : vector<8x5xf32>, vector<5x32xf32>, vector<8x32xf32> -> vector<8x32xf32>
    %322 = vector.broadcast %26 : vector<8x1xf32> to vector<8x32xf32>
    %323 = arith.addf %321, %322 : vector<8x32xf32>
    %cst_82 = arith.constant 0.000000e+00 : f32
    %324 = vector.broadcast %cst_82 : f32 to vector<8x32xf32>
    %325 = arith.maximumf %323, %324 : vector<8x32xf32>
    %326 = vector.broadcast %20 : vector<1x32xf32> to vector<8x32xf32>
    %327 = arith.mulf %325, %326 : vector<8x32xf32>
    %cst_83 = arith.constant dense<0.000000e+00> : vector<8xf32>
    %328 = vector.multi_reduction <add>, %327, %cst_83 [1] : vector<8x32xf32> to vector<8xf32>
    %329 = vector.shape_cast %328 : vector<8xf32> to vector<8x1xf32>
    %330 = arith.addf %315, %329 : vector<8x1xf32>
    %331 = arith.mulf %327, %327 : vector<8x32xf32>
    %cst_84 = arith.constant dense<0.000000e+00> : vector<8xf32>
    %332 = vector.multi_reduction <add>, %331, %cst_84 [1] : vector<8x32xf32> to vector<8xf32>
    %333 = vector.shape_cast %332 : vector<8xf32> to vector<8x1xf32>
    %334 = arith.addf %319, %333 : vector<8x1xf32>
    %335 = vector.extract_strided_slice %42 {offsets = [16, 0], sizes = [5, 32], strides = [1, 1]} : vector<27x32xf32> to vector<5x32xf32>
    %cst_85 = arith.constant dense<0.000000e+00> : vector<8x32xf32>
    %336 = tpu.matmul %43, %335, %cst_85 {dimension_numbers = #tpu.dot_dimension_numbers<[1], [0], [0], [1], [0, 0, 1, 1], [], []>} : vector<8x5xf32>, vector<5x32xf32>, vector<8x32xf32> -> vector<8x32xf32>
    %337 = vector.broadcast %26 : vector<8x1xf32> to vector<8x32xf32>
    %338 = arith.addf %336, %337 : vector<8x32xf32>
    %cst_86 = arith.constant 0.000000e+00 : f32
    %339 = vector.broadcast %cst_86 : f32 to vector<8x32xf32>
    %340 = arith.maximumf %338, %339 : vector<8x32xf32>
    %341 = vector.broadcast %20 : vector<1x32xf32> to vector<8x32xf32>
    %342 = arith.mulf %340, %341 : vector<8x32xf32>
    %cst_87 = arith.constant dense<0.000000e+00> : vector<8xf32>
    %343 = vector.multi_reduction <add>, %342, %cst_87 [1] : vector<8x32xf32> to vector<8xf32>
    %344 = vector.shape_cast %343 : vector<8xf32> to vector<8x1xf32>
    %345 = arith.addf %330, %344 : vector<8x1xf32>
    %346 = arith.mulf %342, %342 : vector<8x32xf32>
    %cst_88 = arith.constant dense<0.000000e+00> : vector<8xf32>
    %347 = vector.multi_reduction <add>, %346, %cst_88 [1] : vector<8x32xf32> to vector<8xf32>
    %348 = vector.shape_cast %347 : vector<8xf32> to vector<8x1xf32>
    %349 = arith.addf %334, %348 : vector<8x1xf32>
    %350 = vector.extract_strided_slice %42 {offsets = [17, 0], sizes = [5, 32], strides = [1, 1]} : vector<27x32xf32> to vector<5x32xf32>
    %cst_89 = arith.constant dense<0.000000e+00> : vector<8x32xf32>
    %351 = tpu.matmul %43, %350, %cst_89 {dimension_numbers = #tpu.dot_dimension_numbers<[1], [0], [0], [1], [0, 0, 1, 1], [], []>} : vector<8x5xf32>, vector<5x32xf32>, vector<8x32xf32> -> vector<8x32xf32>
    %352 = vector.broadcast %26 : vector<8x1xf32> to vector<8x32xf32>
    %353 = arith.addf %351, %352 : vector<8x32xf32>
    %cst_90 = arith.constant 0.000000e+00 : f32
    %354 = vector.broadcast %cst_90 : f32 to vector<8x32xf32>
    %355 = arith.maximumf %353, %354 : vector<8x32xf32>
    %356 = vector.broadcast %20 : vector<1x32xf32> to vector<8x32xf32>
    %357 = arith.mulf %355, %356 : vector<8x32xf32>
    %cst_91 = arith.constant dense<0.000000e+00> : vector<8xf32>
    %358 = vector.multi_reduction <add>, %357, %cst_91 [1] : vector<8x32xf32> to vector<8xf32>
    %359 = vector.shape_cast %358 : vector<8xf32> to vector<8x1xf32>
    %360 = arith.addf %345, %359 : vector<8x1xf32>
    %361 = arith.mulf %357, %357 : vector<8x32xf32>
    %cst_92 = arith.constant dense<0.000000e+00> : vector<8xf32>
    %362 = vector.multi_reduction <add>, %361, %cst_92 [1] : vector<8x32xf32> to vector<8xf32>
    %363 = vector.shape_cast %362 : vector<8xf32> to vector<8x1xf32>
    %364 = arith.addf %349, %363 : vector<8x1xf32>
    %365 = vector.extract_strided_slice %42 {offsets = [18, 0], sizes = [5, 32], strides = [1, 1]} : vector<27x32xf32> to vector<5x32xf32>
    %cst_93 = arith.constant dense<0.000000e+00> : vector<8x32xf32>
    %366 = tpu.matmul %43, %365, %cst_93 {dimension_numbers = #tpu.dot_dimension_numbers<[1], [0], [0], [1], [0, 0, 1, 1], [], []>} : vector<8x5xf32>, vector<5x32xf32>, vector<8x32xf32> -> vector<8x32xf32>
    %367 = vector.broadcast %26 : vector<8x1xf32> to vector<8x32xf32>
    %368 = arith.addf %366, %367 : vector<8x32xf32>
    %cst_94 = arith.constant 0.000000e+00 : f32
    %369 = vector.broadcast %cst_94 : f32 to vector<8x32xf32>
    %370 = arith.maximumf %368, %369 : vector<8x32xf32>
    %371 = vector.broadcast %20 : vector<1x32xf32> to vector<8x32xf32>
    %372 = arith.mulf %370, %371 : vector<8x32xf32>
    %cst_95 = arith.constant dense<0.000000e+00> : vector<8xf32>
    %373 = vector.multi_reduction <add>, %372, %cst_95 [1] : vector<8x32xf32> to vector<8xf32>
    %374 = vector.shape_cast %373 : vector<8xf32> to vector<8x1xf32>
    %375 = arith.addf %360, %374 : vector<8x1xf32>
    %376 = arith.mulf %372, %372 : vector<8x32xf32>
    %cst_96 = arith.constant dense<0.000000e+00> : vector<8xf32>
    %377 = vector.multi_reduction <add>, %376, %cst_96 [1] : vector<8x32xf32> to vector<8xf32>
    %378 = vector.shape_cast %377 : vector<8xf32> to vector<8x1xf32>
    %379 = arith.addf %364, %378 : vector<8x1xf32>
    %380 = vector.extract_strided_slice %42 {offsets = [19, 0], sizes = [5, 32], strides = [1, 1]} : vector<27x32xf32> to vector<5x32xf32>
    %cst_97 = arith.constant dense<0.000000e+00> : vector<8x32xf32>
    %381 = tpu.matmul %43, %380, %cst_97 {dimension_numbers = #tpu.dot_dimension_numbers<[1], [0], [0], [1], [0, 0, 1, 1], [], []>} : vector<8x5xf32>, vector<5x32xf32>, vector<8x32xf32> -> vector<8x32xf32>
    %382 = vector.broadcast %26 : vector<8x1xf32> to vector<8x32xf32>
    %383 = arith.addf %381, %382 : vector<8x32xf32>
    %cst_98 = arith.constant 0.000000e+00 : f32
    %384 = vector.broadcast %cst_98 : f32 to vector<8x32xf32>
    %385 = arith.maximumf %383, %384 : vector<8x32xf32>
    %386 = vector.broadcast %20 : vector<1x32xf32> to vector<8x32xf32>
    %387 = arith.mulf %385, %386 : vector<8x32xf32>
    %cst_99 = arith.constant dense<0.000000e+00> : vector<8xf32>
    %388 = vector.multi_reduction <add>, %387, %cst_99 [1] : vector<8x32xf32> to vector<8xf32>
    %389 = vector.shape_cast %388 : vector<8xf32> to vector<8x1xf32>
    %390 = arith.addf %375, %389 : vector<8x1xf32>
    %391 = arith.mulf %387, %387 : vector<8x32xf32>
    %cst_100 = arith.constant dense<0.000000e+00> : vector<8xf32>
    %392 = vector.multi_reduction <add>, %391, %cst_100 [1] : vector<8x32xf32> to vector<8xf32>
    %393 = vector.shape_cast %392 : vector<8xf32> to vector<8x1xf32>
    %394 = arith.addf %379, %393 : vector<8x1xf32>
    %395 = vector.extract_strided_slice %42 {offsets = [20, 0], sizes = [5, 32], strides = [1, 1]} : vector<27x32xf32> to vector<5x32xf32>
    %cst_101 = arith.constant dense<0.000000e+00> : vector<8x32xf32>
    %396 = tpu.matmul %43, %395, %cst_101 {dimension_numbers = #tpu.dot_dimension_numbers<[1], [0], [0], [1], [0, 0, 1, 1], [], []>} : vector<8x5xf32>, vector<5x32xf32>, vector<8x32xf32> -> vector<8x32xf32>
    %397 = vector.broadcast %26 : vector<8x1xf32> to vector<8x32xf32>
    %398 = arith.addf %396, %397 : vector<8x32xf32>
    %cst_102 = arith.constant 0.000000e+00 : f32
    %399 = vector.broadcast %cst_102 : f32 to vector<8x32xf32>
    %400 = arith.maximumf %398, %399 : vector<8x32xf32>
    %401 = vector.broadcast %20 : vector<1x32xf32> to vector<8x32xf32>
    %402 = arith.mulf %400, %401 : vector<8x32xf32>
    %cst_103 = arith.constant dense<0.000000e+00> : vector<8xf32>
    %403 = vector.multi_reduction <add>, %402, %cst_103 [1] : vector<8x32xf32> to vector<8xf32>
    %404 = vector.shape_cast %403 : vector<8xf32> to vector<8x1xf32>
    %405 = arith.addf %390, %404 : vector<8x1xf32>
    %406 = arith.mulf %402, %402 : vector<8x32xf32>
    %cst_104 = arith.constant dense<0.000000e+00> : vector<8xf32>
    %407 = vector.multi_reduction <add>, %406, %cst_104 [1] : vector<8x32xf32> to vector<8xf32>
    %408 = vector.shape_cast %407 : vector<8xf32> to vector<8x1xf32>
    %409 = arith.addf %394, %408 : vector<8x1xf32>
    %410 = vector.extract_strided_slice %42 {offsets = [21, 0], sizes = [5, 32], strides = [1, 1]} : vector<27x32xf32> to vector<5x32xf32>
    %cst_105 = arith.constant dense<0.000000e+00> : vector<8x32xf32>
    %411 = tpu.matmul %43, %410, %cst_105 {dimension_numbers = #tpu.dot_dimension_numbers<[1], [0], [0], [1], [0, 0, 1, 1], [], []>} : vector<8x5xf32>, vector<5x32xf32>, vector<8x32xf32> -> vector<8x32xf32>
    %412 = vector.broadcast %26 : vector<8x1xf32> to vector<8x32xf32>
    %413 = arith.addf %411, %412 : vector<8x32xf32>
    %cst_106 = arith.constant 0.000000e+00 : f32
    %414 = vector.broadcast %cst_106 : f32 to vector<8x32xf32>
    %415 = arith.maximumf %413, %414 : vector<8x32xf32>
    %416 = vector.broadcast %20 : vector<1x32xf32> to vector<8x32xf32>
    %417 = arith.mulf %415, %416 : vector<8x32xf32>
    %cst_107 = arith.constant dense<0.000000e+00> : vector<8xf32>
    %418 = vector.multi_reduction <add>, %417, %cst_107 [1] : vector<8x32xf32> to vector<8xf32>
    %419 = vector.shape_cast %418 : vector<8xf32> to vector<8x1xf32>
    %420 = arith.addf %405, %419 : vector<8x1xf32>
    %421 = arith.mulf %417, %417 : vector<8x32xf32>
    %cst_108 = arith.constant dense<0.000000e+00> : vector<8xf32>
    %422 = vector.multi_reduction <add>, %421, %cst_108 [1] : vector<8x32xf32> to vector<8xf32>
    %423 = vector.shape_cast %422 : vector<8xf32> to vector<8x1xf32>
    %424 = arith.addf %409, %423 : vector<8x1xf32>
    %425 = vector.extract_strided_slice %42 {offsets = [22, 0], sizes = [5, 32], strides = [1, 1]} : vector<27x32xf32> to vector<5x32xf32>
    %cst_109 = arith.constant dense<0.000000e+00> : vector<8x32xf32>
    %426 = tpu.matmul %43, %425, %cst_109 {dimension_numbers = #tpu.dot_dimension_numbers<[1], [0], [0], [1], [0, 0, 1, 1], [], []>} : vector<8x5xf32>, vector<5x32xf32>, vector<8x32xf32> -> vector<8x32xf32>
    %427 = vector.broadcast %26 : vector<8x1xf32> to vector<8x32xf32>
    %428 = arith.addf %426, %427 : vector<8x32xf32>
    %cst_110 = arith.constant 0.000000e+00 : f32
    %429 = vector.broadcast %cst_110 : f32 to vector<8x32xf32>
    %430 = arith.maximumf %428, %429 : vector<8x32xf32>
    %431 = vector.broadcast %20 : vector<1x32xf32> to vector<8x32xf32>
    %432 = arith.mulf %430, %431 : vector<8x32xf32>
    %cst_111 = arith.constant dense<0.000000e+00> : vector<8xf32>
    %433 = vector.multi_reduction <add>, %432, %cst_111 [1] : vector<8x32xf32> to vector<8xf32>
    %434 = vector.shape_cast %433 : vector<8xf32> to vector<8x1xf32>
    %435 = arith.addf %420, %434 : vector<8x1xf32>
    %436 = arith.mulf %432, %432 : vector<8x32xf32>
    %cst_112 = arith.constant dense<0.000000e+00> : vector<8xf32>
    %437 = vector.multi_reduction <add>, %436, %cst_112 [1] : vector<8x32xf32> to vector<8xf32>
    %438 = vector.shape_cast %437 : vector<8xf32> to vector<8x1xf32>
    %439 = arith.addf %424, %438 : vector<8x1xf32>
    %440 = vector.extract_strided_slice %42 {offsets = [23, 0], sizes = [1, 32], strides = [1, 1]} : vector<27x32xf32> to vector<1x32xf32>
    %441 = vector.extract_strided_slice %42 {offsets = [24, 0], sizes = [1, 32], strides = [1, 1]} : vector<27x32xf32> to vector<1x32xf32>
    %442 = vector.extract_strided_slice %42 {offsets = [25, 0], sizes = [1, 32], strides = [1, 1]} : vector<27x32xf32> to vector<1x32xf32>
    %443 = vector.extract_strided_slice %42 {offsets = [26, 0], sizes = [1, 32], strides = [1, 1]} : vector<27x32xf32> to vector<1x32xf32>
    %444 = vector.extract_strided_slice %42 {offsets = [0, 0], sizes = [1, 32], strides = [1, 1]} : vector<27x32xf32> to vector<1x32xf32>
    %cst_113 = arith.constant 0.000000e+00 : f32
    %445 = vector.broadcast %cst_113 : f32 to vector<1x1xf32>
    %446 = vector.extract_strided_slice %444 {offsets = [0, 1], sizes = [1, 31], strides = [1, 1]} : vector<1x32xf32> to vector<1x31xf32>
    %447 = tpu.concatenate %446, %445 in 1 : vector<1x31xf32>, vector<1x1xf32> -> vector<1x32xf32>
    %448 = tpu.concatenate %440, %441, %442, %443, %447 in 0 : vector<1x32xf32>, vector<1x32xf32>, vector<1x32xf32>, vector<1x32xf32>, vector<1x32xf32> -> vector<5x32xf32>
    %cst_114 = arith.constant dense<0.000000e+00> : vector<8x32xf32>
    %449 = tpu.matmul %43, %448, %cst_114 {dimension_numbers = #tpu.dot_dimension_numbers<[1], [0], [0], [1], [0, 0, 1, 1], [], []>} : vector<8x5xf32>, vector<5x32xf32>, vector<8x32xf32> -> vector<8x32xf32>
    %450 = vector.broadcast %26 : vector<8x1xf32> to vector<8x32xf32>
    %451 = arith.addf %449, %450 : vector<8x32xf32>
    %cst_115 = arith.constant 0.000000e+00 : f32
    %452 = vector.broadcast %cst_115 : f32 to vector<8x32xf32>
    %453 = arith.maximumf %451, %452 : vector<8x32xf32>
    %454 = vector.broadcast %20 : vector<1x32xf32> to vector<8x32xf32>
    %455 = arith.mulf %453, %454 : vector<8x32xf32>
    %cst_116 = arith.constant dense<0.000000e+00> : vector<8xf32>
    %456 = vector.multi_reduction <add>, %455, %cst_116 [1] : vector<8x32xf32> to vector<8xf32>
    %457 = vector.shape_cast %456 : vector<8xf32> to vector<8x1xf32>
    %458 = arith.addf %435, %457 : vector<8x1xf32>
    %459 = arith.mulf %455, %455 : vector<8x32xf32>
    %cst_117 = arith.constant dense<0.000000e+00> : vector<8xf32>
    %460 = vector.multi_reduction <add>, %459, %cst_117 [1] : vector<8x32xf32> to vector<8xf32>
    %461 = vector.shape_cast %460 : vector<8xf32> to vector<8x1xf32>
    %462 = arith.addf %439, %461 : vector<8x1xf32>
    %463 = vector.extract_strided_slice %42 {offsets = [24, 0], sizes = [1, 32], strides = [1, 1]} : vector<27x32xf32> to vector<1x32xf32>
    %464 = vector.extract_strided_slice %42 {offsets = [25, 0], sizes = [1, 32], strides = [1, 1]} : vector<27x32xf32> to vector<1x32xf32>
    %465 = vector.extract_strided_slice %42 {offsets = [26, 0], sizes = [1, 32], strides = [1, 1]} : vector<27x32xf32> to vector<1x32xf32>
    %466 = vector.extract_strided_slice %42 {offsets = [0, 0], sizes = [1, 32], strides = [1, 1]} : vector<27x32xf32> to vector<1x32xf32>
    %cst_118 = arith.constant 0.000000e+00 : f32
    %467 = vector.broadcast %cst_118 : f32 to vector<1x1xf32>
    %468 = vector.extract_strided_slice %466 {offsets = [0, 1], sizes = [1, 31], strides = [1, 1]} : vector<1x32xf32> to vector<1x31xf32>
    %469 = tpu.concatenate %468, %467 in 1 : vector<1x31xf32>, vector<1x1xf32> -> vector<1x32xf32>
    %470 = vector.extract_strided_slice %42 {offsets = [1, 0], sizes = [1, 32], strides = [1, 1]} : vector<27x32xf32> to vector<1x32xf32>
    %cst_119 = arith.constant 0.000000e+00 : f32
    %471 = vector.broadcast %cst_119 : f32 to vector<1x1xf32>
    %472 = vector.extract_strided_slice %470 {offsets = [0, 1], sizes = [1, 31], strides = [1, 1]} : vector<1x32xf32> to vector<1x31xf32>
    %473 = tpu.concatenate %472, %471 in 1 : vector<1x31xf32>, vector<1x1xf32> -> vector<1x32xf32>
    %474 = tpu.concatenate %463, %464, %465, %469, %473 in 0 : vector<1x32xf32>, vector<1x32xf32>, vector<1x32xf32>, vector<1x32xf32>, vector<1x32xf32> -> vector<5x32xf32>
    %cst_120 = arith.constant dense<0.000000e+00> : vector<8x32xf32>
    %475 = tpu.matmul %43, %474, %cst_120 {dimension_numbers = #tpu.dot_dimension_numbers<[1], [0], [0], [1], [0, 0, 1, 1], [], []>} : vector<8x5xf32>, vector<5x32xf32>, vector<8x32xf32> -> vector<8x32xf32>
    %476 = vector.broadcast %26 : vector<8x1xf32> to vector<8x32xf32>
    %477 = arith.addf %475, %476 : vector<8x32xf32>
    %cst_121 = arith.constant 0.000000e+00 : f32
    %478 = vector.broadcast %cst_121 : f32 to vector<8x32xf32>
    %479 = arith.maximumf %477, %478 : vector<8x32xf32>
    %480 = vector.broadcast %20 : vector<1x32xf32> to vector<8x32xf32>
    %481 = arith.mulf %479, %480 : vector<8x32xf32>
    %cst_122 = arith.constant dense<0.000000e+00> : vector<8xf32>
    %482 = vector.multi_reduction <add>, %481, %cst_122 [1] : vector<8x32xf32> to vector<8xf32>
    %483 = vector.shape_cast %482 : vector<8xf32> to vector<8x1xf32>
    %484 = arith.addf %458, %483 : vector<8x1xf32>
    %485 = arith.mulf %481, %481 : vector<8x32xf32>
    %cst_123 = arith.constant dense<0.000000e+00> : vector<8xf32>
    %486 = vector.multi_reduction <add>, %485, %cst_123 [1] : vector<8x32xf32> to vector<8xf32>
    %487 = vector.shape_cast %486 : vector<8xf32> to vector<8x1xf32>
    %488 = arith.addf %462, %487 : vector<8x1xf32>
    %cst_124 = arith.constant 6.480000e+02 : f32
    %489 = vector.broadcast %cst_124 : f32 to vector<8x1xf32>
    %490 = arith.divf %484, %489 : vector<8x1xf32>
    %cst_125 = arith.constant 6.480000e+02 : f32
    %491 = vector.broadcast %cst_125 : f32 to vector<8x1xf32>
    %492 = arith.divf %488, %491 : vector<8x1xf32>
    %493 = arith.mulf %490, %490 : vector<8x1xf32>
    %494 = arith.subf %492, %493 : vector<8x1xf32>
    %cst_126 = arith.constant 0.000000e+00 : f32
    %495 = vector.broadcast %cst_126 : f32 to vector<8x1xf32>
    %496 = arith.maximumf %494, %495 : vector<8x1xf32>
    %cst_127 = arith.constant 9.99999974E-6 : f32
    %497 = vector.broadcast %cst_127 : f32 to vector<8x1xf32>
    %498 = arith.addf %496, %497 : vector<8x1xf32>
    %499 = math.rsqrt %498 : vector<8x1xf32>
    %500 = arith.mulf %27, %499 : vector<8x1xf32>
    %501 = arith.mulf %490, %500 : vector<8x1xf32>
    %502 = arith.subf %28, %501 : vector<8x1xf32>
    %503 = arith.addf %64, %87 : vector<8x32xf32>
    %504 = arith.addf %503, %102 : vector<8x32xf32>
    %cst_128 = arith.constant 0.333333343 : f32
    %505 = vector.broadcast %cst_128 : f32 to vector<8x32xf32>
    %506 = arith.mulf %504, %505 : vector<8x32xf32>
    %507 = vector.broadcast %500 : vector<8x1xf32> to vector<8x32xf32>
    %508 = arith.mulf %507, %506 : vector<8x32xf32>
    %509 = vector.broadcast %502 : vector<8x1xf32> to vector<8x32xf32>
    %510 = arith.addf %508, %509 : vector<8x32xf32>
    %511 = vector.broadcast %20 : vector<1x32xf32> to vector<8x32xf32>
    %512 = arith.mulf %510, %511 : vector<8x32xf32>
    %513 = arith.addf %117, %132 : vector<8x32xf32>
    %514 = arith.addf %513, %147 : vector<8x32xf32>
    %cst_129 = arith.constant 0.333333343 : f32
    %515 = vector.broadcast %cst_129 : f32 to vector<8x32xf32>
    %516 = arith.mulf %514, %515 : vector<8x32xf32>
    %517 = vector.broadcast %500 : vector<8x1xf32> to vector<8x32xf32>
    %518 = arith.mulf %517, %516 : vector<8x32xf32>
    %519 = vector.broadcast %502 : vector<8x1xf32> to vector<8x32xf32>
    %520 = arith.addf %518, %519 : vector<8x32xf32>
    %521 = vector.broadcast %20 : vector<1x32xf32> to vector<8x32xf32>
    %522 = arith.mulf %520, %521 : vector<8x32xf32>
    %523 = arith.addf %162, %177 : vector<8x32xf32>
    %524 = arith.addf %523, %192 : vector<8x32xf32>
    %cst_130 = arith.constant 0.333333343 : f32
    %525 = vector.broadcast %cst_130 : f32 to vector<8x32xf32>
    %526 = arith.mulf %524, %525 : vector<8x32xf32>
    %527 = vector.broadcast %500 : vector<8x1xf32> to vector<8x32xf32>
    %528 = arith.mulf %527, %526 : vector<8x32xf32>
    %529 = vector.broadcast %502 : vector<8x1xf32> to vector<8x32xf32>
    %530 = arith.addf %528, %529 : vector<8x32xf32>
    %531 = vector.broadcast %20 : vector<1x32xf32> to vector<8x32xf32>
    %532 = arith.mulf %530, %531 : vector<8x32xf32>
    %533 = arith.addf %207, %222 : vector<8x32xf32>
    %534 = arith.addf %533, %237 : vector<8x32xf32>
    %cst_131 = arith.constant 0.333333343 : f32
    %535 = vector.broadcast %cst_131 : f32 to vector<8x32xf32>
    %536 = arith.mulf %534, %535 : vector<8x32xf32>
    %537 = vector.broadcast %500 : vector<8x1xf32> to vector<8x32xf32>
    %538 = arith.mulf %537, %536 : vector<8x32xf32>
    %539 = vector.broadcast %502 : vector<8x1xf32> to vector<8x32xf32>
    %540 = arith.addf %538, %539 : vector<8x32xf32>
    %541 = vector.broadcast %20 : vector<1x32xf32> to vector<8x32xf32>
    %542 = arith.mulf %540, %541 : vector<8x32xf32>
    %543 = arith.addf %252, %267 : vector<8x32xf32>
    %544 = arith.addf %543, %282 : vector<8x32xf32>
    %cst_132 = arith.constant 0.333333343 : f32
    %545 = vector.broadcast %cst_132 : f32 to vector<8x32xf32>
    %546 = arith.mulf %544, %545 : vector<8x32xf32>
    %547 = vector.broadcast %500 : vector<8x1xf32> to vector<8x32xf32>
    %548 = arith.mulf %547, %546 : vector<8x32xf32>
    %549 = vector.broadcast %502 : vector<8x1xf32> to vector<8x32xf32>
    %550 = arith.addf %548, %549 : vector<8x32xf32>
    %551 = vector.broadcast %20 : vector<1x32xf32> to vector<8x32xf32>
    %552 = arith.mulf %550, %551 : vector<8x32xf32>
    %553 = arith.addf %297, %312 : vector<8x32xf32>
    %554 = arith.addf %553, %327 : vector<8x32xf32>
    %cst_133 = arith.constant 0.333333343 : f32
    %555 = vector.broadcast %cst_133 : f32 to vector<8x32xf32>
    %556 = arith.mulf %554, %555 : vector<8x32xf32>
    %557 = vector.broadcast %500 : vector<8x1xf32> to vector<8x32xf32>
    %558 = arith.mulf %557, %556 : vector<8x32xf32>
    %559 = vector.broadcast %502 : vector<8x1xf32> to vector<8x32xf32>
    %560 = arith.addf %558, %559 : vector<8x32xf32>
    %561 = vector.broadcast %20 : vector<1x32xf32> to vector<8x32xf32>
    %562 = arith.mulf %560, %561 : vector<8x32xf32>
    %563 = arith.addf %342, %357 : vector<8x32xf32>
    %564 = arith.addf %563, %372 : vector<8x32xf32>
    %cst_134 = arith.constant 0.333333343 : f32
    %565 = vector.broadcast %cst_134 : f32 to vector<8x32xf32>
    %566 = arith.mulf %564, %565 : vector<8x32xf32>
    %567 = vector.broadcast %500 : vector<8x1xf32> to vector<8x32xf32>
    %568 = arith.mulf %567, %566 : vector<8x32xf32>
    %569 = vector.broadcast %502 : vector<8x1xf32> to vector<8x32xf32>
    %570 = arith.addf %568, %569 : vector<8x32xf32>
    %571 = vector.broadcast %20 : vector<1x32xf32> to vector<8x32xf32>
    %572 = arith.mulf %570, %571 : vector<8x32xf32>
    %573 = arith.addf %387, %402 : vector<8x32xf32>
    %574 = arith.addf %573, %417 : vector<8x32xf32>
    %cst_135 = arith.constant 0.333333343 : f32
    %575 = vector.broadcast %cst_135 : f32 to vector<8x32xf32>
    %576 = arith.mulf %574, %575 : vector<8x32xf32>
    %577 = vector.broadcast %500 : vector<8x1xf32> to vector<8x32xf32>
    %578 = arith.mulf %577, %576 : vector<8x32xf32>
    %579 = vector.broadcast %502 : vector<8x1xf32> to vector<8x32xf32>
    %580 = arith.addf %578, %579 : vector<8x32xf32>
    %581 = vector.broadcast %20 : vector<1x32xf32> to vector<8x32xf32>
    %582 = arith.mulf %580, %581 : vector<8x32xf32>
    %583 = arith.addf %432, %455 : vector<8x32xf32>
    %584 = arith.addf %583, %481 : vector<8x32xf32>
    %cst_136 = arith.constant 0.333333343 : f32
    %585 = vector.broadcast %cst_136 : f32 to vector<8x32xf32>
    %586 = arith.mulf %584, %585 : vector<8x32xf32>
    %587 = vector.broadcast %500 : vector<8x1xf32> to vector<8x32xf32>
    %588 = arith.mulf %587, %586 : vector<8x32xf32>
    %589 = vector.broadcast %502 : vector<8x1xf32> to vector<8x32xf32>
    %590 = arith.addf %588, %589 : vector<8x32xf32>
    %591 = vector.broadcast %20 : vector<1x32xf32> to vector<8x32xf32>
    %592 = arith.mulf %590, %591 : vector<8x32xf32>
    %593 = tpu.concatenate %512, %522, %532, %542, %552, %562, %572, %582, %592 in 0 : vector<8x32xf32>, vector<8x32xf32>, vector<8x32xf32>, vector<8x32xf32>, vector<8x32xf32>, vector<8x32xf32>, vector<8x32xf32>, vector<8x32xf32>, vector<8x32xf32> -> vector<72x32xf32>
    %c0_137 = arith.constant 0 : index
    %c0_138 = arith.constant 0 : index
    %594 = vector.load %arg2[%c0_137, %c0_138] : memref<16x40xf32, #tpu.memory_space<vmem>>, vector<16x40xf32>
    %cst_139 = arith.constant 0.000000e+00 : f32
    %595 = vector.broadcast %cst_139 : f32 to vector<16x1xf32>
    %cst_140 = arith.constant 0.000000e+00 : f32
    %596 = vector.broadcast %cst_140 : f32 to vector<16x1xf32>
    %597 = vector.extract_strided_slice %593 {offsets = [56, 0], sizes = [8, 32], strides = [1, 1]} : vector<72x32xf32> to vector<8x32xf32>
    %cst_141 = arith.constant 0.000000e+00 : f32
    %598 = vector.broadcast %cst_141 : f32 to vector<8x1xf32>
    %599 = vector.extract_strided_slice %597 {offsets = [0, 0], sizes = [8, 31], strides = [1, 1]} : vector<8x32xf32> to vector<8x31xf32>
    %600 = tpu.concatenate %598, %599 in 1 : vector<8x1xf32>, vector<8x31xf32> -> vector<8x32xf32>
    %601 = vector.extract_strided_slice %593 {offsets = [64, 0], sizes = [8, 32], strides = [1, 1]} : vector<72x32xf32> to vector<8x32xf32>
    %cst_142 = arith.constant 0.000000e+00 : f32
    %602 = vector.broadcast %cst_142 : f32 to vector<8x1xf32>
    %603 = vector.extract_strided_slice %601 {offsets = [0, 0], sizes = [8, 31], strides = [1, 1]} : vector<8x32xf32> to vector<8x31xf32>
    %604 = tpu.concatenate %602, %603 in 1 : vector<8x1xf32>, vector<8x31xf32> -> vector<8x32xf32>
    %605 = vector.extract_strided_slice %593 {offsets = [0, 0], sizes = [8, 32], strides = [1, 1]} : vector<72x32xf32> to vector<8x32xf32>
    %606 = vector.extract_strided_slice %593 {offsets = [8, 0], sizes = [8, 32], strides = [1, 1]} : vector<72x32xf32> to vector<8x32xf32>
    %607 = vector.extract_strided_slice %593 {offsets = [16, 0], sizes = [8, 32], strides = [1, 1]} : vector<72x32xf32> to vector<8x32xf32>
    %608 = tpu.concatenate %600, %604, %605, %606, %607 in 0 : vector<8x32xf32>, vector<8x32xf32>, vector<8x32xf32>, vector<8x32xf32>, vector<8x32xf32> -> vector<40x32xf32>
    %cst_143 = arith.constant dense<0.000000e+00> : vector<16x32xf32>
    %609 = tpu.matmul %594, %608, %cst_143 {dimension_numbers = #tpu.dot_dimension_numbers<[1], [0], [0], [1], [0, 0, 1, 1], [], []>} : vector<16x40xf32>, vector<40x32xf32>, vector<16x32xf32> -> vector<16x32xf32>
    %610 = vector.broadcast %29 : vector<16x1xf32> to vector<16x32xf32>
    %611 = arith.addf %609, %610 : vector<16x32xf32>
    %cst_144 = arith.constant 0.000000e+00 : f32
    %612 = vector.broadcast %cst_144 : f32 to vector<16x32xf32>
    %613 = arith.maximumf %611, %612 : vector<16x32xf32>
    %614 = vector.broadcast %20 : vector<1x32xf32> to vector<16x32xf32>
    %615 = arith.mulf %613, %614 : vector<16x32xf32>
    %cst_145 = arith.constant dense<0.000000e+00> : vector<16xf32>
    %616 = vector.multi_reduction <add>, %615, %cst_145 [1] : vector<16x32xf32> to vector<16xf32>
    %617 = vector.shape_cast %616 : vector<16xf32> to vector<16x1xf32>
    %618 = arith.addf %595, %617 : vector<16x1xf32>
    %619 = arith.mulf %615, %615 : vector<16x32xf32>
    %cst_146 = arith.constant dense<0.000000e+00> : vector<16xf32>
    %620 = vector.multi_reduction <add>, %619, %cst_146 [1] : vector<16x32xf32> to vector<16xf32>
    %621 = vector.shape_cast %620 : vector<16xf32> to vector<16x1xf32>
    %622 = arith.addf %596, %621 : vector<16x1xf32>
    %623 = vector.extract_strided_slice %593 {offsets = [64, 0], sizes = [8, 32], strides = [1, 1]} : vector<72x32xf32> to vector<8x32xf32>
    %cst_147 = arith.constant 0.000000e+00 : f32
    %624 = vector.broadcast %cst_147 : f32 to vector<8x1xf32>
    %625 = vector.extract_strided_slice %623 {offsets = [0, 0], sizes = [8, 31], strides = [1, 1]} : vector<8x32xf32> to vector<8x31xf32>
    %626 = tpu.concatenate %624, %625 in 1 : vector<8x1xf32>, vector<8x31xf32> -> vector<8x32xf32>
    %627 = vector.extract_strided_slice %593 {offsets = [0, 0], sizes = [8, 32], strides = [1, 1]} : vector<72x32xf32> to vector<8x32xf32>
    %628 = vector.extract_strided_slice %593 {offsets = [8, 0], sizes = [8, 32], strides = [1, 1]} : vector<72x32xf32> to vector<8x32xf32>
    %629 = vector.extract_strided_slice %593 {offsets = [16, 0], sizes = [8, 32], strides = [1, 1]} : vector<72x32xf32> to vector<8x32xf32>
    %630 = vector.extract_strided_slice %593 {offsets = [24, 0], sizes = [8, 32], strides = [1, 1]} : vector<72x32xf32> to vector<8x32xf32>
    %631 = tpu.concatenate %626, %627, %628, %629, %630 in 0 : vector<8x32xf32>, vector<8x32xf32>, vector<8x32xf32>, vector<8x32xf32>, vector<8x32xf32> -> vector<40x32xf32>
    %cst_148 = arith.constant dense<0.000000e+00> : vector<16x32xf32>
    %632 = tpu.matmul %594, %631, %cst_148 {dimension_numbers = #tpu.dot_dimension_numbers<[1], [0], [0], [1], [0, 0, 1, 1], [], []>} : vector<16x40xf32>, vector<40x32xf32>, vector<16x32xf32> -> vector<16x32xf32>
    %633 = vector.broadcast %29 : vector<16x1xf32> to vector<16x32xf32>
    %634 = arith.addf %632, %633 : vector<16x32xf32>
    %cst_149 = arith.constant 0.000000e+00 : f32
    %635 = vector.broadcast %cst_149 : f32 to vector<16x32xf32>
    %636 = arith.maximumf %634, %635 : vector<16x32xf32>
    %637 = vector.broadcast %20 : vector<1x32xf32> to vector<16x32xf32>
    %638 = arith.mulf %636, %637 : vector<16x32xf32>
    %cst_150 = arith.constant dense<0.000000e+00> : vector<16xf32>
    %639 = vector.multi_reduction <add>, %638, %cst_150 [1] : vector<16x32xf32> to vector<16xf32>
    %640 = vector.shape_cast %639 : vector<16xf32> to vector<16x1xf32>
    %641 = arith.addf %618, %640 : vector<16x1xf32>
    %642 = arith.mulf %638, %638 : vector<16x32xf32>
    %cst_151 = arith.constant dense<0.000000e+00> : vector<16xf32>
    %643 = vector.multi_reduction <add>, %642, %cst_151 [1] : vector<16x32xf32> to vector<16xf32>
    %644 = vector.shape_cast %643 : vector<16xf32> to vector<16x1xf32>
    %645 = arith.addf %622, %644 : vector<16x1xf32>
    %646 = vector.extract_strided_slice %593 {offsets = [0, 0], sizes = [40, 32], strides = [1, 1]} : vector<72x32xf32> to vector<40x32xf32>
    %cst_152 = arith.constant dense<0.000000e+00> : vector<16x32xf32>
    %647 = tpu.matmul %594, %646, %cst_152 {dimension_numbers = #tpu.dot_dimension_numbers<[1], [0], [0], [1], [0, 0, 1, 1], [], []>} : vector<16x40xf32>, vector<40x32xf32>, vector<16x32xf32> -> vector<16x32xf32>
    %648 = vector.broadcast %29 : vector<16x1xf32> to vector<16x32xf32>
    %649 = arith.addf %647, %648 : vector<16x32xf32>
    %cst_153 = arith.constant 0.000000e+00 : f32
    %650 = vector.broadcast %cst_153 : f32 to vector<16x32xf32>
    %651 = arith.maximumf %649, %650 : vector<16x32xf32>
    %652 = vector.broadcast %20 : vector<1x32xf32> to vector<16x32xf32>
    %653 = arith.mulf %651, %652 : vector<16x32xf32>
    %cst_154 = arith.constant dense<0.000000e+00> : vector<16xf32>
    %654 = vector.multi_reduction <add>, %653, %cst_154 [1] : vector<16x32xf32> to vector<16xf32>
    %655 = vector.shape_cast %654 : vector<16xf32> to vector<16x1xf32>
    %656 = arith.addf %641, %655 : vector<16x1xf32>
    %657 = arith.mulf %653, %653 : vector<16x32xf32>
    %cst_155 = arith.constant dense<0.000000e+00> : vector<16xf32>
    %658 = vector.multi_reduction <add>, %657, %cst_155 [1] : vector<16x32xf32> to vector<16xf32>
    %659 = vector.shape_cast %658 : vector<16xf32> to vector<16x1xf32>
    %660 = arith.addf %645, %659 : vector<16x1xf32>
    %661 = vector.extract_strided_slice %593 {offsets = [8, 0], sizes = [40, 32], strides = [1, 1]} : vector<72x32xf32> to vector<40x32xf32>
    %cst_156 = arith.constant dense<0.000000e+00> : vector<16x32xf32>
    %662 = tpu.matmul %594, %661, %cst_156 {dimension_numbers = #tpu.dot_dimension_numbers<[1], [0], [0], [1], [0, 0, 1, 1], [], []>} : vector<16x40xf32>, vector<40x32xf32>, vector<16x32xf32> -> vector<16x32xf32>
    %663 = vector.broadcast %29 : vector<16x1xf32> to vector<16x32xf32>
    %664 = arith.addf %662, %663 : vector<16x32xf32>
    %cst_157 = arith.constant 0.000000e+00 : f32
    %665 = vector.broadcast %cst_157 : f32 to vector<16x32xf32>
    %666 = arith.maximumf %664, %665 : vector<16x32xf32>
    %667 = vector.broadcast %20 : vector<1x32xf32> to vector<16x32xf32>
    %668 = arith.mulf %666, %667 : vector<16x32xf32>
    %cst_158 = arith.constant dense<0.000000e+00> : vector<16xf32>
    %669 = vector.multi_reduction <add>, %668, %cst_158 [1] : vector<16x32xf32> to vector<16xf32>
    %670 = vector.shape_cast %669 : vector<16xf32> to vector<16x1xf32>
    %671 = arith.addf %656, %670 : vector<16x1xf32>
    %672 = arith.mulf %668, %668 : vector<16x32xf32>
    %cst_159 = arith.constant dense<0.000000e+00> : vector<16xf32>
    %673 = vector.multi_reduction <add>, %672, %cst_159 [1] : vector<16x32xf32> to vector<16xf32>
    %674 = vector.shape_cast %673 : vector<16xf32> to vector<16x1xf32>
    %675 = arith.addf %660, %674 : vector<16x1xf32>
    %676 = vector.extract_strided_slice %593 {offsets = [16, 0], sizes = [40, 32], strides = [1, 1]} : vector<72x32xf32> to vector<40x32xf32>
    %cst_160 = arith.constant dense<0.000000e+00> : vector<16x32xf32>
    %677 = tpu.matmul %594, %676, %cst_160 {dimension_numbers = #tpu.dot_dimension_numbers<[1], [0], [0], [1], [0, 0, 1, 1], [], []>} : vector<16x40xf32>, vector<40x32xf32>, vector<16x32xf32> -> vector<16x32xf32>
    %678 = vector.broadcast %29 : vector<16x1xf32> to vector<16x32xf32>
    %679 = arith.addf %677, %678 : vector<16x32xf32>
    %cst_161 = arith.constant 0.000000e+00 : f32
    %680 = vector.broadcast %cst_161 : f32 to vector<16x32xf32>
    %681 = arith.maximumf %679, %680 : vector<16x32xf32>
    %682 = vector.broadcast %20 : vector<1x32xf32> to vector<16x32xf32>
    %683 = arith.mulf %681, %682 : vector<16x32xf32>
    %cst_162 = arith.constant dense<0.000000e+00> : vector<16xf32>
    %684 = vector.multi_reduction <add>, %683, %cst_162 [1] : vector<16x32xf32> to vector<16xf32>
    %685 = vector.shape_cast %684 : vector<16xf32> to vector<16x1xf32>
    %686 = arith.addf %671, %685 : vector<16x1xf32>
    %687 = arith.mulf %683, %683 : vector<16x32xf32>
    %cst_163 = arith.constant dense<0.000000e+00> : vector<16xf32>
    %688 = vector.multi_reduction <add>, %687, %cst_163 [1] : vector<16x32xf32> to vector<16xf32>
    %689 = vector.shape_cast %688 : vector<16xf32> to vector<16x1xf32>
    %690 = arith.addf %675, %689 : vector<16x1xf32>
    %691 = vector.extract_strided_slice %593 {offsets = [24, 0], sizes = [40, 32], strides = [1, 1]} : vector<72x32xf32> to vector<40x32xf32>
    %cst_164 = arith.constant dense<0.000000e+00> : vector<16x32xf32>
    %692 = tpu.matmul %594, %691, %cst_164 {dimension_numbers = #tpu.dot_dimension_numbers<[1], [0], [0], [1], [0, 0, 1, 1], [], []>} : vector<16x40xf32>, vector<40x32xf32>, vector<16x32xf32> -> vector<16x32xf32>
    %693 = vector.broadcast %29 : vector<16x1xf32> to vector<16x32xf32>
    %694 = arith.addf %692, %693 : vector<16x32xf32>
    %cst_165 = arith.constant 0.000000e+00 : f32
    %695 = vector.broadcast %cst_165 : f32 to vector<16x32xf32>
    %696 = arith.maximumf %694, %695 : vector<16x32xf32>
    %697 = vector.broadcast %20 : vector<1x32xf32> to vector<16x32xf32>
    %698 = arith.mulf %696, %697 : vector<16x32xf32>
    %cst_166 = arith.constant dense<0.000000e+00> : vector<16xf32>
    %699 = vector.multi_reduction <add>, %698, %cst_166 [1] : vector<16x32xf32> to vector<16xf32>
    %700 = vector.shape_cast %699 : vector<16xf32> to vector<16x1xf32>
    %701 = arith.addf %686, %700 : vector<16x1xf32>
    %702 = arith.mulf %698, %698 : vector<16x32xf32>
    %cst_167 = arith.constant dense<0.000000e+00> : vector<16xf32>
    %703 = vector.multi_reduction <add>, %702, %cst_167 [1] : vector<16x32xf32> to vector<16xf32>
    %704 = vector.shape_cast %703 : vector<16xf32> to vector<16x1xf32>
    %705 = arith.addf %690, %704 : vector<16x1xf32>
    %706 = vector.extract_strided_slice %593 {offsets = [32, 0], sizes = [40, 32], strides = [1, 1]} : vector<72x32xf32> to vector<40x32xf32>
    %cst_168 = arith.constant dense<0.000000e+00> : vector<16x32xf32>
    %707 = tpu.matmul %594, %706, %cst_168 {dimension_numbers = #tpu.dot_dimension_numbers<[1], [0], [0], [1], [0, 0, 1, 1], [], []>} : vector<16x40xf32>, vector<40x32xf32>, vector<16x32xf32> -> vector<16x32xf32>
    %708 = vector.broadcast %29 : vector<16x1xf32> to vector<16x32xf32>
    %709 = arith.addf %707, %708 : vector<16x32xf32>
    %cst_169 = arith.constant 0.000000e+00 : f32
    %710 = vector.broadcast %cst_169 : f32 to vector<16x32xf32>
    %711 = arith.maximumf %709, %710 : vector<16x32xf32>
    %712 = vector.broadcast %20 : vector<1x32xf32> to vector<16x32xf32>
    %713 = arith.mulf %711, %712 : vector<16x32xf32>
    %cst_170 = arith.constant dense<0.000000e+00> : vector<16xf32>
    %714 = vector.multi_reduction <add>, %713, %cst_170 [1] : vector<16x32xf32> to vector<16xf32>
    %715 = vector.shape_cast %714 : vector<16xf32> to vector<16x1xf32>
    %716 = arith.addf %701, %715 : vector<16x1xf32>
    %717 = arith.mulf %713, %713 : vector<16x32xf32>
    %cst_171 = arith.constant dense<0.000000e+00> : vector<16xf32>
    %718 = vector.multi_reduction <add>, %717, %cst_171 [1] : vector<16x32xf32> to vector<16xf32>
    %719 = vector.shape_cast %718 : vector<16xf32> to vector<16x1xf32>
    %720 = arith.addf %705, %719 : vector<16x1xf32>
    %721 = vector.extract_strided_slice %593 {offsets = [40, 0], sizes = [8, 32], strides = [1, 1]} : vector<72x32xf32> to vector<8x32xf32>
    %722 = vector.extract_strided_slice %593 {offsets = [48, 0], sizes = [8, 32], strides = [1, 1]} : vector<72x32xf32> to vector<8x32xf32>
    %723 = vector.extract_strided_slice %593 {offsets = [56, 0], sizes = [8, 32], strides = [1, 1]} : vector<72x32xf32> to vector<8x32xf32>
    %724 = vector.extract_strided_slice %593 {offsets = [64, 0], sizes = [8, 32], strides = [1, 1]} : vector<72x32xf32> to vector<8x32xf32>
    %725 = vector.extract_strided_slice %593 {offsets = [0, 0], sizes = [8, 32], strides = [1, 1]} : vector<72x32xf32> to vector<8x32xf32>
    %cst_172 = arith.constant 0.000000e+00 : f32
    %726 = vector.broadcast %cst_172 : f32 to vector<8x1xf32>
    %727 = vector.extract_strided_slice %725 {offsets = [0, 1], sizes = [8, 31], strides = [1, 1]} : vector<8x32xf32> to vector<8x31xf32>
    %728 = tpu.concatenate %727, %726 in 1 : vector<8x31xf32>, vector<8x1xf32> -> vector<8x32xf32>
    %729 = tpu.concatenate %721, %722, %723, %724, %728 in 0 : vector<8x32xf32>, vector<8x32xf32>, vector<8x32xf32>, vector<8x32xf32>, vector<8x32xf32> -> vector<40x32xf32>
    %cst_173 = arith.constant dense<0.000000e+00> : vector<16x32xf32>
    %730 = tpu.matmul %594, %729, %cst_173 {dimension_numbers = #tpu.dot_dimension_numbers<[1], [0], [0], [1], [0, 0, 1, 1], [], []>} : vector<16x40xf32>, vector<40x32xf32>, vector<16x32xf32> -> vector<16x32xf32>
    %731 = vector.broadcast %29 : vector<16x1xf32> to vector<16x32xf32>
    %732 = arith.addf %730, %731 : vector<16x32xf32>
    %cst_174 = arith.constant 0.000000e+00 : f32
    %733 = vector.broadcast %cst_174 : f32 to vector<16x32xf32>
    %734 = arith.maximumf %732, %733 : vector<16x32xf32>
    %735 = vector.broadcast %20 : vector<1x32xf32> to vector<16x32xf32>
    %736 = arith.mulf %734, %735 : vector<16x32xf32>
    %cst_175 = arith.constant dense<0.000000e+00> : vector<16xf32>
    %737 = vector.multi_reduction <add>, %736, %cst_175 [1] : vector<16x32xf32> to vector<16xf32>
    %738 = vector.shape_cast %737 : vector<16xf32> to vector<16x1xf32>
    %739 = arith.addf %716, %738 : vector<16x1xf32>
    %740 = arith.mulf %736, %736 : vector<16x32xf32>
    %cst_176 = arith.constant dense<0.000000e+00> : vector<16xf32>
    %741 = vector.multi_reduction <add>, %740, %cst_176 [1] : vector<16x32xf32> to vector<16xf32>
    %742 = vector.shape_cast %741 : vector<16xf32> to vector<16x1xf32>
    %743 = arith.addf %720, %742 : vector<16x1xf32>
    %744 = vector.extract_strided_slice %593 {offsets = [48, 0], sizes = [8, 32], strides = [1, 1]} : vector<72x32xf32> to vector<8x32xf32>
    %745 = vector.extract_strided_slice %593 {offsets = [56, 0], sizes = [8, 32], strides = [1, 1]} : vector<72x32xf32> to vector<8x32xf32>
    %746 = vector.extract_strided_slice %593 {offsets = [64, 0], sizes = [8, 32], strides = [1, 1]} : vector<72x32xf32> to vector<8x32xf32>
    %747 = vector.extract_strided_slice %593 {offsets = [0, 0], sizes = [8, 32], strides = [1, 1]} : vector<72x32xf32> to vector<8x32xf32>
    %cst_177 = arith.constant 0.000000e+00 : f32
    %748 = vector.broadcast %cst_177 : f32 to vector<8x1xf32>
    %749 = vector.extract_strided_slice %747 {offsets = [0, 1], sizes = [8, 31], strides = [1, 1]} : vector<8x32xf32> to vector<8x31xf32>
    %750 = tpu.concatenate %749, %748 in 1 : vector<8x31xf32>, vector<8x1xf32> -> vector<8x32xf32>
    %751 = vector.extract_strided_slice %593 {offsets = [8, 0], sizes = [8, 32], strides = [1, 1]} : vector<72x32xf32> to vector<8x32xf32>
    %cst_178 = arith.constant 0.000000e+00 : f32
    %752 = vector.broadcast %cst_178 : f32 to vector<8x1xf32>
    %753 = vector.extract_strided_slice %751 {offsets = [0, 1], sizes = [8, 31], strides = [1, 1]} : vector<8x32xf32> to vector<8x31xf32>
    %754 = tpu.concatenate %753, %752 in 1 : vector<8x31xf32>, vector<8x1xf32> -> vector<8x32xf32>
    %755 = tpu.concatenate %744, %745, %746, %750, %754 in 0 : vector<8x32xf32>, vector<8x32xf32>, vector<8x32xf32>, vector<8x32xf32>, vector<8x32xf32> -> vector<40x32xf32>
    %cst_179 = arith.constant dense<0.000000e+00> : vector<16x32xf32>
    %756 = tpu.matmul %594, %755, %cst_179 {dimension_numbers = #tpu.dot_dimension_numbers<[1], [0], [0], [1], [0, 0, 1, 1], [], []>} : vector<16x40xf32>, vector<40x32xf32>, vector<16x32xf32> -> vector<16x32xf32>
    %757 = vector.broadcast %29 : vector<16x1xf32> to vector<16x32xf32>
    %758 = arith.addf %756, %757 : vector<16x32xf32>
    %cst_180 = arith.constant 0.000000e+00 : f32
    %759 = vector.broadcast %cst_180 : f32 to vector<16x32xf32>
    %760 = arith.maximumf %758, %759 : vector<16x32xf32>
    %761 = vector.broadcast %20 : vector<1x32xf32> to vector<16x32xf32>
    %762 = arith.mulf %760, %761 : vector<16x32xf32>
    %cst_181 = arith.constant dense<0.000000e+00> : vector<16xf32>
    %763 = vector.multi_reduction <add>, %762, %cst_181 [1] : vector<16x32xf32> to vector<16xf32>
    %764 = vector.shape_cast %763 : vector<16xf32> to vector<16x1xf32>
    %765 = arith.addf %739, %764 : vector<16x1xf32>
    %766 = arith.mulf %762, %762 : vector<16x32xf32>
    %cst_182 = arith.constant dense<0.000000e+00> : vector<16xf32>
    %767 = vector.multi_reduction <add>, %766, %cst_182 [1] : vector<16x32xf32> to vector<16xf32>
    %768 = vector.shape_cast %767 : vector<16xf32> to vector<16x1xf32>
    %769 = arith.addf %743, %768 : vector<16x1xf32>
    %cst_183 = arith.constant 2.160000e+02 : f32
    %770 = vector.broadcast %cst_183 : f32 to vector<16x1xf32>
    %771 = arith.divf %765, %770 : vector<16x1xf32>
    %cst_184 = arith.constant 2.160000e+02 : f32
    %772 = vector.broadcast %cst_184 : f32 to vector<16x1xf32>
    %773 = arith.divf %769, %772 : vector<16x1xf32>
    %774 = arith.mulf %771, %771 : vector<16x1xf32>
    %775 = arith.subf %773, %774 : vector<16x1xf32>
    %cst_185 = arith.constant 0.000000e+00 : f32
    %776 = vector.broadcast %cst_185 : f32 to vector<16x1xf32>
    %777 = arith.maximumf %775, %776 : vector<16x1xf32>
    %cst_186 = arith.constant 9.99999974E-6 : f32
    %778 = vector.broadcast %cst_186 : f32 to vector<16x1xf32>
    %779 = arith.addf %777, %778 : vector<16x1xf32>
    %780 = math.rsqrt %779 : vector<16x1xf32>
    %781 = arith.mulf %30, %780 : vector<16x1xf32>
    %782 = arith.mulf %771, %781 : vector<16x1xf32>
    %783 = arith.subf %31, %782 : vector<16x1xf32>
    %784 = arith.addf %615, %638 : vector<16x32xf32>
    %785 = arith.addf %784, %653 : vector<16x32xf32>
    %cst_187 = arith.constant 0.333333343 : f32
    %786 = vector.broadcast %cst_187 : f32 to vector<16x32xf32>
    %787 = arith.mulf %785, %786 : vector<16x32xf32>
    %788 = vector.broadcast %781 : vector<16x1xf32> to vector<16x32xf32>
    %789 = arith.mulf %788, %787 : vector<16x32xf32>
    %790 = vector.broadcast %783 : vector<16x1xf32> to vector<16x32xf32>
    %791 = arith.addf %789, %790 : vector<16x32xf32>
    %792 = vector.broadcast %20 : vector<1x32xf32> to vector<16x32xf32>
    %793 = arith.mulf %791, %792 : vector<16x32xf32>
    %794 = arith.addf %668, %683 : vector<16x32xf32>
    %795 = arith.addf %794, %698 : vector<16x32xf32>
    %cst_188 = arith.constant 0.333333343 : f32
    %796 = vector.broadcast %cst_188 : f32 to vector<16x32xf32>
    %797 = arith.mulf %795, %796 : vector<16x32xf32>
    %798 = vector.broadcast %781 : vector<16x1xf32> to vector<16x32xf32>
    %799 = arith.mulf %798, %797 : vector<16x32xf32>
    %800 = vector.broadcast %783 : vector<16x1xf32> to vector<16x32xf32>
    %801 = arith.addf %799, %800 : vector<16x32xf32>
    %802 = vector.broadcast %20 : vector<1x32xf32> to vector<16x32xf32>
    %803 = arith.mulf %801, %802 : vector<16x32xf32>
    %804 = arith.addf %713, %736 : vector<16x32xf32>
    %805 = arith.addf %804, %762 : vector<16x32xf32>
    %cst_189 = arith.constant 0.333333343 : f32
    %806 = vector.broadcast %cst_189 : f32 to vector<16x32xf32>
    %807 = arith.mulf %805, %806 : vector<16x32xf32>
    %808 = vector.broadcast %781 : vector<16x1xf32> to vector<16x32xf32>
    %809 = arith.mulf %808, %807 : vector<16x32xf32>
    %810 = vector.broadcast %783 : vector<16x1xf32> to vector<16x32xf32>
    %811 = arith.addf %809, %810 : vector<16x32xf32>
    %812 = vector.broadcast %20 : vector<1x32xf32> to vector<16x32xf32>
    %813 = arith.mulf %811, %812 : vector<16x32xf32>
    %814 = tpu.concatenate %793, %803, %813 in 0 : vector<16x32xf32>, vector<16x32xf32>, vector<16x32xf32> -> vector<48x32xf32>
    %c0_190 = arith.constant 0 : index
    %c0_191 = arith.constant 0 : index
    %815 = vector.load %arg3[%c0_190, %c0_191] : memref<32x80xf32, #tpu.memory_space<vmem>>, vector<32x80xf32>
    %cst_192 = arith.constant 0.000000e+00 : f32
    %816 = vector.broadcast %cst_192 : f32 to vector<32x1xf32>
    %cst_193 = arith.constant 0.000000e+00 : f32
    %817 = vector.broadcast %cst_193 : f32 to vector<32x1xf32>
    %818 = vector.extract_strided_slice %814 {offsets = [16, 0], sizes = [16, 32], strides = [1, 1]} : vector<48x32xf32> to vector<16x32xf32>
    %cst_194 = arith.constant 0.000000e+00 : f32
    %819 = vector.broadcast %cst_194 : f32 to vector<16x1xf32>
    %820 = vector.extract_strided_slice %818 {offsets = [0, 0], sizes = [16, 31], strides = [1, 1]} : vector<16x32xf32> to vector<16x31xf32>
    %821 = tpu.concatenate %819, %820 in 1 : vector<16x1xf32>, vector<16x31xf32> -> vector<16x32xf32>
    %822 = vector.extract_strided_slice %814 {offsets = [32, 0], sizes = [16, 32], strides = [1, 1]} : vector<48x32xf32> to vector<16x32xf32>
    %cst_195 = arith.constant 0.000000e+00 : f32
    %823 = vector.broadcast %cst_195 : f32 to vector<16x1xf32>
    %824 = vector.extract_strided_slice %822 {offsets = [0, 0], sizes = [16, 31], strides = [1, 1]} : vector<16x32xf32> to vector<16x31xf32>
    %825 = tpu.concatenate %823, %824 in 1 : vector<16x1xf32>, vector<16x31xf32> -> vector<16x32xf32>
    %826 = vector.extract_strided_slice %814 {offsets = [0, 0], sizes = [16, 32], strides = [1, 1]} : vector<48x32xf32> to vector<16x32xf32>
    %827 = vector.extract_strided_slice %814 {offsets = [16, 0], sizes = [16, 32], strides = [1, 1]} : vector<48x32xf32> to vector<16x32xf32>
    %828 = vector.extract_strided_slice %814 {offsets = [32, 0], sizes = [16, 32], strides = [1, 1]} : vector<48x32xf32> to vector<16x32xf32>
    %829 = tpu.concatenate %821, %825, %826, %827, %828 in 0 : vector<16x32xf32>, vector<16x32xf32>, vector<16x32xf32>, vector<16x32xf32>, vector<16x32xf32> -> vector<80x32xf32>
    %cst_196 = arith.constant dense<0.000000e+00> : vector<32x32xf32>
    %830 = tpu.matmul %815, %829, %cst_196 {dimension_numbers = #tpu.dot_dimension_numbers<[1], [0], [0], [1], [0, 0, 1, 1], [], []>} : vector<32x80xf32>, vector<80x32xf32>, vector<32x32xf32> -> vector<32x32xf32>
    %831 = vector.broadcast %32 : vector<32x1xf32> to vector<32x32xf32>
    %832 = arith.addf %830, %831 : vector<32x32xf32>
    %cst_197 = arith.constant 0.000000e+00 : f32
    %833 = vector.broadcast %cst_197 : f32 to vector<32x32xf32>
    %834 = arith.maximumf %832, %833 : vector<32x32xf32>
    %835 = vector.broadcast %20 : vector<1x32xf32> to vector<32x32xf32>
    %836 = arith.mulf %834, %835 : vector<32x32xf32>
    %cst_198 = arith.constant dense<0.000000e+00> : vector<32xf32>
    %837 = vector.multi_reduction <add>, %836, %cst_198 [1] : vector<32x32xf32> to vector<32xf32>
    %838 = vector.shape_cast %837 : vector<32xf32> to vector<32x1xf32>
    %839 = arith.addf %816, %838 : vector<32x1xf32>
    %840 = arith.mulf %836, %836 : vector<32x32xf32>
    %cst_199 = arith.constant dense<0.000000e+00> : vector<32xf32>
    %841 = vector.multi_reduction <add>, %840, %cst_199 [1] : vector<32x32xf32> to vector<32xf32>
    %842 = vector.shape_cast %841 : vector<32xf32> to vector<32x1xf32>
    %843 = arith.addf %817, %842 : vector<32x1xf32>
    %844 = vector.extract_strided_slice %814 {offsets = [32, 0], sizes = [16, 32], strides = [1, 1]} : vector<48x32xf32> to vector<16x32xf32>
    %cst_200 = arith.constant 0.000000e+00 : f32
    %845 = vector.broadcast %cst_200 : f32 to vector<16x1xf32>
    %846 = vector.extract_strided_slice %844 {offsets = [0, 0], sizes = [16, 31], strides = [1, 1]} : vector<16x32xf32> to vector<16x31xf32>
    %847 = tpu.concatenate %845, %846 in 1 : vector<16x1xf32>, vector<16x31xf32> -> vector<16x32xf32>
    %848 = vector.extract_strided_slice %814 {offsets = [0, 0], sizes = [16, 32], strides = [1, 1]} : vector<48x32xf32> to vector<16x32xf32>
    %849 = vector.extract_strided_slice %814 {offsets = [16, 0], sizes = [16, 32], strides = [1, 1]} : vector<48x32xf32> to vector<16x32xf32>
    %850 = vector.extract_strided_slice %814 {offsets = [32, 0], sizes = [16, 32], strides = [1, 1]} : vector<48x32xf32> to vector<16x32xf32>
    %851 = vector.extract_strided_slice %814 {offsets = [0, 0], sizes = [16, 32], strides = [1, 1]} : vector<48x32xf32> to vector<16x32xf32>
    %cst_201 = arith.constant 0.000000e+00 : f32
    %852 = vector.broadcast %cst_201 : f32 to vector<16x1xf32>
    %853 = vector.extract_strided_slice %851 {offsets = [0, 1], sizes = [16, 31], strides = [1, 1]} : vector<16x32xf32> to vector<16x31xf32>
    %854 = tpu.concatenate %853, %852 in 1 : vector<16x31xf32>, vector<16x1xf32> -> vector<16x32xf32>
    %855 = tpu.concatenate %847, %848, %849, %850, %854 in 0 : vector<16x32xf32>, vector<16x32xf32>, vector<16x32xf32>, vector<16x32xf32>, vector<16x32xf32> -> vector<80x32xf32>
    %cst_202 = arith.constant dense<0.000000e+00> : vector<32x32xf32>
    %856 = tpu.matmul %815, %855, %cst_202 {dimension_numbers = #tpu.dot_dimension_numbers<[1], [0], [0], [1], [0, 0, 1, 1], [], []>} : vector<32x80xf32>, vector<80x32xf32>, vector<32x32xf32> -> vector<32x32xf32>
    %857 = vector.broadcast %32 : vector<32x1xf32> to vector<32x32xf32>
    %858 = arith.addf %856, %857 : vector<32x32xf32>
    %cst_203 = arith.constant 0.000000e+00 : f32
    %859 = vector.broadcast %cst_203 : f32 to vector<32x32xf32>
    %860 = arith.maximumf %858, %859 : vector<32x32xf32>
    %861 = vector.broadcast %20 : vector<1x32xf32> to vector<32x32xf32>
    %862 = arith.mulf %860, %861 : vector<32x32xf32>
    %cst_204 = arith.constant dense<0.000000e+00> : vector<32xf32>
    %863 = vector.multi_reduction <add>, %862, %cst_204 [1] : vector<32x32xf32> to vector<32xf32>
    %864 = vector.shape_cast %863 : vector<32xf32> to vector<32x1xf32>
    %865 = arith.addf %839, %864 : vector<32x1xf32>
    %866 = arith.mulf %862, %862 : vector<32x32xf32>
    %cst_205 = arith.constant dense<0.000000e+00> : vector<32xf32>
    %867 = vector.multi_reduction <add>, %866, %cst_205 [1] : vector<32x32xf32> to vector<32xf32>
    %868 = vector.shape_cast %867 : vector<32xf32> to vector<32x1xf32>
    %869 = arith.addf %843, %868 : vector<32x1xf32>
    %870 = vector.extract_strided_slice %814 {offsets = [0, 0], sizes = [16, 32], strides = [1, 1]} : vector<48x32xf32> to vector<16x32xf32>
    %871 = vector.extract_strided_slice %814 {offsets = [16, 0], sizes = [16, 32], strides = [1, 1]} : vector<48x32xf32> to vector<16x32xf32>
    %872 = vector.extract_strided_slice %814 {offsets = [32, 0], sizes = [16, 32], strides = [1, 1]} : vector<48x32xf32> to vector<16x32xf32>
    %873 = vector.extract_strided_slice %814 {offsets = [0, 0], sizes = [16, 32], strides = [1, 1]} : vector<48x32xf32> to vector<16x32xf32>
    %cst_206 = arith.constant 0.000000e+00 : f32
    %874 = vector.broadcast %cst_206 : f32 to vector<16x1xf32>
    %875 = vector.extract_strided_slice %873 {offsets = [0, 1], sizes = [16, 31], strides = [1, 1]} : vector<16x32xf32> to vector<16x31xf32>
    %876 = tpu.concatenate %875, %874 in 1 : vector<16x31xf32>, vector<16x1xf32> -> vector<16x32xf32>
    %877 = vector.extract_strided_slice %814 {offsets = [16, 0], sizes = [16, 32], strides = [1, 1]} : vector<48x32xf32> to vector<16x32xf32>
    %cst_207 = arith.constant 0.000000e+00 : f32
    %878 = vector.broadcast %cst_207 : f32 to vector<16x1xf32>
    %879 = vector.extract_strided_slice %877 {offsets = [0, 1], sizes = [16, 31], strides = [1, 1]} : vector<16x32xf32> to vector<16x31xf32>
    %880 = tpu.concatenate %879, %878 in 1 : vector<16x31xf32>, vector<16x1xf32> -> vector<16x32xf32>
    %881 = tpu.concatenate %870, %871, %872, %876, %880 in 0 : vector<16x32xf32>, vector<16x32xf32>, vector<16x32xf32>, vector<16x32xf32>, vector<16x32xf32> -> vector<80x32xf32>
    %cst_208 = arith.constant dense<0.000000e+00> : vector<32x32xf32>
    %882 = tpu.matmul %815, %881, %cst_208 {dimension_numbers = #tpu.dot_dimension_numbers<[1], [0], [0], [1], [0, 0, 1, 1], [], []>} : vector<32x80xf32>, vector<80x32xf32>, vector<32x32xf32> -> vector<32x32xf32>
    %883 = vector.broadcast %32 : vector<32x1xf32> to vector<32x32xf32>
    %884 = arith.addf %882, %883 : vector<32x32xf32>
    %cst_209 = arith.constant 0.000000e+00 : f32
    %885 = vector.broadcast %cst_209 : f32 to vector<32x32xf32>
    %886 = arith.maximumf %884, %885 : vector<32x32xf32>
    %887 = vector.broadcast %20 : vector<1x32xf32> to vector<32x32xf32>
    %888 = arith.mulf %886, %887 : vector<32x32xf32>
    %cst_210 = arith.constant dense<0.000000e+00> : vector<32xf32>
    %889 = vector.multi_reduction <add>, %888, %cst_210 [1] : vector<32x32xf32> to vector<32xf32>
    %890 = vector.shape_cast %889 : vector<32xf32> to vector<32x1xf32>
    %891 = arith.addf %865, %890 : vector<32x1xf32>
    %892 = arith.mulf %888, %888 : vector<32x32xf32>
    %cst_211 = arith.constant dense<0.000000e+00> : vector<32xf32>
    %893 = vector.multi_reduction <add>, %892, %cst_211 [1] : vector<32x32xf32> to vector<32xf32>
    %894 = vector.shape_cast %893 : vector<32xf32> to vector<32x1xf32>
    %895 = arith.addf %869, %894 : vector<32x1xf32>
    %cst_212 = arith.constant 7.200000e+01 : f32
    %896 = vector.broadcast %cst_212 : f32 to vector<32x1xf32>
    %897 = arith.divf %891, %896 : vector<32x1xf32>
    %cst_213 = arith.constant 7.200000e+01 : f32
    %898 = vector.broadcast %cst_213 : f32 to vector<32x1xf32>
    %899 = arith.divf %895, %898 : vector<32x1xf32>
    %900 = arith.mulf %897, %897 : vector<32x1xf32>
    %901 = arith.subf %899, %900 : vector<32x1xf32>
    %cst_214 = arith.constant 0.000000e+00 : f32
    %902 = vector.broadcast %cst_214 : f32 to vector<32x1xf32>
    %903 = arith.maximumf %901, %902 : vector<32x1xf32>
    %cst_215 = arith.constant 9.99999974E-6 : f32
    %904 = vector.broadcast %cst_215 : f32 to vector<32x1xf32>
    %905 = arith.addf %903, %904 : vector<32x1xf32>
    %906 = math.rsqrt %905 : vector<32x1xf32>
    %907 = arith.mulf %33, %906 : vector<32x1xf32>
    %908 = arith.mulf %897, %907 : vector<32x1xf32>
    %909 = arith.subf %34, %908 : vector<32x1xf32>
    %910 = arith.addf %836, %862 : vector<32x32xf32>
    %911 = arith.addf %910, %888 : vector<32x32xf32>
    %cst_216 = arith.constant 0.333333343 : f32
    %912 = vector.broadcast %cst_216 : f32 to vector<32x32xf32>
    %913 = arith.mulf %911, %912 : vector<32x32xf32>
    %914 = vector.broadcast %907 : vector<32x1xf32> to vector<32x32xf32>
    %915 = arith.mulf %914, %913 : vector<32x32xf32>
    %916 = vector.broadcast %909 : vector<32x1xf32> to vector<32x32xf32>
    %917 = arith.addf %915, %916 : vector<32x32xf32>
    %918 = vector.broadcast %20 : vector<1x32xf32> to vector<32x32xf32>
    %919 = arith.mulf %917, %918 : vector<32x32xf32>
    %cst_217 = arith.constant 0.000000e+00 : f32
    %920 = vector.broadcast %cst_217 : f32 to vector<32x1xf32>
    %921 = vector.extract_strided_slice %919 {offsets = [0, 1], sizes = [32, 31], strides = [1, 1]} : vector<32x32xf32> to vector<32x31xf32>
    %922 = tpu.concatenate %921, %920 in 1 : vector<32x31xf32>, vector<32x1xf32> -> vector<32x32xf32>
    %cst_218 = arith.constant 0.000000e+00 : f32
    %923 = vector.broadcast %cst_218 : f32 to vector<32x2xf32>
    %924 = vector.extract_strided_slice %919 {offsets = [0, 2], sizes = [32, 30], strides = [1, 1]} : vector<32x32xf32> to vector<32x30xf32>
    %925 = tpu.concatenate %924, %923 in 1 : vector<32x30xf32>, vector<32x2xf32> -> vector<32x32xf32>
    %cst_219 = arith.constant 0.000000e+00 : f32
    %926 = vector.broadcast %cst_219 : f32 to vector<32x3xf32>
    %927 = vector.extract_strided_slice %919 {offsets = [0, 3], sizes = [32, 29], strides = [1, 1]} : vector<32x32xf32> to vector<32x29xf32>
    %928 = tpu.concatenate %927, %926 in 1 : vector<32x29xf32>, vector<32x3xf32> -> vector<32x32xf32>
    %cst_220 = arith.constant 0.000000e+00 : f32
    %929 = vector.broadcast %cst_220 : f32 to vector<32x4xf32>
    %930 = vector.extract_strided_slice %919 {offsets = [0, 4], sizes = [32, 28], strides = [1, 1]} : vector<32x32xf32> to vector<32x28xf32>
    %931 = tpu.concatenate %930, %929 in 1 : vector<32x28xf32>, vector<32x4xf32> -> vector<32x32xf32>
    %cst_221 = arith.constant 0.000000e+00 : f32
    %932 = vector.broadcast %cst_221 : f32 to vector<32x5xf32>
    %933 = vector.extract_strided_slice %919 {offsets = [0, 5], sizes = [32, 27], strides = [1, 1]} : vector<32x32xf32> to vector<32x27xf32>
    %934 = tpu.concatenate %933, %932 in 1 : vector<32x27xf32>, vector<32x5xf32> -> vector<32x32xf32>
    %935 = tpu.concatenate %919, %922, %925, %928, %931, %934 in 0 : vector<32x32xf32>, vector<32x32xf32>, vector<32x32xf32>, vector<32x32xf32>, vector<32x32xf32>, vector<32x32xf32> -> vector<192x32xf32>
    %c0_222 = arith.constant 0 : index
    %c0_223 = arith.constant 0 : index
    %936 = vector.load %arg4[%c0_222, %c0_223] : memref<64x192xf32, #tpu.memory_space<vmem>>, vector<64x192xf32>
    %cst_224 = arith.constant dense<0.000000e+00> : vector<64x32xf32>
    %937 = tpu.matmul %936, %935, %cst_224 {dimension_numbers = #tpu.dot_dimension_numbers<[1], [0], [0], [1], [0, 0, 1, 1], [], []>} : vector<64x192xf32>, vector<192x32xf32>, vector<64x32xf32> -> vector<64x32xf32>
    %938 = vector.broadcast %35 : vector<64x1xf32> to vector<64x32xf32>
    %939 = arith.addf %937, %938 : vector<64x32xf32>
    %cst_225 = arith.constant 0.000000e+00 : f32
    %940 = vector.broadcast %cst_225 : f32 to vector<64x32xf32>
    %941 = arith.maximumf %939, %940 : vector<64x32xf32>
    %942 = vector.broadcast %24 : vector<1x32xf32> to vector<64x32xf32>
    %943 = arith.mulf %941, %942 : vector<64x32xf32>
    %cst_226 = arith.constant dense<0.000000e+00> : vector<64xf32>
    %944 = vector.multi_reduction <add>, %943, %cst_226 [1] : vector<64x32xf32> to vector<64xf32>
    %945 = vector.shape_cast %944 : vector<64xf32> to vector<64x1xf32>
    %cst_227 = arith.constant 4.000000e+00 : f32
    %946 = vector.broadcast %cst_227 : f32 to vector<64x1xf32>
    %947 = arith.divf %945, %946 : vector<64x1xf32>
    %948 = arith.mulf %943, %943 : vector<64x32xf32>
    %cst_228 = arith.constant dense<0.000000e+00> : vector<64xf32>
    %949 = vector.multi_reduction <add>, %948, %cst_228 [1] : vector<64x32xf32> to vector<64xf32>
    %950 = vector.shape_cast %949 : vector<64xf32> to vector<64x1xf32>
    %cst_229 = arith.constant 4.000000e+00 : f32
    %951 = vector.broadcast %cst_229 : f32 to vector<64x1xf32>
    %952 = arith.divf %950, %951 : vector<64x1xf32>
    %953 = arith.mulf %947, %947 : vector<64x1xf32>
    %954 = arith.subf %952, %953 : vector<64x1xf32>
    %cst_230 = arith.constant 0.000000e+00 : f32
    %955 = vector.broadcast %cst_230 : f32 to vector<64x1xf32>
    %956 = arith.maximumf %954, %955 : vector<64x1xf32>
    %cst_231 = arith.constant 9.99999974E-6 : f32
    %957 = vector.broadcast %cst_231 : f32 to vector<64x1xf32>
    %958 = arith.addf %956, %957 : vector<64x1xf32>
    %959 = math.rsqrt %958 : vector<64x1xf32>
    %960 = arith.mulf %36, %959 : vector<64x1xf32>
    %961 = vector.broadcast %960 : vector<64x1xf32> to vector<64x32xf32>
    %962 = arith.mulf %941, %961 : vector<64x32xf32>
    %963 = arith.mulf %947, %960 : vector<64x1xf32>
    %964 = arith.subf %37, %963 : vector<64x1xf32>
    %965 = vector.broadcast %964 : vector<64x1xf32> to vector<64x32xf32>
    %966 = arith.addf %962, %965 : vector<64x32xf32>
    %c0_232 = arith.constant 0 : index
    %c0_233 = arith.constant 0 : index
    %967 = vector.load %arg5[%c0_232, %c0_233] : memref<32x64xf32, #tpu.memory_space<vmem>>, vector<32x64xf32>
    %cst_234 = arith.constant dense<0.000000e+00> : vector<32x32xf32>
    %968 = tpu.matmul %967, %966, %cst_234 {dimension_numbers = #tpu.dot_dimension_numbers<[1], [0], [0], [1], [0, 0, 1, 1], [], []>} : vector<32x64xf32>, vector<64x32xf32>, vector<32x32xf32> -> vector<32x32xf32>
    %969 = vector.broadcast %38 : vector<32x1xf32> to vector<32x32xf32>
    %970 = arith.addf %968, %969 : vector<32x32xf32>
    %cst_235 = arith.constant 0.000000e+00 : f32
    %971 = vector.broadcast %cst_235 : f32 to vector<32x32xf32>
    %972 = arith.maximumf %970, %971 : vector<32x32xf32>
    %973 = vector.broadcast %24 : vector<1x32xf32> to vector<32x32xf32>
    %974 = arith.mulf %972, %973 : vector<32x32xf32>
    %cst_236 = arith.constant dense<0.000000e+00> : vector<32xf32>
    %975 = vector.multi_reduction <add>, %974, %cst_236 [1] : vector<32x32xf32> to vector<32xf32>
    %976 = vector.shape_cast %975 : vector<32xf32> to vector<32x1xf32>
    %cst_237 = arith.constant 4.000000e+00 : f32
    %977 = vector.broadcast %cst_237 : f32 to vector<32x1xf32>
    %978 = arith.divf %976, %977 : vector<32x1xf32>
    %979 = arith.mulf %974, %974 : vector<32x32xf32>
    %cst_238 = arith.constant dense<0.000000e+00> : vector<32xf32>
    %980 = vector.multi_reduction <add>, %979, %cst_238 [1] : vector<32x32xf32> to vector<32xf32>
    %981 = vector.shape_cast %980 : vector<32xf32> to vector<32x1xf32>
    %cst_239 = arith.constant 4.000000e+00 : f32
    %982 = vector.broadcast %cst_239 : f32 to vector<32x1xf32>
    %983 = arith.divf %981, %982 : vector<32x1xf32>
    %984 = arith.mulf %978, %978 : vector<32x1xf32>
    %985 = arith.subf %983, %984 : vector<32x1xf32>
    %cst_240 = arith.constant 0.000000e+00 : f32
    %986 = vector.broadcast %cst_240 : f32 to vector<32x1xf32>
    %987 = arith.maximumf %985, %986 : vector<32x1xf32>
    %cst_241 = arith.constant 9.99999974E-6 : f32
    %988 = vector.broadcast %cst_241 : f32 to vector<32x1xf32>
    %989 = arith.addf %987, %988 : vector<32x1xf32>
    %990 = math.rsqrt %989 : vector<32x1xf32>
    %991 = arith.mulf %39, %990 : vector<32x1xf32>
    %992 = vector.broadcast %991 : vector<32x1xf32> to vector<32x32xf32>
    %993 = arith.mulf %972, %992 : vector<32x32xf32>
    %994 = arith.mulf %978, %991 : vector<32x1xf32>
    %995 = arith.subf %40, %994 : vector<32x1xf32>
    %996 = vector.broadcast %995 : vector<32x1xf32> to vector<32x32xf32>
    %997 = arith.addf %993, %996 : vector<32x32xf32>
    %c0_242 = arith.constant 0 : index
    %c0_243 = arith.constant 0 : index
    %998 = vector.load %arg6[%c0_242, %c0_243] : memref<32x1xf32, #tpu.memory_space<vmem>>, vector<32x1xf32>
    %999 = vector.broadcast %998 : vector<32x1xf32> to vector<32x32xf32>
    %1000 = arith.mulf %999, %997 : vector<32x32xf32>
    %cst_244 = arith.constant dense<0.000000e+00> : vector<32xf32>
    %1001 = vector.multi_reduction <add>, %1000, %cst_244 [0] : vector<32x32xf32> to vector<32xf32>
    %1002 = vector.shape_cast %1001 : vector<32xf32> to vector<1x32xf32>
    %1003 = vector.broadcast %41 : vector<1x1xf32> to vector<1x32xf32>
    %1004 = arith.addf %1002, %1003 : vector<1x32xf32>
    %c0_245 = arith.constant 0 : index
    %c0_246 = arith.constant 0 : index
    %1005 = vector.load %arg8[%c0_245, %c0_246] : memref<1x32xf32, #tpu.memory_space<vmem>>, vector<1x32xf32>
    tpu.vector_store %arg8[%c0_245, %c0_246], %1004 {strides = array<i32>} : memref<1x32xf32, #tpu.memory_space<vmem>>, vector<1x32xf32>,
    return
  }
}

</mosaic_0001>

<bundles_post_ra>
// kernel: tpu_custom_call.1
= control target key start
LH: loop header
LB: loop body
LE: loop exit
PB: predicated region body
PF: predicated region fallthrough
CT: control target
= control target key end

     0   :  { %s5948_s9 = smov 127   ;;  %s5949_s10 = smov 1   ;;  %v5950_v4 = vmov 0.0   ;;  %vm5951_vm0 = vmmov 0   ;;  %s7333_s0 = inlined_call_operand.vmem [shape: f32[27,32], index: 0, kind: input, shape index: {}]   ;;  %s7334_s1 = inlined_call_operand.vmem [shape: f32[8,5], index: 1, kind: input, shape index: {}]   ;;  %s7335_s2 = inlined_call_operand.vmem [shape: f32[16,40], index: 2, kind: input, shape index: {}]   ;;  %s7336_s3 = inlined_call_operand.vmem [shape: f32[32,80], index: 3, kind: input, shape index: {}]   ;;  %s7337_s4 = inlined_call_operand.vmem [shape: f32[64,192], index: 4, kind: input, shape index: {}]   ;;  %s7338_s5 = inlined_call_operand.vmem [shape: f32[32,64], index: 5, kind: input, shape index: {}]   ;;  %s7339_s6 = inlined_call_operand.vmem [shape: f32[32,1], index: 6, kind: input, shape index: {}]   ;;  %s7340_s7 = inlined_call_operand.vmem [shape: f32[457,1], index: 7, kind: input, shape index: {}]   ;;  %s7341_s8 = inlined_call_operand.hbm [shape: f32[1,32], index: 8, kind: output, shape index: {}]  }
   0x1   :  { %v6008_v0 = vld [vmem:[%s7333_s0 + $0x18] sm:$0x7]  ;;  %v6013_v1 = vld [vmem:[%s7333_s0] sm:$0xff]  ;;  %5238 = vmatprep.subr.mxu1 %v5950_v4  ;;  %5240 = vmatprep.mubr.msk.f32.mxu1 %vm5951_vm0, %v5950_v4 }
   0x2   :  { %v120_v2 = vrot.slane %v6008_v0, 2  ;;  %2268 = vrot.lane.b32.xlu1 %v6013_v1, %s5948_s9  ;;  %v114_v3 = vrot.slane %v6008_v0, 1  ;;  %5233 = vmatprep.subr.mxu0 %v5950_v4 }
   0x4   :  { %121 = vrot.lane.b32.xlu0 %v120_v2, %s5949_s10 }
   0x5   :  { %13 = vsyncpa [#allocation3], 0  ;;  %5235 = vmatprep.mubr.msk.f32.mxu0 %vm5951_vm0, %v5950_v4  ;;  %v50_v5 = vld [vmem:[%s7340_s7] sm:$0xff]  ;;  %v5952_v6 = vmov 0   ;;  %vm118_vm1 = vcmask 7168   ;;  %v234_v7 = vrot.slane %v6013_v1, 7 }
   0x6   :  { %5809 = vset.pattern.permute.xlu1 %v5952_v6  ;;  %5810 = vset.pattern.permute.xlu0 %v5952_v6  ;;  %vm131_vm2 = vcmask 1040384   ;;  %vm133_vm3 = vcmask 1041408   ;;  %vm135_vm4 = vcmask 1042432   ;;  %vm137_vm5 = vcmask 1043456   ;;  %v6039_v16 = vld [vmem:[%s7334_s1] sm:$0xff]  ;;  %v6053_v22 = vld [vmem:[%s7333_s0 + $0x8] sm:$0xff]  ;;  %vm4973_vm12 = vmneg %vm118_vm1 }
   0x7   :  { %141 = vperm.xlu1 %5809, %v50_v5   ;;  %vm148_vm6 = vcmask 1044480   ;;  %v129_v12 = vrot.slane %v6013_v1, 6  ;;  %vm144_vm7 = vcmask 39936   ;;  %v407_v17 = vrot.slane %v6013_v1, 1  ;;  %v6119_v38 = vld [vmem:[%s7333_s0 + $0x10] sm:$0xff]  ;;  %vm6576_vm13 = vmpackc.low %vm4973_vm12, %vm4973_vm12  ;;  %s5956_s21 = smov 125  }
   0x8   :  { %115 = vrot.lane.b32.xlu0 %v114_v3, %s5949_s10  ;;  %v575_v25 = vrot.slane %v6013_v1, 3  ;;  %v746_v26 = vrot.slane %v6013_v1, 5  ;;  %v747_v27 = vrot.slane %v6053_v22, 5  ;;  %v491_v28 = vrot.slane %v6013_v1, 2  ;;  %s5957_s22 = smov 124   ;;  %s5958_s23 = smov 123  }
   0x9   :  { %v660_v29 = vrot.slane %v6013_v1, 4  ;;  %v661_v30 = vrot.slane %v6053_v22, 4  ;;  %v917_v32 = vrot.slane %v6053_v22, 7  ;;  %v832_v34 = vrot.slane %v6053_v22, 6 }
   0xa   :  { %v748_v31 = vsel %vm135_vm4, %v746_v26, %v747_v27  ;;  %v1085_v37 = vrot.slane %v6053_v22, 1  ;;  %v1253_v39 = vrot.slane %v6053_v22, 3  ;;  %v1423_v40 = vrot.slane %v6119_v38, 5 }
   0xb   :  { %v662_v33 = vsel %vm137_vm5, %v660_v29, %v661_v30  ;;  %v918_v35 = vsel %vm131_vm2, %v234_v7, %v917_v32  ;;  %v833_v36 = vsel %vm133_vm3, %v129_v12, %v832_v34  ;;  %v1169_v41 = vrot.slane %v6053_v22, 2 }
   0xc   :  { %v1338_v42 = vrot.slane %v6119_v38, 4  ;;  %v1424_v43 = vsel %vm135_vm4, %v747_v27, %v1423_v40  ;;  %v1593_v44 = vrot.slane %v6119_v38, 7  ;;  %v1508_v46 = vrot.slane %v6119_v38, 6 }
   0xd   :  { %v1761_v49 = vrot.slane %v6119_v38, 1  ;;  %v2274_v50 = vrot.slane %v6008_v0, 7  ;;  %vm2271_vm8 = vcmask 252928   ;;  %v1929_v52 = vrot.slane %v6119_v38, 3 }
   0xe   :  { %v1339_v45 = vsel %vm137_vm5, %v661_v30, %v1338_v42  ;;  %v1594_v47 = vsel %vm131_vm2, %v917_v32, %v1593_v44  ;;  %v1509_v48 = vsel %vm133_vm3, %v832_v34, %v1508_v46  ;;  %v2098_v54 = vrot.slane %v6008_v0, 5 }
   0xf   :  { %v2279_v53 = vsel %vm131_vm2, %v1593_v44, %v2274_v50  ;;  %v1845_v56 = vrot.slane %v6119_v38, 2  ;;  %v2013_v58 = vrot.slane %v6008_v0, 4  ;;  %v2183_v63 = vrot.slane %v6008_v0, 6 }
  0x10   :  { %v2280_v57 = vsel %vm133_vm3, %v2279_v53, %v2274_v50  ;;  %v2099_v60 = vsel %vm135_vm4, %v1423_v40, %v2098_v54  ;;  %v30_v6 = vlaneseq  ;;  %vm224_vm10 = vcmask 261120  }
  0x11   :  { %v2281_v61 = vsel %vm135_vm4, %v2280_v57, %v2274_v50  ;;  %v2014_v62 = vsel %vm137_vm5, %v1338_v42, %v2013_v58  ;;  %v2184_v3 = vsel %vm133_vm3, %v1508_v46, %v2183_v63  ;;  %vm2552_vm11 = vcmask 326656  }
  0x12   :  { %vm5953_vm14 = vmmov 1  }
  0x13   :  { %vm5596_vm15 = vmpackc.low %vm5953_vm14, %vm4973_vm12 }
  0x74   :  { %v2269_v51 = vpop.permute.xlu1 %2268 }
  0x75   :  { %v2272_v55 = vsel %vm2271_vm8, %v2269_v51, 0.0 }
  0x76   :  { %v122_v8 = vpop.permute.xlu0 %121  ;;  %v2277_v59 = vrot.slane %v2272_v55, 4 }
  0x77   :  { %v124_v9 = vsel %vm118_vm1, 0.0, %v122_v8 }
  0x78   :  { %v236_v10 = vsel %vm131_vm2, %v124_v9, %v234_v7  ;;  %v126_v13 = vrot.slane %v124_v9, 7  ;;  %v2282_v2 = vsel %vm137_vm5, %v2281_v61, %v2277_v59 }
  0x79   :  { %v237_v11 = vsel %vm133_vm3, %v236_v10, %v234_v7 }
  0x7a   :  { %v116_v14 = vpop.permute.xlu0 %115  ;;  %v238_v15 = vsel %vm135_vm4, %v237_v11, %v234_v7 }
  0x7b   :  { %v119_v18 = vsel %vm118_vm1, 0.0, %v116_v14  ;;  %v239_v19 = vsel %vm137_vm5, %v238_v15, %v234_v7  ;;  %v6258_v7 = vand.u32 127, %v30_v6  ;;  %vm3563_vm1 = vcmask 654336  }
  0x7c   :  { %v132_v20 = vsel %vm131_vm2, %v119_v18, %v126_v13  ;;  %5239 = vmatpush3.msk.msra.mxu1 %vm148_vm6, %v239_v19  ;;  %vm6823_vm2 = vmpackc.low %vm2271_vm8, %vm2271_vm8 }
  0x7d   :  { %5241 = vmatmul.mubr.msk.f32.vlgmr.msra.gmra.mrb[0].mxu1 %vm144_vm7, %v6039_v16  ;;  %5248 = vmatprep.subr.mxu1 %v5950_v4  ;;  %v134_v21 = vsel %vm133_vm3, %v132_v20, %v129_v12  ;;  %v36_v8 = vand.u32 7, %v6258_v7  ;;  %vm4230_vm3 = vcmask 523264  }
  0x7e   :  { %v136_v23 = vsel %vm135_vm4, %v134_v21, %v129_v12  ;;  %5249 = vmatpush3.msk.msra.mxu1 %vm148_vm6, %v407_v17  ;;  %5250 = vmatprep.mubr.msk.f32.mxu1 %vm5951_vm0, %v5950_v4 }
  0x7f   :  { %v138_v24 = vsel %vm137_vm5, %v136_v23, %v129_v12  ;;  %5258 = vmatprep.subr.mxu1 %v5950_v4  ;;  %vm44_vm9 = vcmp.lt.s32.totalorder %v36_v8, 6 }
  0x80   :  { %5234 = vmatpush3.msk.msra.mxu0 %vm148_vm6, %v138_v24  ;;  %v6267_v13 = vsel %vm44_vm9, 1.0, %v5950_v4 }
  0x81   :  { %5236 = vmatmul.mubr.msk.f32.vlgmr.msra.gmra.mrb[0].mxu0 %vm144_vm7, %v6039_v16  ;;  %5251 = vmatmul.mubr.msk.f32.vlgmr.msra.gmra.mrb[2].mxu1 %vm144_vm7, %v6039_v16 }
  0x82   :  { %5243 = vmatprep.subr.mxu0 %v5950_v4  ;;  %5245 = vmatprep.mubr.msk.f32.mxu0 %vm5951_vm0, %v5950_v4 }
  0x83   :  { %5244 = vmatpush3.msk.msra.mxu0 %vm148_vm6, %v6013_v1  ;;  %5259 = vmatpush3.msk.msra.mxu1 %vm148_vm6, %v575_v25  ;;  %v2367_v1 = vrot.slane %v2272_v55, 5 }
  0x84   :  { %5260 = vmatprep.mubr.msk.f32.mxu1 %vm5951_vm0, %v5950_v4  ;;  %5253 = vmatprep.subr.mxu0 %v5950_v4 }
  0x85   :  { %5246 = vmatmul.mubr.msk.f32.vlgmr.msra.gmra.mrb[2].mxu0 %vm144_vm7, %v6039_v16  ;;  %5261 = vmatmul.mubr.msk.f32.vlgmr.msra.gmra.mrb[4].mxu1 %vm144_vm7, %v6039_v16  ;;  %v2369_v5 = vsel %vm135_vm4, %v6008_v0, %v2367_v1  ;;  %vm4118_vm4 = vcmask 244736  }
  0x86   :  { %5268 = vmatprep.subr.mxu1 %v5950_v4  ;;  %5254 = vmatpush3.msk.msra.mxu0 %vm148_vm6, %v491_v28  ;;  %v2370_v0 = vsel %vm137_vm5, %v2369_v5, %v2367_v1  ;;  %v6261_v9 = vpop.permute.xlu1 %141  ;;  %vm5751_vm5 = vmpackc.low %vm4118_vm4, %vm4118_vm4 }
  0x87   :  { %5255 = vmatprep.mubr.msk.f32.mxu0 %vm5951_vm0, %v5950_v4  ;;  %5269 = vmatpush3.msk.msra.mxu1 %vm148_vm6, %v748_v31 }
  0x88   :  { %5270 = vmatprep.mubr.msk.f32.mxu1 %vm5951_vm0, %v5950_v4  ;;  %5263 = vmatprep.subr.mxu0 %v5950_v4 }
  0x89   :  { %5256 = vmatmul.mubr.msk.f32.vlgmr.msra.gmra.mrb[4].mxu0 %vm144_vm7, %v6039_v16  ;;  %5271 = vmatmul.mubr.msk.f32.vlgmr.msra.gmra.mrb[6].mxu1 %vm144_vm7, %v6039_v16 }
  0x8a   :  { %5278 = vmatprep.subr.mxu1 %v5950_v4  ;;  %5264 = vmatpush3.msk.msra.mxu0 %vm148_vm6, %v662_v33 }
  0x8b   :  { %5265 = vmatprep.mubr.msk.f32.mxu0 %vm5951_vm0, %v5950_v4  ;;  %5279 = vmatpush3.msk.msra.mxu1 %vm148_vm6, %v918_v35 }
  0x8c   :  { %5280 = vmatprep.mubr.msk.f32.mxu1 %vm5951_vm0, %v5950_v4  ;;  %5273 = vmatprep.subr.mxu0 %v5950_v4 }
  0x8d   :  { %5266 = vmatmul.mubr.msk.f32.vlgmr.msra.gmra.mrb[6].mxu0 %vm144_vm7, %v6039_v16  ;;  %5281 = vmatmul.mubr.msk.f32.vlgmr.msra.gmra.mrb[8].mxu1 %vm144_vm7, %v6039_v16 }
  0x8e   :  { %5288 = vmatprep.subr.mxu1 %v5950_v4  ;;  %5274 = vmatpush3.msk.msra.mxu0 %vm148_vm6, %v833_v36 }
  0x8f   :  { %5275 = vmatprep.mubr.msk.f32.mxu0 %vm5951_vm0, %v5950_v4  ;;  %5289 = vmatpush3.msk.msra.mxu1 %vm148_vm6, %v1085_v37 }
  0x90   :  { %5290 = vmatprep.mubr.msk.f32.mxu1 %vm5951_vm0, %v5950_v4  ;;  %5283 = vmatprep.subr.mxu0 %v5950_v4 }
  0x91   :  { %5276 = vmatmul.mubr.msk.f32.vlgmr.msra.gmra.mrb[8].mxu0 %vm144_vm7, %v6039_v16  ;;  %5291 = vmatmul.mubr.msk.f32.vlgmr.msra.gmra.mrb[10].mxu1 %vm144_vm7, %v6039_v16 }
  0x92   :  { %5298 = vmatprep.subr.mxu1 %v5950_v4  ;;  %5284 = vmatpush3.msk.msra.mxu0 %vm148_vm6, %v6053_v22 }
  0x93   :  { %5285 = vmatprep.mubr.msk.f32.mxu0 %vm5951_vm0, %v5950_v4  ;;  %5299 = vmatpush3.msk.msra.mxu1 %vm148_vm6, %v1253_v39 }
  0x94   :  { %5300 = vmatprep.mubr.msk.f32.mxu1 %vm5951_vm0, %v5950_v4  ;;  %5293 = vmatprep.subr.mxu0 %v5950_v4 }
  0x95   :  { %5286 = vmatmul.mubr.msk.f32.vlgmr.msra.gmra.mrb[10].mxu0 %vm144_vm7, %v6039_v16  ;;  %5301 = vmatmul.mubr.msk.f32.vlgmr.msra.gmra.mrb[12].mxu1 %vm144_vm7, %v6039_v16 }
  0x96   :  { %5308 = vmatprep.subr.mxu1 %v5950_v4  ;;  %5294 = vmatpush3.msk.msra.mxu0 %vm148_vm6, %v1169_v41 }
  0x97   :  { %5295 = vmatprep.mubr.msk.f32.mxu0 %vm5951_vm0, %v5950_v4  ;;  %5309 = vmatpush3.msk.msra.mxu1 %vm148_vm6, %v1424_v43 }
  0x98   :  { %5310 = vmatprep.mubr.msk.f32.mxu1 %vm5951_vm0, %v5950_v4  ;;  %5303 = vmatprep.subr.mxu0 %v5950_v4 }
  0x99   :  { %5296 = vmatmul.mubr.msk.f32.vlgmr.msra.gmra.mrb[12].mxu0 %vm144_vm7, %v6039_v16  ;;  %5311 = vmatmul.mubr.msk.f32.vlgmr.msra.gmra.mrb[14].mxu1 %vm144_vm7, %v6039_v16 }
  0x9a   :  { %5318 = vmatprep.subr.mxu1 %v5950_v4  ;;  %5304 = vmatpush3.msk.msra.mxu0 %vm148_vm6, %v1339_v45 }
  0x9b   :  { %5305 = vmatprep.mubr.msk.f32.mxu0 %vm5951_vm0, %v5950_v4  ;;  %5319 = vmatpush3.msk.msra.mxu1 %vm148_vm6, %v1594_v47 }
  0x9c   :  { %5320 = vmatprep.mubr.msk.f32.mxu1 %vm5951_vm0, %v5950_v4  ;;  %5313 = vmatprep.subr.mxu0 %v5950_v4 }
  0x9d   :  { %5306 = vmatmul.mubr.msk.f32.vlgmr.msra.gmra.mrb[14].mxu0 %vm144_vm7, %v6039_v16  ;;  %5321 = vmatmul.mubr.msk.f32.vlgmr.msra.gmra.mrb[16].mxu1 %vm144_vm7, %v6039_v16 }
  0x9e   :  { %5328 = vmatprep.subr.mxu1 %v5950_v4  ;;  %5314 = vmatpush3.msk.msra.mxu0 %vm148_vm6, %v1509_v48 }
  0x9f   :  { %5315 = vmatprep.mubr.msk.f32.mxu0 %vm5951_vm0, %v5950_v4  ;;  %5329 = vmatpush3.msk.msra.mxu1 %vm148_vm6, %v1761_v49 }
  0xa0   :  { %5330 = vmatprep.mubr.msk.f32.mxu1 %vm5951_vm0, %v5950_v4  ;;  %5323 = vmatprep.subr.mxu0 %v5950_v4 }
  0xa1   :  { %5316 = vmatmul.mubr.msk.f32.vlgmr.msra.gmra.mrb[16].mxu0 %vm144_vm7, %v6039_v16  ;;  %5331 = vmatmul.mubr.msk.f32.vlgmr.msra.gmra.mrb[18].mxu1 %vm144_vm7, %v6039_v16 }
  0xa2   :  { %5338 = vmatprep.subr.mxu1 %v5950_v4  ;;  %5324 = vmatpush3.msk.msra.mxu0 %vm148_vm6, %v6119_v38 }
  0xa3   :  { %5325 = vmatprep.mubr.msk.f32.mxu0 %vm5951_vm0, %v5950_v4  ;;  %5339 = vmatpush3.msk.msra.mxu1 %vm148_vm6, %v1929_v52 }
  0xa4   :  { %5340 = vmatprep.mubr.msk.f32.mxu1 %vm5951_vm0, %v5950_v4  ;;  %5333 = vmatprep.subr.mxu0 %v5950_v4 }
  0xa5   :  { %5326 = vmatmul.mubr.msk.f32.vlgmr.msra.gmra.mrb[18].mxu0 %vm144_vm7, %v6039_v16  ;;  %5341 = vmatmul.mubr.msk.f32.vlgmr.msra.gmra.mrb[20].mxu1 %vm144_vm7, %v6039_v16 }
  0xa6   :  { %5348 = vmatprep.subr.mxu1 %v5950_v4  ;;  %5334 = vmatpush3.msk.msra.mxu0 %vm148_vm6, %v1845_v56 }
  0xa7   :  { %5335 = vmatprep.mubr.msk.f32.mxu0 %vm5951_vm0, %v5950_v4  ;;  %5349 = vmatpush3.msk.msra.mxu1 %vm148_vm6, %v2099_v60 }
  0xa8   :  { %5350 = vmatprep.mubr.msk.f32.mxu1 %vm5951_vm0, %v5950_v4  ;;  %5343 = vmatprep.subr.mxu0 %v5950_v4 }
  0xa9   :  { %5336 = vmatmul.mubr.msk.f32.vlgmr.msra.gmra.mrb[20].mxu0 %vm144_vm7, %v6039_v16  ;;  %5351 = vmatmul.mubr.msk.f32.vlgmr.msra.gmra.mrb[22].mxu1 %vm144_vm7, %v6039_v16 }
  0xaa   :  { %5358 = vmatprep.subr.mxu1 %v5950_v4  ;;  %5344 = vmatpush3.msk.msra.mxu0 %vm148_vm6, %v2014_v62 }
  0xab   :  { %5345 = vmatprep.mubr.msk.f32.mxu0 %vm5951_vm0, %v5950_v4  ;;  %5359 = vmatpush3.msk.msra.mxu1 %vm148_vm6, %v2282_v2 }
  0xac   :  { %5360 = vmatprep.mubr.msk.f32.mxu1 %vm5951_vm0, %v5950_v4  ;;  %5353 = vmatprep.subr.mxu0 %v5950_v4 }
  0xad   :  { %5346 = vmatmul.mubr.msk.f32.vlgmr.msra.gmra.mrb[22].mxu0 %vm144_vm7, %v6039_v16  ;;  %5361 = vmatmul.mubr.msk.f32.vlgmr.msra.gmra.mrb[24].mxu1 %vm144_vm7, %v6039_v16 }
  0xae   :  { %5354 = vmatpush3.msk.msra.mxu0 %vm148_vm6, %v2184_v3  ;;  %5355 = vmatprep.mubr.msk.f32.mxu0 %vm5951_vm0, %v5950_v4 }
  0xaf   :  { %5363 = vmatprep.subr.mxu0 %v5950_v4 }
  0xb1   :  { %5356 = vmatmul.mubr.msk.f32.vlgmr.msra.gmra.mrb[24].mxu0 %vm144_vm7, %v6039_v16 }
  0xb2   :  { %5364 = vmatpush3.msk.msra.mxu0 %vm148_vm6, %v2370_v0  ;;  %5365 = vmatprep.mubr.msk.f32.mxu0 %vm5951_vm0, %v5950_v4  ;;  %vm5658_vm0 = vmpackc.low %vm2271_vm8, %vm5953_vm14  ;;  %vm4135_vm6 = vcmask 236544   ;;  %vm4901_vm14 = vcmask 253952  }
  0xb5   :  { %5366 = vmatmul.mubr.msk.f32.vlgmr.msra.gmra.mrb[26].mxu0 %vm144_vm7, %v6039_v16  ;;  %vm5759_vm7 = vmpackc.low %vm4135_vm6, %vm4135_vm6 }
 0x150   :  { %v309_v10 = vpop.f32.mrb[0].mxu1 }
 0x151   :  { %v310_v11 = vadd.f32 %v309_v10, %v6261_v9  ;;  %v5242_v12 = vpop.f32.mrb[1].mxu1 }
 0x153   :  { %v313_v14 = vmax.f32 %v310_v11, 0.0 }
 0x154   :  { %v218_v15 = vpop.f32.mrb[0].mxu0  ;;  %v476_v16 = vpop.f32.mrb[2].mxu1 }
 0x155   :  { %v314_v17 = vmul.f32 %v6267_v13, %v313_v14  ;;  %v219_v18 = vadd.f32 %v218_v15, %v6261_v9  ;;  %v477_v19 = vadd.f32 %v476_v16, %v6261_v9  ;;  %v5237_v20 = vpop.f32.mrb[1].mxu0  ;;  %v5252_v21 = vpop.f32.mrb[3].mxu1 }
 0x157   :  { %v222_v22 = vmax.f32 %v219_v18, 0.0  ;;  %v480_v23 = vmax.f32 %v477_v19, 0.0  ;;  %v315_v24 = vsel %vm224_vm10, %v314_v17, 0.0  ;;  %v319_v40 = vmul.f32 %v314_v17, %v314_v17 }
 0x158   :  { %v392_v25 = vpop.f32.mrb[2].mxu0  ;;  %v644_v26 = vpop.f32.mrb[4].mxu1  ;;  %316 = vadd.xlane.f32.xlu1 %v315_v24 }
 0x159   :  { %v223_v27 = vmul.f32 %v6267_v13, %v222_v22  ;;  %v481_v28 = vmul.f32 %v6267_v13, %v480_v23  ;;  %v393_v29 = vadd.f32 %v392_v25, %v6261_v9  ;;  %v645_v30 = vadd.f32 %v644_v26, %v6261_v9  ;;  %v5247_v31 = vpop.f32.mrb[3].mxu0  ;;  %v5262_v32 = vpop.f32.mrb[5].mxu1 }
 0x15a   :  { %v320_v53 = vsel %vm224_vm10, %v319_v40, 0.0 }
 0x15b   :  { %v2466_v33 = vadd.f32 %v314_v17, %v223_v27  ;;  %v396_v34 = vmax.f32 %v393_v29, 0.0  ;;  %v648_v35 = vmax.f32 %v645_v30, 0.0  ;;  %v482_v36 = vsel %vm224_vm10, %v481_v28, 0.0 }
 0x15c   :  { %v560_v37 = vpop.f32.mrb[4].mxu0  ;;  %v817_v38 = vpop.f32.mrb[6].mxu1  ;;  %483 = vadd.xlane.f32.xlu1 %v482_v36  ;;  %v225_v39 = vsel %vm224_vm10, %v223_v27, 0.0  ;;  %v229_v54 = vmul.f32 %v223_v27, %v223_v27  ;;  %v486_v3 = vmul.f32 %v481_v28, %v481_v28 }
 0x15d   :  { %v397_v41 = vmul.f32 %v6267_v13, %v396_v34  ;;  %v561_v42 = vadd.f32 %v560_v37, %v6261_v9  ;;  %v818_v43 = vadd.f32 %v817_v38, %v6261_v9  ;;  %226 = vadd.xlane.f32.xlu0 %v225_v39  ;;  %v5257_v44 = vpop.f32.mrb[5].mxu0  ;;  %v5272_v45 = vpop.f32.mrb[7].mxu1  ;;  %v649_v47 = vmul.f32 %v6267_v13, %v648_v35 }
 0x15e   :  { %v230_v2 = vsel %vm224_vm10, %v229_v54, 0.0  ;;  %v487_v20 = vsel %vm224_vm10, %v486_v3, 0.0 }
 0x15f   :  { %v6282_v46 = vadd.f32 %v2466_v33, %v397_v41  ;;  %v564_v48 = vmax.f32 %v561_v42, 0.0  ;;  %v398_v49 = vsel %vm224_vm10, %v397_v41, 0.0  ;;  %v821_v50 = vmax.f32 %v818_v43, 0.0 }
 0x160   :  { %v731_v51 = vpop.f32.mrb[6].mxu0  ;;  %v987_v52 = vpop.f32.mrb[8].mxu1  ;;  %399 = vadd.xlane.f32.xlu1 %v398_v49  ;;  %v650_v61 = vsel %vm224_vm10, %v649_v47, 0.0  ;;  %v402_v21 = vmul.f32 %v397_v41, %v397_v41  ;;  %v654_v36 = vmul.f32 %v649_v47, %v649_v47 }
 0x161   :  { %v565_v55 = vmul.f32 %v6267_v13, %v564_v48  ;;  %v732_v56 = vadd.f32 %v731_v51, %v6261_v9  ;;  %321 = vadd.xlane.f32.xlu0 %v320_v53  ;;  %v5267_v57 = vpop.f32.mrb[7].mxu0  ;;  %v5282_v58 = vpop.f32.mrb[9].mxu1  ;;  %v6291_v62 = vmul.f32 %v6267_v13, %v821_v50  ;;  %v988_v6 = vadd.f32 %v987_v52, %v6261_v9 }
 0x162   :  { %v403_v35 = vsel %vm224_vm10, %v402_v21, 0.0  ;;  %v655_v50 = vsel %vm224_vm10, %v654_v36, 0.0 }
 0x163   :  { %v2482_v59 = vadd.f32 %v565_v55, %v481_v28  ;;  %v735_v60 = vmax.f32 %v732_v56, 0.0  ;;  %v566_v17 = vsel %vm224_vm10, %v565_v55, 0.0  ;;  %v991_v22 = vmax.f32 %v988_v6, 0.0 }
 0x164   :  { %v902_v63 = vpop.f32.mrb[8].mxu0  ;;  %v1154_v1 = vpop.f32.mrb[10].mxu1  ;;  %651 = vadd.xlane.f32.xlu1 %v650_v61  ;;  %v823_v31 = vsel %vm224_vm10, %v6291_v62, 0.0  ;;  %v570_v51 = vmul.f32 %v565_v55, %v565_v55  ;;  %v827_v3 = vmul.f32 %v6291_v62, %v6291_v62 }
 0x165   :  { %v6294_v5 = vadd.f32 %v2482_v59, %v649_v47  ;;  %v6297_v0 = vmul.f32 %v6267_v13, %v735_v60  ;;  %v903_v10 = vadd.f32 %v902_v63, %v6261_v9  ;;  %231 = vadd.xlane.f32.xlu0 %v230_v2  ;;  %v5277_v11 = vpop.f32.mrb[9].mxu0  ;;  %v5292_v12 = vpop.f32.mrb[11].mxu1  ;;  %v1155_v16 = vadd.f32 %v1154_v1, %v6261_v9 }
 0x166   :  { %v6318_v37 = vmul.f32 %v6267_v13, %v991_v22  ;;  %v571_v2 = vsel %vm224_vm10, %v570_v51, 0.0  ;;  %v828_v22 = vsel %vm224_vm10, %v827_v3, 0.0 }
 0x167   :  { %v2488_v14 = vadd.f32 %v6291_v62, %v6297_v0  ;;  %v906_v15 = vmax.f32 %v903_v10, 0.0  ;;  %v1158_v29 = vmax.f32 %v1155_v16, 0.0  ;;  %v737_v45 = vsel %vm224_vm10, %v6297_v0, 0.0 }
 0x168   :  { %v1070_v18 = vpop.f32.mrb[10].mxu0  ;;  %v1322_v19 = vpop.f32.mrb[12].mxu1  ;;  %567 = vadd.xlane.f32.xlu1 %v566_v17  ;;  %v993_v55 = vsel %vm224_vm10, %v6318_v37, 0.0 }
 0x169   :  { %v6307_v23 = vmul.f32 %v6267_v13, %v906_v15  ;;  %v1071_v24 = vadd.f32 %v1070_v18, %v6261_v9  ;;  %v1323_v25 = vadd.f32 %v1322_v19, %v6261_v9  ;;  %488 = vadd.xlane.f32.xlu0 %v487_v20  ;;  %v5287_v26 = vpop.f32.mrb[11].mxu0  ;;  %v5302_v27 = vpop.f32.mrb[13].mxu1  ;;  %v6325_v42 = vmul.f32 %v6267_v13, %v1158_v29 }
 0x16b   :  { %v6312_v28 = vadd.f32 %v2488_v14, %v6307_v23  ;;  %v1074_v30 = vmax.f32 %v1071_v24, 0.0  ;;  %v1326_v32 = vmax.f32 %v1323_v25, 0.0  ;;  %v908_v19 = vsel %vm224_vm10, %v6307_v23, 0.0 }
 0x16c   :  { %v1238_v33 = vpop.f32.mrb[12].mxu0  ;;  %v1493_v34 = vpop.f32.mrb[14].mxu1  ;;  %824 = vadd.xlane.f32.xlu1 %v823_v31  ;;  %v741_v24 = vmul.f32 %v6297_v0, %v6297_v0  ;;  %v1160_v0 = vsel %vm224_vm10, %v6325_v42, 0.0 }
 0x16d   :  { %v6321_v38 = vmul.f32 %v6267_v13, %v1074_v30  ;;  %v1239_v39 = vadd.f32 %v1238_v33, %v6261_v9  ;;  %404 = vadd.xlane.f32.xlu0 %v403_v35  ;;  %v5297_v40 = vpop.f32.mrb[13].mxu0  ;;  %v5312_v41 = vpop.f32.mrb[15].mxu1  ;;  %v6332_v47 = vmul.f32 %v6267_v13, %v1326_v32  ;;  %v1494_v54 = vadd.f32 %v1493_v34, %v6261_v9 }
 0x16e   :  { %v997_v40 = vmul.f32 %v6318_v37, %v6318_v37 }
 0x16f   :  { %v2494_v43 = vadd.f32 %v6321_v38, %v6318_v37  ;;  %v1242_v44 = vmax.f32 %v1239_v39, 0.0  ;;  %v1497_v6 = vmax.f32 %v1494_v54, 0.0  ;;  %v742_v39 = vsel %vm224_vm10, %v741_v24, 0.0 }
 0x170   :  { %v1408_v48 = vpop.f32.mrb[14].mxu0  ;;  %v1663_v49 = vpop.f32.mrb[16].mxu1  ;;  %738 = vadd.xlane.f32.xlu1 %v737_v45  ;;  %v1076_v37 = vsel %vm224_vm10, %v6321_v38, 0.0 }
 0x171   :  { %v6336_v52 = vadd.f32 %v2494_v43, %v6325_v42  ;;  %v6339_v53 = vmul.f32 %v6267_v13, %v1242_v44  ;;  %v1409_v56 = vadd.f32 %v1408_v48, %v6261_v9  ;;  %656 = vadd.xlane.f32.xlu0 %v655_v50  ;;  %v5307_v57 = vpop.f32.mrb[15].mxu0  ;;  %v5322_v58 = vpop.f32.mrb[17].mxu1  ;;  %v1664_v61 = vadd.f32 %v1663_v49, %v6261_v9 }
 0x172   :  { %v6365_v25 = vmul.f32 %v6267_v13, %v1497_v6  ;;  %v998_v58 = vsel %vm224_vm10, %v997_v40, 0.0 }
 0x173   :  { %v2500_v59 = vadd.f32 %v6332_v47, %v6339_v53  ;;  %v1412_v60 = vmax.f32 %v1409_v56, 0.0  ;;  %v1667_v17 = vmax.f32 %v1664_v61, 0.0 }
 0x174   :  { %v1578_v63 = vpop.f32.mrb[16].mxu0  ;;  %v1830_v1 = vpop.f32.mrb[18].mxu1  ;;  %994 = vadd.xlane.f32.xlu1 %v993_v55 }
 0x175   :  { %v6352_v10 = vmul.f32 %v6267_v13, %v1412_v60  ;;  %v1579_v11 = vadd.f32 %v1578_v63, %v6261_v9  ;;  %v1831_v12 = vadd.f32 %v1830_v1, %v6261_v9  ;;  %572 = vadd.xlane.f32.xlu0 %v571_v2  ;;  %v5317_v14 = vpop.f32.mrb[17].mxu0  ;;  %v5332_v15 = vpop.f32.mrb[19].mxu1  ;;  %v6372_v31 = vmul.f32 %v6267_v13, %v1667_v17 }
 0x176   :  { %v1164_v15 = vmul.f32 %v6325_v42, %v6325_v42  ;;  %v1244_v42 = vsel %vm224_vm10, %v6339_v53, 0.0 }
 0x177   :  { %v6357_v16 = vadd.f32 %v2500_v59, %v6352_v10  ;;  %v1582_v18 = vmax.f32 %v1579_v11, 0.0  ;;  %v1834_v62 = vmax.f32 %v1831_v12, 0.0  ;;  %v912_v59 = vmul.f32 %v6307_v23, %v6307_v23 }
 0x178   :  { %v1746_v20 = vpop.f32.mrb[18].mxu0  ;;  %v1998_v21 = vpop.f32.mrb[20].mxu1  ;;  %909 = vadd.xlane.f32.xlu1 %v908_v19  ;;  %v1328_v12 = vsel %vm224_vm10, %v6332_v47, 0.0 }
 0x179   :  { %v6368_v26 = vmul.f32 %v6267_v13, %v1582_v18  ;;  %v1747_v27 = vadd.f32 %v1746_v20, %v6261_v9  ;;  %829 = vadd.xlane.f32.xlu0 %v828_v22  ;;  %v5327_v29 = vpop.f32.mrb[19].mxu0  ;;  %v5342_v30 = vpop.f32.mrb[21].mxu1  ;;  %v6379_v34 = vmul.f32 %v6267_v13, %v1834_v62  ;;  %v1999_v44 = vadd.f32 %v1998_v21, %v6261_v9 }
 0x17a   :  { %v913_v14 = vsel %vm224_vm10, %v912_v59, 0.0  ;;  %v1165_v29 = vsel %vm224_vm10, %v1164_v15, 0.0  ;;  %v1080_v30 = vmul.f32 %v6321_v38, %v6321_v38  ;;  %v1499_v38 = vsel %vm224_vm10, %v6365_v25, 0.0 }
 0x17b   :  { %v2506_v32 = vadd.f32 %v6368_v26, %v6365_v25  ;;  %v1750_v33 = vmax.f32 %v1747_v27, 0.0  ;;  %v2002_v60 = vmax.f32 %v1999_v44, 0.0 }
 0x17c   :  { %v1914_v35 = vpop.f32.mrb[20].mxu0  ;;  %v2168_v36 = vpop.f32.mrb[22].mxu1  ;;  %1161 = vadd.xlane.f32.xlu1 %v1160_v0  ;;  %v1081_v44 = vsel %vm224_vm10, %v1080_v30, 0.0 }
 0x17d   :  { %v6385_v41 = vadd.f32 %v2506_v32, %v6372_v31  ;;  %v6388_v43 = vmul.f32 %v6267_v13, %v1750_v33  ;;  %v1915_v45 = vadd.f32 %v1914_v35, %v6261_v9  ;;  %743 = vadd.xlane.f32.xlu0 %v742_v39  ;;  %v5337_v48 = vpop.f32.mrb[21].mxu0  ;;  %v5352_v49 = vpop.f32.mrb[23].mxu1  ;;  %v2169_v54 = vadd.f32 %v2168_v36, %v6261_v9 }
 0x17e   :  { %v6414_v17 = vmul.f32 %v6267_v13, %v2002_v60  ;;  %v1414_v49 = vsel %vm224_vm10, %v6352_v10, 0.0 }
 0x17f   :  { %v2512_v50 = vadd.f32 %v6379_v34, %v6388_v43  ;;  %v1918_v51 = vmax.f32 %v1915_v45, 0.0  ;;  %v2172_v6 = vmax.f32 %v2169_v54, 0.0  ;;  %v1332_v45 = vmul.f32 %v6332_v47, %v6332_v47 }
 0x180   :  { %v2083_v56 = vpop.f32.mrb[22].mxu0  ;;  %v2352_v57 = vpop.f32.mrb[24].mxu1  ;;  %1077 = vadd.xlane.f32.xlu1 %v1076_v37  ;;  %v1669_v47 = vsel %vm224_vm10, %v6372_v31, 0.0  ;;  %v1503_v37 = vmul.f32 %v6365_v25, %v6365_v25  ;;  %v1673_v25 = vmul.f32 %v6372_v31, %v6372_v31  ;;  %v1752_v60 = vsel %vm224_vm10, %v6388_v43, 0.0 }
 0x181   :  { %v6401_v61 = vmul.f32 %v6267_v13, %v1918_v51  ;;  %v2084_v55 = vadd.f32 %v2083_v56, %v6261_v9  ;;  %v2353_v63 = vadd.f32 %v2352_v57, %v6261_v9  ;;  %999 = vadd.xlane.f32.xlu0 %v998_v58  ;;  %v5347_v1 = vpop.f32.mrb[23].mxu0  ;;  %v5362_v2 = vpop.f32.mrb[25].mxu1  ;;  %v6421_v21 = vmul.f32 %v6267_v13, %v2172_v6 }
 0x182   :  { %v1248_v51 = vmul.f32 %v6339_v53, %v6339_v53  ;;  %v1584_v56 = vsel %vm224_vm10, %v6368_v26, 0.0  ;;  %v1504_v57 = vsel %vm224_vm10, %v1503_v37, 0.0  ;;  %v1418_v53 = vmul.f32 %v6352_v10, %v6352_v10 }
 0x183   :  { %v6406_v3 = vadd.f32 %v2512_v50, %v6401_v61  ;;  %v2087_v11 = vmax.f32 %v2084_v55, 0.0  ;;  %v2356_v19 = vmax.f32 %v2353_v63, 0.0  ;;  %v1333_v50 = vsel %vm224_vm10, %v1332_v45, 0.0 }
 0x184   :  { %v2253_v23 = vpop.f32.mrb[24].mxu0  ;;  %1329 = vadd.xlane.f32.xlu1 %v1328_v12  ;;  %v1249_v54 = vsel %vm224_vm10, %v1248_v51, 0.0  ;;  %v1836_v58 = vsel %vm224_vm10, %v6379_v34, 0.0  ;;  %v1419_v59 = vsel %vm224_vm10, %v1418_v53, 0.0  ;;  %v1674_v55 = vsel %vm224_vm10, %v1673_v25, 0.0 }
 0x185   :  { %v6417_v18 = vmul.f32 %v6267_v13, %v2087_v11  ;;  %v2254_v62 = vadd.f32 %v2253_v23, %v6261_v9  ;;  %914 = vadd.xlane.f32.xlu0 %v913_v14  ;;  %v5357_v20 = vpop.f32.mrb[25].mxu0  ;;  %v6434_v33 = vmul.f32 %v6267_v13, %v2356_v19  ;;  %v1588_v10 = vmul.f32 %v6368_v26, %v6368_v26 }
 0x186   :  { %v2004_v63 = vsel %vm224_vm10, %v6414_v17, 0.0  ;;  %v1840_v31 = vmul.f32 %v6379_v34, %v6379_v34  ;;  %v1920_v2 = vsel %vm224_vm10, %v6401_v61, 0.0  ;;  %v1756_v26 = vmul.f32 %v6388_v43, %v6388_v43 }
 0x187   :  { %v2518_v22 = vadd.f32 %v6417_v18, %v6414_v17  ;;  %v2257_v24 = vmax.f32 %v2254_v62, 0.0  ;;  %v1589_v1 = vsel %vm224_vm10, %v1588_v10, 0.0  ;;  %v2174_v11 = vsel %vm224_vm10, %v6421_v21, 0.0 }
 0x188   :  { %v2440_v27 = vpop.f32.mrb[26].mxu0  ;;  %1245 = vadd.xlane.f32.xlu1 %v1244_v42  ;;  %v1841_v6 = vsel %vm224_vm10, %v1840_v31, 0.0  ;;  %v1757_v12 = vsel %vm224_vm10, %v1756_v26, 0.0  ;;  %v2008_v34 = vmul.f32 %v6414_v17, %v6414_v17  ;;  %v2089_v23 = vsel %vm224_vm10, %v6417_v18, 0.0 }
 0x189   :  { %v6431_v32 = vadd.f32 %v2518_v22, %v6421_v21  ;;  %v6437_v0 = vmul.f32 %v6267_v13, %v2257_v24  ;;  %v2441_v35 = vadd.f32 %v2440_v27, %v6261_v9  ;;  %1166 = vadd.xlane.f32.xlu0 %v1165_v29  ;;  %v5367_v36 = vpop.f32.mrb[27].mxu0  ;;  %v1924_v43 = vmul.f32 %v6401_v61, %v6401_v61 }
 0x18a   :  { %v2009_v14 = vsel %vm224_vm10, %v2008_v34, 0.0  ;;  %v2358_v15 = vsel %vm224_vm10, %v6434_v33, 0.0  ;;  %v2178_v17 = vmul.f32 %v6421_v21, %v6421_v21  ;;  %v2093_v61 = vmul.f32 %v6417_v18, %v6417_v18 }
 0x18b   :  { %v2524_v39 = vadd.f32 %v6434_v33, %v6437_v0  ;;  %v2444_v40 = vmax.f32 %v2441_v35, 0.0  ;;  %v1925_v19 = vsel %vm224_vm10, %v1924_v43, 0.0  ;;  %v2259_v62 = vsel %vm224_vm10, %v6437_v0, 0.0 }
 0x18c   :  { %1500 = vadd.xlane.f32.xlu1 %v1499_v38  ;;  %v2179_v20 = vsel %vm224_vm10, %v2178_v17, 0.0  ;;  %v2094_v24 = vsel %vm224_vm10, %v2093_v61, 0.0  ;;  %v2362_v21 = vmul.f32 %v6434_v33, %v6434_v33  ;;  %v2263_v27 = vmul.f32 %v6437_v0, %v6437_v0 }
 0x18d   :  { %v6448_v48 = vmul.f32 %v6267_v13, %v2444_v40  ;;  %1082 = vadd.xlane.f32.xlu0 %v1081_v44 }
 0x18e   :  { %v2363_v42 = vsel %vm224_vm10, %v2362_v21, 0.0  ;;  %v2264_v29 = vsel %vm224_vm10, %v2263_v27, 0.0 }
 0x18f   :  { %v6451_v9 = vadd.f32 %v2524_v39, %v6448_v48  ;;  %v2446_v22 = vsel %vm224_vm10, %v6448_v48, 0.0  ;;  %v2450_v18 = vmul.f32 %v6448_v48, %v6448_v48 }
 0x190   :  { %1415 = vadd.xlane.f32.xlu1 %v1414_v49 }
 0x191   :  { %1334 = vadd.xlane.f32.xlu0 %v1333_v50  ;;  %v2451_v30 = vsel %vm224_vm10, %v2450_v18, 0.0 }
 0x194   :  { %1670 = vadd.xlane.f32.xlu1 %v1669_v47 }
 0x195   :  { %1250 = vadd.xlane.f32.xlu0 %v1249_v54 }
 0x198   :  { %1585 = vadd.xlane.f32.xlu1 %v1584_v56 }
 0x199   :  { %1505 = vadd.xlane.f32.xlu0 %v1504_v57 }
 0x19c   :  { %1837 = vadd.xlane.f32.xlu1 %v1836_v58 }
 0x19d   :  { %1420 = vadd.xlane.f32.xlu0 %v1419_v59 }
 0x1a0   :  { %1753 = vadd.xlane.f32.xlu1 %v1752_v60 }
 0x1a1   :  { %1675 = vadd.xlane.f32.xlu0 %v1674_v55 }
 0x1a4   :  { %2005 = vadd.xlane.f32.xlu1 %v2004_v63 }
 0x1a5   :  { %1590 = vadd.xlane.f32.xlu0 %v1589_v1 }
 0x1a8   :  { %1921 = vadd.xlane.f32.xlu1 %v1920_v2 }
 0x1a9   :  { %1842 = vadd.xlane.f32.xlu0 %v1841_v6 }
 0x1ac   :  { %2175 = vadd.xlane.f32.xlu1 %v2174_v11 }
 0x1ad   :  { %1758 = vadd.xlane.f32.xlu0 %v1757_v12 }
 0x1b0   :  { %2090 = vadd.xlane.f32.xlu1 %v2089_v23 }
 0x1b1   :  { %2010 = vadd.xlane.f32.xlu0 %v2009_v14 }
 0x1b4   :  { %2359 = vadd.xlane.f32.xlu1 %v2358_v15 }
 0x1b5   :  { %1926 = vadd.xlane.f32.xlu0 %v1925_v19 }
 0x1b8   :  { %2260 = vadd.xlane.f32.xlu1 %v2259_v62 }
 0x1b9   :  { %2180 = vadd.xlane.f32.xlu0 %v2179_v20 }
 0x1bc   :  { %2447 = vadd.xlane.f32.xlu1 %v2446_v22 }
 0x1bd   :  { %2095 = vadd.xlane.f32.xlu0 %v2094_v24 }
 0x1c1   :  { %2364 = vadd.xlane.f32.xlu0 %v2363_v42 }
 0x1c5   :  { %2265 = vadd.xlane.f32.xlu0 %v2264_v29 }
 0x1c9   :  { %2452 = vadd.xlane.f32.xlu0 %v2451_v30 }
 0x1e5   :  { %v317_v35 = vpop.xlane.xlu1 %316 }
 0x1e9   :  { %v484_v36 = vpop.xlane.xlu1 %483 }
 0x1ea   :  { %v227_v39 = vpop.xlane.xlu0 %226 }
 0x1eb   :  { %v318_v48 = vadd.f32 %v317_v35, %v227_v39 }
 0x1ed   :  { %v400_v33 = vpop.xlane.xlu1 %399 }
 0x1ee   :  { %v322_v40 = vpop.xlane.xlu0 %321  ;;  %v401_v53 = vadd.f32 %v400_v33, %v318_v48 }
 0x1f0   :  { %v485_v25 = vadd.f32 %v484_v36, %v401_v53 }
 0x1f1   :  { %v652_v38 = vpop.xlane.xlu1 %651 }
 0x1f2   :  { %v232_v44 = vpop.xlane.xlu0 %231 }
 0x1f3   :  { %v323_v63 = vadd.f32 %v322_v40, %v232_v44 }
 0x1f5   :  { %v568_v45 = vpop.xlane.xlu1 %567 }
 0x1f6   :  { %v489_v49 = vpop.xlane.xlu0 %488  ;;  %v569_v60 = vadd.f32 %v568_v45, %v485_v25 }
 0x1f8   :  { %v653_v31 = vadd.f32 %v652_v38, %v569_v60 }
 0x1f9   :  { %v825_v0 = vpop.xlane.xlu1 %824 }
 0x1fa   :  { %v405_v50 = vpop.xlane.xlu0 %404 }
 0x1fb   :  { %v406_v1 = vadd.f32 %v405_v50, %v323_v63 }
 0x1fd   :  { %v739_v51 = vpop.xlane.xlu1 %738  ;;  %v490_v11 = vadd.f32 %v489_v49, %v406_v1 }
 0x1fe   :  { %v657_v47 = vpop.xlane.xlu0 %656  ;;  %v740_v26 = vadd.f32 %v739_v51, %v653_v31 }
 0x200   :  { %v826_v14 = vadd.f32 %v825_v0, %v740_v26 }
 0x201   :  { %v995_v54 = vpop.xlane.xlu1 %994 }
 0x202   :  { %v573_v37 = vpop.xlane.xlu0 %572 }
 0x203   :  { %v574_v23 = vadd.f32 %v573_v37, %v490_v11 }
 0x205   :  { %v910_v56 = vpop.xlane.xlu1 %909  ;;  %v658_v17 = vadd.f32 %v657_v47, %v574_v23 }
 0x206   :  { %v830_v57 = vpop.xlane.xlu0 %829  ;;  %v911_v43 = vadd.f32 %v910_v56, %v826_v14 }
 0x208   :  { %v996_v20 = vadd.f32 %v995_v54, %v911_v43 }
 0x209   :  { %v1162_v58 = vpop.xlane.xlu1 %1161 }
 0x20a   :  { %v744_v59 = vpop.xlane.xlu0 %743 }
 0x20b   :  { %v745_v62 = vadd.f32 %v744_v59, %v658_v17 }
 0x20d   :  { %v1078_v55 = vpop.xlane.xlu1 %1077  ;;  %v831_v21 = vadd.f32 %v830_v57, %v745_v62 }
 0x20e   :  { %v1000_v10 = vpop.xlane.xlu0 %999  ;;  %v1079_v24 = vadd.f32 %v1078_v55, %v996_v20 }
 0x210   :  { %v1163_v18 = vadd.f32 %v1162_v58, %v1079_v24 }
 0x211   :  { %v1330_v2 = vpop.xlane.xlu1 %1329 }
 0x212   :  { %v915_v6 = vpop.xlane.xlu0 %914 }
 0x213   :  { %v916_v29 = vadd.f32 %v915_v6, %v831_v21 }
 0x215   :  { %v1246_v12 = vpop.xlane.xlu1 %1245  ;;  %v1001_v39 = vadd.f32 %v1000_v10, %v916_v29 }
 0x216   :  { %v1167_v34 = vpop.xlane.xlu0 %1166  ;;  %v1247_v30 = vadd.f32 %v1246_v12, %v1163_v18 }
 0x218   :  { %v1331_v40 = vadd.f32 %v1330_v2, %v1247_v30 }
 0x219   :  { %v1501_v15 = vpop.xlane.xlu1 %1500 }
 0x21a   :  { %v1083_v19 = vpop.xlane.xlu0 %1082 }
 0x21b   :  { %v1084_v33 = vadd.f32 %v1083_v19, %v1001_v39 }
 0x21d   :  { %v1416_v61 = vpop.xlane.xlu1 %1415  ;;  %v1168_v49 = vadd.f32 %v1167_v34, %v1084_v33 }
 0x21e   :  { %v1335_v22 = vpop.xlane.xlu0 %1334  ;;  %v1417_v45 = vadd.f32 %v1416_v61, %v1331_v40 }
 0x220   :  { %v1502_v47 = vadd.f32 %v1501_v15, %v1417_v45 }
 0x221   :  { %v1671_v42 = vpop.xlane.xlu1 %1670 }
 0x222   :  { %v1251_v27 = vpop.xlane.xlu0 %1250 }
 0x223   :  { %v1252_v51 = vadd.f32 %v1251_v27, %v1168_v49 }
 0x225   :  { %v1586_v35 = vpop.xlane.xlu1 %1585  ;;  %v1336_v56 = vadd.f32 %v1335_v22, %v1252_v51 }
 0x226   :  { %v1506_v36 = vpop.xlane.xlu0 %1505  ;;  %v1587_v54 = vadd.f32 %v1586_v35, %v1502_v47 }
 0x228   :  { %v1672_v53 = vadd.f32 %v1671_v42, %v1587_v54  ;;  %v52_v54 = vld [vmem:[%s7340_s7 + $0x10] sm:$0xff] }
 0x229   :  { %v1838_v38 = vpop.xlane.xlu1 %1837 }
 0x22a   :  { %v1421_v44 = vpop.xlane.xlu0 %1420 }
 0x22b   :  { %v1422_v57 = vadd.f32 %v1421_v44, %v1336_v56  ;;  %v2468_v56 = vmul.f32 0.33333334, %v6282_v46 }
 0x22d   :  { %v1754_v0 = vpop.xlane.xlu1 %1753  ;;  %v1507_v60 = vadd.f32 %v1506_v36, %v1422_v57 }
 0x22e   :  { %v1676_v50 = vpop.xlane.xlu0 %1675  ;;  %v1755_v25 = vadd.f32 %v1754_v0, %v1672_v53  ;;  %v2484_v53 = vmul.f32 0.33333334, %v6294_v5 }
 0x230   :  { %v1839_v1 = vadd.f32 %v1838_v38, %v1755_v25  ;;  %v2526_v25 = vmul.f32 0.33333334, %v6451_v9 }
 0x231   :  { %v2006_v37 = vpop.xlane.xlu1 %2005 }
 0x232   :  { %v1591_v48 = vpop.xlane.xlu0 %1590 }
 0x233   :  { %v1592_v63 = vadd.f32 %v1591_v48, %v1507_v60  ;;  %v2496_v60 = vmul.f32 0.33333334, %v6336_v52 }
 0x235   :  { %v1922_v58 = vpop.xlane.xlu1 %1921  ;;  %v1677_v26 = vadd.f32 %v1676_v50, %v1592_v63  ;;  %v51_v50 = vld [vmem:[%s7340_s7 + $0x8] sm:$0xff]  ;;  %v2514_v63 = vmul.f32 0.33333334, %v6406_v3 }
 0x236   :  { %v1843_v59 = vpop.xlane.xlu0 %1842  ;;  %v1923_v31 = vadd.f32 %v1922_v58, %v1839_v1  ;;  %v2490_v58 = vmul.f32 0.33333334, %v6312_v28 }
 0x238   :  { %v2007_v12 = vadd.f32 %v2006_v37, %v1923_v31 }
 0x239   :  { %v2176_v55 = vpop.xlane.xlu1 %2175 }
 0x23a   :  { %v1759_v10 = vpop.xlane.xlu0 %1758 }
 0x23b   :  { %v1760_v11 = vadd.f32 %v1759_v10, %v1677_v26  ;;  %v2508_v10 = vmul.f32 0.33333334, %v6385_v41 }
 0x23d   :  { %v2091_v2 = vpop.xlane.xlu1 %2090  ;;  %v1844_v43 = vadd.f32 %v1843_v59, %v1760_v11  ;;  %v2520_v59 = vmul.f32 0.33333334, %v6431_v32 }
 0x23e   :  { %v2011_v6 = vpop.xlane.xlu0 %2010  ;;  %v2092_v14 = vadd.f32 %v2091_v2, %v2007_v12 }
 0x240   :  { %v2177_v62 = vadd.f32 %v2176_v55, %v2092_v14  ;;  %v2502_v55 = vmul.f32 0.33333334, %v6357_v16 }
 0x241   :  { %v2360_v34 = vpop.xlane.xlu1 %2359 }
 0x242   :  { %v1927_v23 = vpop.xlane.xlu0 %1926 }
 0x243   :  { %v1928_v17 = vadd.f32 %v1927_v23, %v1844_v43 }
 0x245   :  { %v2261_v15 = vpop.xlane.xlu1 %2260  ;;  %v2012_v22 = vadd.f32 %v2011_v6, %v1928_v17 }
 0x246   :  { %v2181_v19 = vpop.xlane.xlu0 %2180  ;;  %v2262_v20 = vadd.f32 %v2261_v15, %v2177_v62 }
 0x248   :  { %v2361_v24 = vadd.f32 %v2360_v34, %v2262_v20 }
 0x249   :  { %v2448_v42 = vpop.xlane.xlu1 %2447 }
 0x24a   :  { %v2096_v61 = vpop.xlane.xlu0 %2095  ;;  %v2449_v29 = vadd.f32 %v2448_v42, %v2361_v24 }
 0x24b   :  { %v2097_v21 = vadd.f32 %v2096_v61, %v2012_v22 }
 0x24c   :  { %v2456_v36 = vmul.f32 0.0015432099, %v2449_v29  ;;  %v6554_v29 = vld [vmem:[%s7335_s2] sm:$0xff] }
 0x24d   :  { %v2182_v18 = vadd.f32 %v2181_v19, %v2097_v21  ;;  %5378 = vmatprep.mubr.msk.f32.mxu1 %vm2552_vm11, %v6554_v29  ;;  %5391 = vmatprep.mubr.msk.f32.mxu0 %vm2552_vm11, %v6554_v29 }
 0x24e   :  { %v2365_v27 = vpop.xlane.xlu0 %2364  ;;  %v2458_v38 = vmul.f32 %v2456_v36, %v2456_v36 }
 0x252   :  { %v2266_v30 = vpop.xlane.xlu0 %2265 }
 0x253   :  { %v2267_v35 = vadd.f32 %v2266_v30, %v2182_v18 }
 0x255   :  { %v2366_v39 = vadd.f32 %v2365_v27, %v2267_v35 }
 0x256   :  { %v2453_v33 = vpop.xlane.xlu0 %2452 }
 0x257   :  { %v2454_v40 = vadd.f32 %v2453_v33, %v2366_v39  ;;  %v54_v39 = vld [vmem:[%s7340_s7 + $0x20] sm:$0xff] }
 0x259   :  { %v2457_v44 = vmul.f32 0.0015432099, %v2454_v40 }
 0x25b   :  { %v2459_v45 = vsub.f32 %v2457_v44, %v2458_v38 }
 0x25d   :  { %v2460_v49 = vmax.f32 %v2459_v45, 0.0 }
 0x25f   :  { %v2461_v0 = vadd.f32 1e-05, %v2460_v49 }
 0x261   :  { %5886 = vrsqrt.f32 %v2461_v0 }
 0x26b   :  { %v5887_v51 = vpop.eup %5886 }
 0x26c   :  { %v2463_v47 = vmul.f32 %v5887_v51, %v51_v50  ;;  %v6588_v50 = vld [vmem:[%s7335_s2 + $0x8] sm:$0xff] }
 0x26e   :  { %2471 = vperm.xlu1 %5809, %v2463_v47   ;;  %v2464_v37 = vmul.f32 %v2463_v47, %v2456_v36  ;;  %v53_v36 = vld [vmem:[%s7340_s7 + $0x18] sm:$0xff] }
 0x270   :  { %v2465_v48 = vsub.f32 %v52_v54, %v2464_v37 }
 0x272   :  { %2477 = vperm.xlu0 %5810, %v2465_v48  }
 0x2ed   :  { %v2472_v57 = vpop.permute.xlu1 %2471 }
 0x2ee   :  { %v2521_v1 = vmul.f32 %v2520_v59, %v2472_v57  ;;  %v2527_v31 = vmul.f32 %v2526_v25, %v2472_v57  ;;  %v2485_v46 = vmul.f32 %v2484_v53, %v2472_v57  ;;  %v2491_v6 = vmul.f32 %v2490_v58, %v2472_v57 }
 0x2ef   :  { %v2497_v5 = vmul.f32 %v2496_v60, %v2472_v57  ;;  %v2503_v26 = vmul.f32 %v2502_v55, %v2472_v57  ;;  %v2509_v28 = vmul.f32 %v2508_v10, %v2472_v57  ;;  %v2474_v12 = vmul.f32 %v2472_v57, %v2468_v56 }
 0x2f0   :  { %v2515_v43 = vmul.f32 %v2514_v63, %v2472_v57 }
 0x2f1   :  { %v2478_v2 = vpop.permute.xlu0 %2477 }
 0x2f2   :  { %v2522_v11 = vadd.f32 %v2521_v1, %v2478_v2  ;;  %v2528_v32 = vadd.f32 %v2527_v31, %v2478_v2  ;;  %v2486_v9 = vadd.f32 %v2485_v46, %v2478_v2  ;;  %v2492_v34 = vadd.f32 %v2491_v6, %v2478_v2 }
 0x2f3   :  { %v2498_v52 = vadd.f32 %v2497_v5, %v2478_v2  ;;  %v2504_v23 = vadd.f32 %v2503_v26, %v2478_v2  ;;  %v2510_v16 = vadd.f32 %v2509_v28, %v2478_v2  ;;  %v2480_v61 = vadd.f32 %v2478_v2, %v2474_v12 }
 0x2f4   :  { %v6536_v41 = vmul.f32 %v6267_v13, %v2522_v11  ;;  %v6539_v3 = vmul.f32 %v6267_v13, %v2528_v32  ;;  %v2487_v14 = vmul.f32 %v6267_v13, %v2486_v9  ;;  %v2493_v15 = vmul.f32 %v6267_v13, %v2492_v34 }
 0x2f5   :  { %v2499_v19 = vmul.f32 %v6267_v13, %v2498_v52  ;;  %v2505_v17 = vmul.f32 %v6267_v13, %v2504_v23  ;;  %v2511_v62 = vmul.f32 %v6267_v13, %v2510_v16  ;;  %v2516_v22 = vadd.f32 %v2515_v43, %v2478_v2 }
 0x2f6   :  { %v5811_v20 = vpack.i.bf16 %v6539_v3, %v6536_v41  ;;  %v5601_v24 = vpack.c.bf16 %v2493_v15, %v2487_v14  ;;  %v2481_v30 = vmul.f32 %v6267_v13, %v2480_v61  ;;  %v5649_v47 = vpack.c.bf16 %v6539_v3, %v6536_v41 }
 0x2f7   :  { %v5609_v21 = vpack.c.bf16 %v2499_v19, %v2493_v15  ;;  %v5617_v42 = vpack.c.bf16 %v2505_v17, %v2499_v19  ;;  %v6548_v27 = vpack.c.bf16 %v2511_v62, %v2505_v17  ;;  %v6557_v18 = vmul.f32 %v6267_v13, %v2516_v22 }
 0x2f8   :  { %5812 = vrot.lane.b32.xlu1 %v5811_v20, %s5949_s10  ;;  %v5591_v0 = vpack.c.bf16 %v2487_v14, %v2481_v30 }
 0x2f9   :  { %v6565_v35 = vpack.c.bf16 %v6557_v18, %v2511_v62  ;;  %v5641_v51 = vpack.c.bf16 %v6536_v41, %v6557_v18 }
 0x2fc   :  { %3239 = vrot.lane.b32.xlu1 %v2481_v30, %s5948_s9 }
 0x300   :  { %3341 = vrot.lane.b32.xlu1 %v2487_v14, %s5948_s9 }
 0x304   :  { %2544 = vperm.xlu1 %5809, %v53_v36  }
 0x308   :  { %2549 = vperm.xlu1 %5809, %v54_v39  }
 0x36a   :  { %v5813_v33 = vpop.permute.xlu1 %5812 }
 0x36b   :  { %v5815_v38 = vunpack.i.h.bf16 %v5813_v33  ;;  %v5814_v44 = vunpack.i.l.bf16 %v5813_v33 }
 0x36d   :  { %v5595_v45 = vpack.c.bf16 %v2481_v30, %v5815_v38  ;;  %v5585_v49 = vpack.c.bf16 %v5815_v38, %v5814_v44 }
 0x36e   :  { %v3240_v54 = vpop.permute.xlu1 %3239 }
 0x36f   :  { %5587 = vmatprep.subr.msk.bf16.mxu1 %vm6576_vm13, %v5585_v49  ;;  %5597 = vmatprep.subr.msk.bf16.mxu0 %vm5596_vm15, %v5595_v45  ;;  %v5657_v37 = vpack.c.bf16 %v3240_v54, %v6539_v3 }
 0x370   :  { %5590 = vmatpush3.bf16.msk.msra.mxu1 %vm6576_vm13, %v5585_v49  ;;  %5600 = vmatpush3.bf16.msk.msra.mxu0 %vm5596_vm15, %v5595_v45 }
 0x371   :  { %5592 = vmatprep.subr.bf16.mxu1 %v5591_v0  ;;  %5602 = vmatprep.subr.bf16.mxu0 %v5601_v24 }
 0x372   :  { %v3342_v48 = vpop.permute.xlu1 %3341 }
 0x374   :  { %5594 = vmatpush3.bf16.msra.mxu1 %v5591_v0  ;;  %5604 = vmatpush3.bf16.msra.mxu0 %v5601_v24 }
 0x375   :  { %5376 = vmatprep.subr.mxu1 %v2493_v15  ;;  %5389 = vmatprep.subr.mxu0 %v2499_v19 }
 0x378   :  { %5377 = vmatpush3.msra.mxu1 %v2493_v15  ;;  %5390 = vmatpush3.msra.mxu0 %v2499_v19 }
 0x379   :  { %5379 = vmatmul.mubr.msk.f32.vlgmr.msra.gmra.mrb[26].mxu1 %vm2552_vm11, %v6588_v50  ;;  %5392 = vmatmul.mubr.msk.f32.vlgmr.msra.gmra.mrb[28].mxu0 %vm2552_vm11, %v6588_v50 }
 0x37a   :  { %5606 = vmatprep.subr.bf16.mxu1 %v5591_v0  ;;  %5614 = vmatprep.subr.bf16.mxu0 %v5601_v24 }
 0x37b   :  { %5608 = vmatpush3.bf16.msra.mxu1 %v5591_v0  ;;  %5616 = vmatpush3.bf16.msra.mxu0 %v5601_v24 }
 0x37c   :  { %5610 = vmatprep.subr.bf16.mxu1 %v5609_v21  ;;  %5618 = vmatprep.subr.bf16.mxu0 %v5617_v42 }
 0x37d   :  { %5404 = vmatprep.mubr.msk.f32.mxu1 %vm2552_vm11, %v6554_v29  ;;  %5417 = vmatprep.mubr.msk.f32.mxu0 %vm2552_vm11, %v6554_v29 }
 0x37f   :  { %5612 = vmatpush3.bf16.msra.mxu1 %v5609_v21  ;;  %5620 = vmatpush3.bf16.msra.mxu0 %v5617_v42 }
 0x380   :  { %5402 = vmatprep.subr.mxu1 %v2505_v17  ;;  %5415 = vmatprep.subr.mxu0 %v2511_v62 }
 0x383   :  { %5403 = vmatpush3.msra.mxu1 %v2505_v17  ;;  %5416 = vmatpush3.msra.mxu0 %v2511_v62  ;;  %v6647_v56 = vpop.permute.xlu1 %2544 }
 0x384   :  { %5405 = vmatmul.mubr.msk.f32.vlgmr.msra.gmra.mrb[28].mxu1 %vm2552_vm11, %v6588_v50  ;;  %5418 = vmatmul.mubr.msk.f32.vlgmr.msra.gmra.mrb[30].mxu0 %vm2552_vm11, %v6588_v50 }
 0x385   :  { %5622 = vmatprep.subr.bf16.mxu1 %v5609_v21  ;;  %5630 = vmatprep.subr.bf16.mxu0 %v5617_v42 }
 0x386   :  { %5624 = vmatpush3.bf16.msra.mxu1 %v5609_v21  ;;  %5632 = vmatpush3.bf16.msra.mxu0 %v5617_v42 }
 0x387   :  { %5626 = vmatprep.subr.bf16.mxu1 %v6548_v27  ;;  %5634 = vmatprep.subr.bf16.mxu0 %v6565_v35  ;;  %v6649_v57 = vpop.permute.xlu1 %2549 }
 0x388   :  { %5430 = vmatprep.mubr.msk.f32.mxu1 %vm2552_vm11, %v6554_v29  ;;  %5443 = vmatprep.mubr.msk.f32.mxu0 %vm2552_vm11, %v6554_v29 }
 0x38a   :  { %5628 = vmatpush3.bf16.msra.mxu1 %v6548_v27  ;;  %5636 = vmatpush3.bf16.msra.mxu0 %v6565_v35 }
 0x38b   :  { %5428 = vmatprep.subr.mxu1 %v6557_v18  ;;  %5441 = vmatprep.subr.mxu0 %v6536_v41 }
 0x38e   :  { %5429 = vmatpush3.msra.mxu1 %v6557_v18  ;;  %5442 = vmatpush3.msra.mxu0 %v6536_v41 }
 0x38f   :  { %5431 = vmatmul.mubr.msk.f32.vlgmr.msra.gmra.mrb[30].mxu1 %vm2552_vm11, %v6588_v50  ;;  %5444 = vmatmul.mubr.msk.f32.vlgmr.msra.gmra.mrb[32].mxu0 %vm2552_vm11, %v6588_v50 }
 0x390   :  { %5638 = vmatprep.subr.bf16.mxu1 %v6548_v27  ;;  %5646 = vmatprep.subr.bf16.mxu0 %v6565_v35 }
 0x391   :  { %5640 = vmatpush3.bf16.msra.mxu1 %v6548_v27  ;;  %5648 = vmatpush3.bf16.msra.mxu0 %v6565_v35 }
 0x392   :  { %5642 = vmatprep.subr.bf16.mxu1 %v5641_v51  ;;  %5650 = vmatprep.subr.bf16.mxu0 %v5649_v47 }
 0x393   :  { %5456 = vmatprep.mubr.msk.f32.mxu1 %vm2552_vm11, %v6554_v29  ;;  %5469 = vmatprep.mubr.msk.f32.mxu0 %vm2552_vm11, %v6554_v29 }
 0x395   :  { %5644 = vmatpush3.bf16.msra.mxu1 %v5641_v51  ;;  %5652 = vmatpush3.bf16.msra.mxu0 %v5649_v47 }
 0x396   :  { %5454 = vmatprep.subr.mxu1 %v6539_v3  ;;  %5467 = vmatprep.subr.msk.mxu0 %vm2271_vm8, %v3240_v54 }
 0x399   :  { %5455 = vmatpush3.msra.mxu1 %v6539_v3  ;;  %5468 = vmatpush3.msk.msra.mxu0 %vm2271_vm8, %v3240_v54 }
 0x39a   :  { %5457 = vmatmul.mubr.msk.f32.vlgmr.msra.gmra.mrb[32].mxu1 %vm2552_vm11, %v6588_v50  ;;  %5470 = vmatmul.mubr.msk.f32.vlgmr.msra.gmra.mrb[34].mxu0 %vm2552_vm11, %v6588_v50 }
 0x39b   :  { %5654 = vmatprep.subr.bf16.mxu1 %v5641_v51  ;;  %5482 = vmatprep.mubr.msk.f32.mxu1 %vm2552_vm11, %v6554_v29 }
 0x39c   :  { %5656 = vmatpush3.bf16.msra.mxu1 %v5641_v51 }
 0x39d   :  { %5659 = vmatprep.subr.msk.bf16.mxu1 %vm5658_vm0, %v5657_v37 }
 0x3a0   :  { %5662 = vmatpush3.bf16.msk.msra.mxu1 %vm5658_vm0, %v5657_v37 }
 0x3a1   :  { %5480 = vmatprep.subr.msk.mxu1 %vm2271_vm8, %v3342_v48 }
 0x3a4   :  { %5481 = vmatpush3.msk.msra.mxu1 %vm2271_vm8, %v3342_v48  ;;  %vm4152_vm8 = vcmask 228352  }
 0x3a5   :  { %5483 = vmatmul.mubr.msk.f32.vlgmr.msra.gmra.mrb[34].mxu1 %vm2552_vm11, %v6588_v50  ;;  %vm5767_vm9 = vmpackc.low %vm4152_vm8, %vm4152_vm8  ;;  %vm4169_vm11 = vcmask 220160  }
 0x3a6   :  { %vm5775_vm12 = vmpackc.low %vm4169_vm11, %vm4169_vm11 }
 0x44c   :  { %v5380_v53 = vpop.f32.mrb[26].mxu1  ;;  %v5393_v58 = vpop.f32.mrb[28].mxu0 }
 0x44d   :  { %v2631_v59 = vadd.f32 %v5380_v53, %v6649_v57  ;;  %v2728_v25 = vadd.f32 %v5393_v58, %v6649_v57  ;;  %v2625_v60 = vpop.f32.mrb[27].mxu1  ;;  %v2722_v55 = vpop.f32.mrb[29].mxu0 }
 0x44e   :  { %v2626_v10 = vadd.f32 %v2625_v60, %v6647_v56  ;;  %v2723_v63 = vadd.f32 %v2722_v55, %v6647_v56 }
 0x44f   :  { %v2635_v1 = vmax.f32 %v2631_v59, 0.0  ;;  %v2732_v31 = vmax.f32 %v2728_v25, 0.0 }
 0x450   :  { %v2634_v46 = vmax.f32 %v2626_v10, 0.0  ;;  %v2731_v2 = vmax.f32 %v2723_v63, 0.0 }
 0x451   :  { %v2637_v6 = vmul.f32 %v6267_v13, %v2635_v1  ;;  %v2734_v5 = vmul.f32 %v6267_v13, %v2732_v31 }
 0x452   :  { %v2636_v26 = vmul.f32 %v6267_v13, %v2634_v46  ;;  %v2733_v28 = vmul.f32 %v6267_v13, %v2731_v2 }
 0x453   :  { %v3464_v11 = vadd.f32 %v2734_v5, %v2637_v6  ;;  %v2738_v32 = vsel %vm224_vm10, %v2734_v5, 0.0  ;;  %v2641_v12 = vsel %vm224_vm10, %v2637_v6, 0.0  ;;  %v2647_v20 = vmul.f32 %v2637_v6, %v2637_v6 }
 0x454   :  { %v3463_v9 = vadd.f32 %v2733_v28, %v2636_v26  ;;  %2739 = vadd.xlane.f32.xlu1 %v2738_v32  ;;  %2642 = vadd.xlane.f32.xlu0 %v2641_v12  ;;  %v2646_v34 = vmul.f32 %v2636_v26, %v2636_v26  ;;  %v2638_v41 = vsel %vm224_vm10, %v2636_v26, 0.0  ;;  %v2743_v3 = vmul.f32 %v2733_v28, %v2733_v28 }
 0x455   :  { %v2735_v21 = vsel %vm224_vm10, %v2733_v28, 0.0  ;;  %v2744_v30 = vmul.f32 %v2734_v5, %v2734_v5  ;;  %v2651_v33 = vsel %vm224_vm10, %v2647_v20, 0.0 }
 0x456   :  { %v2648_v52 = vsel %vm224_vm10, %v2646_v34, 0.0  ;;  %v2745_v24 = vsel %vm224_vm10, %v2743_v3, 0.0 }
 0x457   :  { %v5406_v23 = vpop.f32.mrb[28].mxu1  ;;  %v5419_v16 = vpop.f32.mrb[30].mxu0  ;;  %v2748_v49 = vsel %vm224_vm10, %v2744_v30, 0.0 }
 0x458   :  { %v2825_v14 = vadd.f32 %v5406_v23, %v6649_v57  ;;  %v2819_v43 = vpop.f32.mrb[29].mxu1  ;;  %v2916_v15 = vpop.f32.mrb[31].mxu0  ;;  %2649 = vadd.xlane.f32.xlu0 %v2648_v52  ;;  %2639 = vadd.xlane.f32.xlu1 %v2638_v41  ;;  %v2922_v18 = vadd.f32 %v5419_v16, %v6649_v57 }
 0x459   :  { %v2820_v19 = vadd.f32 %v2819_v43, %v6647_v56  ;;  %v2917_v17 = vadd.f32 %v2916_v15, %v6647_v56 }
 0x45a   :  { %v2829_v62 = vmax.f32 %v2825_v14, 0.0  ;;  %v2926_v38 = vmax.f32 %v2922_v18, 0.0 }
 0x45b   :  { %v2828_v61 = vmax.f32 %v2820_v19, 0.0  ;;  %v2925_v22 = vmax.f32 %v2917_v17, 0.0 }
 0x45c   :  { %v2831_v42 = vmul.f32 %v6267_v13, %v2829_v62  ;;  %2746 = vadd.xlane.f32.xlu0 %v2745_v24  ;;  %2736 = vadd.xlane.f32.xlu1 %v2735_v21  ;;  %v2928_v25 = vmul.f32 %v6267_v13, %v2926_v38 }
 0x45d   :  { %v2830_v27 = vmul.f32 %v6267_v13, %v2828_v61  ;;  %v2927_v36 = vmul.f32 %v6267_v13, %v2925_v22 }
 0x45e   :  { %v6670_v29 = vadd.f32 %v3464_v11, %v2831_v42  ;;  %v2835_v1 = vsel %vm224_vm10, %v2831_v42, 0.0  ;;  %v2932_v32 = vsel %vm224_vm10, %v2928_v25, 0.0  ;;  %v2841_v12 = vmul.f32 %v2831_v42, %v2831_v42 }
 0x45f   :  { %v6673_v35 = vadd.f32 %v3463_v9, %v2830_v27  ;;  %v2832_v39 = vsel %vm224_vm10, %v2830_v27, 0.0  ;;  %v2929_v54 = vsel %vm224_vm10, %v2927_v36, 0.0  ;;  %v2840_v37 = vmul.f32 %v2830_v27, %v2830_v27 }
 0x460   :  { %2833 = vadd.xlane.f32.xlu0 %v2832_v39  ;;  %2652 = vadd.xlane.f32.xlu1 %v2651_v33  ;;  %v2937_v31 = vmul.f32 %v2927_v36, %v2927_v36  ;;  %v2938_v14 = vmul.f32 %v2928_v25, %v2928_v25  ;;  %v2845_v17 = vsel %vm224_vm10, %v2841_v12, 0.0 }
 0x461   :  { %v2842_v63 = vsel %vm224_vm10, %v2840_v37, 0.0 }
 0x462   :  { %v5432_v44 = vpop.f32.mrb[30].mxu1  ;;  %v5445_v45 = vpop.f32.mrb[32].mxu0  ;;  %v2939_v11 = vsel %vm224_vm10, %v2937_v31, 0.0  ;;  %v2942_v42 = vsel %vm224_vm10, %v2938_v14, 0.0 }
 0x463   :  { %v3019_v0 = vadd.f32 %v5432_v44, %v6649_v57  ;;  %v3116_v50 = vadd.f32 %v5445_v45, %v6649_v57  ;;  %v3013_v51 = vpop.f32.mrb[31].mxu1  ;;  %v3110_v47 = vpop.f32.mrb[33].mxu0 }
 0x464   :  { %v3014_v48 = vadd.f32 %v3013_v51, %v6647_v56  ;;  %v3111_v53 = vadd.f32 %v3110_v47, %v6647_v56  ;;  %2930 = vadd.xlane.f32.xlu0 %v2929_v54  ;;  %2749 = vadd.xlane.f32.xlu1 %v2748_v49 }
 0x465   :  { %v3023_v58 = vmax.f32 %v3019_v0, 0.0  ;;  %v3120_v59 = vmax.f32 %v3116_v50, 0.0 }
 0x466   :  { %v3022_v60 = vmax.f32 %v3014_v48, 0.0  ;;  %v3119_v55 = vmax.f32 %v3111_v53, 0.0 }
 0x467   :  { %v3025_v10 = vmul.f32 %v6267_v13, %v3023_v58  ;;  %v3122_v6 = vmul.f32 %v6267_v13, %v3120_v59 }
 0x468   :  { %v3024_v46 = vmul.f32 %v6267_v13, %v3022_v60  ;;  %2843 = vadd.xlane.f32.xlu0 %v2842_v63  ;;  %2836 = vadd.xlane.f32.xlu1 %v2835_v1  ;;  %v3121_v26 = vmul.f32 %v6267_v13, %v3119_v55 }
 0x469   :  { %v3496_v2 = vadd.f32 %v3025_v10, %v2928_v25  ;;  %v3029_v44 = vsel %vm224_vm10, %v3025_v10, 0.0  ;;  %v3126_v37 = vsel %vm224_vm10, %v3122_v6, 0.0  ;;  %v3035_v48 = vmul.f32 %v3025_v10, %v3025_v10 }
 0x46a   :  { %v3495_v5 = vadd.f32 %v3024_v46, %v2927_v36  ;;  %v3026_v19 = vsel %vm224_vm10, %v3024_v46, 0.0  ;;  %v3123_v30 = vsel %vm224_vm10, %v3121_v26, 0.0  ;;  %v3034_v36 = vmul.f32 %v3024_v46, %v3024_v46 }
 0x46b   :  { %v6691_v28 = vadd.f32 %v3496_v2, %v3122_v6  ;;  %v3131_v45 = vmul.f32 %v3121_v26, %v3121_v26  ;;  %v3039_v60 = vsel %vm224_vm10, %v3035_v48, 0.0 }
 0x46c   :  { %v6695_v9 = vadd.f32 %v3495_v5, %v3121_v26  ;;  %2940 = vadd.xlane.f32.xlu0 %v2939_v11  ;;  %2933 = vadd.xlane.f32.xlu1 %v2932_v32  ;;  %v3036_v38 = vsel %vm224_vm10, %v3034_v36, 0.0 }
 0x46d   :  { %v5458_v34 = vpop.f32.mrb[32].mxu1  ;;  %v5471_v52 = vpop.f32.mrb[34].mxu0  ;;  %v3133_v54 = vsel %vm224_vm10, %v3131_v45, 0.0 }
 0x46e   :  { %v3213_v23 = vadd.f32 %v5458_v34, %v6649_v57  ;;  %v3315_v16 = vadd.f32 %v5471_v52, %v6649_v57  ;;  %v3207_v41 = vpop.f32.mrb[33].mxu1  ;;  %v3309_v3 = vpop.f32.mrb[35].mxu0 }
 0x46f   :  { %v3208_v43 = vadd.f32 %v3207_v41, %v6647_v56  ;;  %v3310_v15 = vadd.f32 %v3309_v3, %v6647_v56 }
 0x470   :  { %v3217_v62 = vmax.f32 %v3213_v23, 0.0  ;;  %v3319_v20 = vmax.f32 %v3315_v16, 0.0  ;;  %3027 = vadd.xlane.f32.xlu0 %v3026_v19  ;;  %2846 = vadd.xlane.f32.xlu1 %v2845_v17 }
 0x471   :  { %v3216_v61 = vmax.f32 %v3208_v43, 0.0  ;;  %v3318_v22 = vmax.f32 %v3310_v15, 0.0 }
 0x472   :  { %v3219_v24 = vmul.f32 %v6267_v13, %v3217_v62  ;;  %v3321_v21 = vmul.f32 %v6267_v13, %v3319_v20 }
 0x473   :  { %v3218_v27 = vmul.f32 %v6267_v13, %v3216_v61  ;;  %v3320_v18 = vmul.f32 %v6267_v13, %v3318_v22 }
 0x474   :  { %v3508_v39 = vadd.f32 %v3321_v21, %v3219_v24  ;;  %3124 = vadd.xlane.f32.xlu0 %v3123_v30  ;;  %2943 = vadd.xlane.f32.xlu1 %v2942_v42  ;;  %v3223_v46 = vsel %vm224_vm10, %v3219_v24, 0.0  ;;  %v3325_v5 = vsel %vm224_vm10, %v3321_v21, 0.0  ;;  %v3229_v26 = vmul.f32 %v3219_v24, %v3219_v24 }
 0x475   :  { %v3507_v33 = vadd.f32 %v3320_v18, %v3218_v27  ;;  %v3322_v10 = vsel %vm224_vm10, %v3320_v18, 0.0  ;;  %v3228_v1 = vmul.f32 %v3218_v27, %v3218_v27  ;;  %v3330_v2 = vmul.f32 %v3320_v18, %v3320_v18 }
 0x476   :  { %v3233_v32 = vsel %vm224_vm10, %v3229_v26, 0.0  ;;  %v3331_v34 = vmul.f32 %v3321_v21, %v3321_v21 }
 0x477   :  { %v3230_v31 = vsel %vm224_vm10, %v3228_v1, 0.0 }
 0x478   :  { %v5484_v49 = vpop.f32.mrb[34].mxu1  ;;  %3037 = vadd.xlane.f32.xlu0 %v3036_v38  ;;  %3030 = vadd.xlane.f32.xlu1 %v3029_v44  ;;  %v3335_v23 = vsel %vm224_vm10, %v3331_v34, 0.0 }
 0x479   :  { %v3417_v0 = vadd.f32 %v5484_v49, %v6649_v57  ;;  %v3411_v50 = vpop.f32.mrb[35].mxu1  ;;  %v3220_v57 = vsel %vm224_vm10, %v3218_v27, 0.0 }
 0x47a   :  { %v3412_v51 = vadd.f32 %v3411_v50, %v6647_v56  ;;  %v3132_v56 = vmul.f32 %v3122_v6, %v3122_v6  ;;  %v3332_v6 = vsel %vm224_vm10, %v3330_v2, 0.0 }
 0x47b   :  { %v3421_v47 = vmax.f32 %v3417_v0, 0.0 }
 0x47c   :  { %v3420_v53 = vmax.f32 %v3412_v51, 0.0  ;;  %3134 = vadd.xlane.f32.xlu0 %v3133_v54  ;;  %3127 = vadd.xlane.f32.xlu1 %v3126_v37  ;;  %v3136_v63 = vsel %vm224_vm10, %v3132_v56, 0.0 }
 0x47d   :  { %v3423_v58 = vmul.f32 %v6267_v13, %v3421_v47 }
 0x47e   :  { %v3422_v59 = vmul.f32 %v6267_v13, %v3420_v53 }
 0x47f   :  { %v6717_v25 = vadd.f32 %v3508_v39, %v3423_v58  ;;  %v3427_v16 = vsel %vm224_vm10, %v3423_v58, 0.0  ;;  %v3433_v41 = vmul.f32 %v3423_v58, %v3423_v58 }
 0x480   :  { %v6721_v55 = vadd.f32 %v3507_v33, %v3422_v59  ;;  %3221 = vadd.xlane.f32.xlu0 %v3220_v57  ;;  %3040 = vadd.xlane.f32.xlu1 %v3039_v60  ;;  %v3424_v11 = vsel %vm224_vm10, %v3422_v59, 0.0  ;;  %v3432_v12 = vmul.f32 %v3422_v59, %v3422_v59 }
 0x481   :  { %v3437_v3 = vsel %vm224_vm10, %v3433_v41, 0.0 }
 0x482   :  { %v3434_v52 = vsel %vm224_vm10, %v3432_v12, 0.0 }
 0x484   :  { %3323 = vadd.xlane.f32.xlu0 %v3322_v10  ;;  %3137 = vadd.xlane.f32.xlu1 %v3136_v63 }
 0x488   :  { %3231 = vadd.xlane.f32.xlu0 %v3230_v31  ;;  %3224 = vadd.xlane.f32.xlu1 %v3223_v46 }
 0x48c   :  { %3333 = vadd.xlane.f32.xlu0 %v3332_v6  ;;  %3326 = vadd.xlane.f32.xlu1 %v3325_v5 }
 0x490   :  { %3425 = vadd.xlane.f32.xlu0 %v3424_v11  ;;  %3234 = vadd.xlane.f32.xlu1 %v3233_v32 }
 0x494   :  { %3435 = vadd.xlane.f32.xlu0 %v3434_v52  ;;  %3336 = vadd.xlane.f32.xlu1 %v3335_v23 }
 0x498   :  { %3428 = vadd.xlane.f32.xlu1 %v3427_v16 }
 0x49c   :  { %3438 = vadd.xlane.f32.xlu1 %v3437_v3 }
 0x4e1   :  { %v2740_v14 = vpop.xlane.xlu1 %2739  ;;  %v2643_v43 = vpop.xlane.xlu0 %2642 }
 0x4e2   :  { %v2742_v56 = vadd.f32 %v2740_v14, %v2643_v43 }
 0x4e5   :  { %v2650_v15 = vpop.xlane.xlu0 %2649  ;;  %v2640_v19 = vpop.xlane.xlu1 %2639 }
 0x4e9   :  { %v2747_v17 = vpop.xlane.xlu0 %2746  ;;  %v2737_v62 = vpop.xlane.xlu1 %2736 }
 0x4ea   :  { %v2741_v51 = vadd.f32 %v2737_v62, %v2640_v19  ;;  %v2751_v48 = vadd.f32 %v2747_v17, %v2650_v15 }
 0x4ed   :  { %v2834_v20 = vpop.xlane.xlu0 %2833  ;;  %v2653_v61 = vpop.xlane.xlu1 %2652 }
 0x4ee   :  { %v2838_v37 = vadd.f32 %v2834_v20, %v2741_v51 }
 0x4f1   :  { %v2931_v22 = vpop.xlane.xlu0 %2930  ;;  %v2750_v24 = vpop.xlane.xlu1 %2749 }
 0x4f2   :  { %v2935_v53 = vadd.f32 %v2931_v22, %v2838_v37  ;;  %v2752_v5 = vadd.f32 %v2750_v24, %v2653_v61 }
 0x4f5   :  { %v2844_v21 = vpop.xlane.xlu0 %2843  ;;  %v2837_v42 = vpop.xlane.xlu1 %2836 }
 0x4f6   :  { %v2848_v57 = vadd.f32 %v2844_v21, %v2751_v48  ;;  %v2839_v46 = vadd.f32 %v2837_v42, %v2742_v56  ;;  %v57_v56 = vld [vmem:[%s7340_s7 + $0x38] sm:$0xff] }
 0x4f9   :  { %v2941_v27 = vpop.xlane.xlu0 %2940  ;;  %v2934_v18 = vpop.xlane.xlu1 %2933 }
 0x4fa   :  { %v2945_v10 = vadd.f32 %v2941_v27, %v2848_v57  ;;  %v2936_v26 = vadd.f32 %v2934_v18, %v2839_v46 }
 0x4fd   :  { %v3028_v30 = vpop.xlane.xlu0 %3027  ;;  %v2847_v36 = vpop.xlane.xlu1 %2846 }
 0x4fe   :  { %v3032_v60 = vadd.f32 %v3028_v30, %v2935_v53  ;;  %v2849_v52 = vadd.f32 %v2847_v36, %v2752_v5  ;;  %v3467_v5 = vmul.f32 0.33333334, %v6673_v35 }
 0x501   :  { %v3125_v39 = vpop.xlane.xlu0 %3124  ;;  %v2944_v33 = vpop.xlane.xlu1 %2943 }
 0x502   :  { %v3129_v63 = vadd.f32 %v3125_v39, %v3032_v60  ;;  %v2946_v3 = vadd.f32 %v2944_v33, %v2849_v52 }
 0x505   :  { %v3038_v38 = vpop.xlane.xlu0 %3037  ;;  %v3031_v44 = vpop.xlane.xlu1 %3030 }
 0x506   :  { %v3042_v2 = vadd.f32 %v3038_v38, %v2945_v10  ;;  %v3033_v23 = vadd.f32 %v3031_v44, %v2936_v26  ;;  %v58_v10 = vld [vmem:[%s7340_s7 + $0x40] sm:$0xff]  ;;  %v3499_v26 = vmul.f32 0.33333334, %v6695_v9 }
 0x509   :  { %v3135_v45 = vpop.xlane.xlu0 %3134  ;;  %v3128_v49 = vpop.xlane.xlu1 %3127 }
 0x50a   :  { %v3139_v11 = vadd.f32 %v3135_v45, %v3042_v2  ;;  %v3130_v15 = vadd.f32 %v3128_v49, %v3033_v23  ;;  %v3468_v2 = vmul.f32 0.33333334, %v6670_v29 }
 0x50d   :  { %v3222_v0 = vpop.xlane.xlu0 %3221  ;;  %v3041_v50 = vpop.xlane.xlu1 %3040 }
 0x50e   :  { %v3226_v6 = vadd.f32 %v3222_v0, %v3129_v63  ;;  %v3043_v62 = vadd.f32 %v3041_v50, %v2946_v3 }
 0x511   :  { %v3324_v47 = vpop.xlane.xlu0 %3323  ;;  %v3138_v54 = vpop.xlane.xlu1 %3137 }
 0x512   :  { %v3328_v32 = vadd.f32 %v3324_v47, %v3226_v6  ;;  %v3140_v21 = vadd.f32 %v3138_v54, %v3043_v62  ;;  %v55_v54 = vld [vmem:[%s7340_s7 + $0x28] sm:$0xff] }
 0x515   :  { %v3232_v58 = vpop.xlane.xlu0 %3231  ;;  %v3225_v59 = vpop.xlane.xlu1 %3224 }
 0x516   :  { %v3236_v16 = vadd.f32 %v3232_v58, %v3139_v11  ;;  %v3227_v20 = vadd.f32 %v3225_v59, %v3130_v15  ;;  %v56_v58 = vld [vmem:[%s7340_s7 + $0x30] sm:$0xff]  ;;  %v3511_v11 = vmul.f32 0.33333334, %v6721_v55 }
 0x519   :  { %v3334_v1 = vpop.xlane.xlu0 %3333  ;;  %v3327_v31 = vpop.xlane.xlu1 %3326 }
 0x51a   :  { %v3338_v14 = vadd.f32 %v3334_v1, %v3236_v16  ;;  %v3329_v61 = vadd.f32 %v3327_v31, %v3227_v20 }
 0x51d   :  { %v3426_v12 = vpop.xlane.xlu0 %3425  ;;  %v3235_v34 = vpop.xlane.xlu1 %3234 }
 0x51e   :  { %v3430_v41 = vadd.f32 %v3426_v12, %v3328_v32  ;;  %v3237_v18 = vadd.f32 %v3235_v34, %v3140_v21  ;;  %v3500_v32 = vmul.f32 0.33333334, %v6691_v28  ;;  %v3512_v12 = vmul.f32 0.33333334, %v6717_v25 }
 0x520   :  { %v3443_v43 = vmul.f32 0.0046296297, %v3430_v41 }
 0x521   :  { %v3436_v19 = vpop.xlane.xlu0 %3435  ;;  %v3337_v17 = vpop.xlane.xlu1 %3336 }
 0x522   :  { %v3440_v22 = vadd.f32 %v3436_v19, %v3338_v14  ;;  %v3447_v24 = vmul.f32 %v3443_v43, %v3443_v43  ;;  %v3339_v38 = vadd.f32 %v3337_v17, %v3237_v18 }
 0x524   :  { %v3445_v42 = vmul.f32 0.0046296297, %v3440_v22 }
 0x525   :  { %v3429_v27 = vpop.xlane.xlu1 %3428 }
 0x526   :  { %v3449_v30 = vsub.f32 %v3445_v42, %v3447_v24  ;;  %v3431_v36 = vadd.f32 %v3429_v27, %v3329_v61 }
 0x528   :  { %v3451_v39 = vmax.f32 %v3449_v30, 0.0  ;;  %v3444_v44 = vmul.f32 0.0046296297, %v3431_v36  ;;  %v60_v30 = vld [vmem:[%s7340_s7 + $0x50] sm:$0xff]  ;;  %v59_v36 = vld [vmem:[%s7340_s7 + $0x48] sm:$0xff] }
 0x529   :  { %v3439_v33 = vpop.xlane.xlu1 %3438 }
 0x52a   :  { %v3453_v45 = vadd.f32 1e-05, %v3451_v39  ;;  %v3441_v49 = vadd.f32 %v3439_v33, %v3339_v38  ;;  %v3448_v0 = vmul.f32 %v3444_v44, %v3444_v44  ;;  %v62_v39 = vld [vmem:[%s7340_s7 + $0x60] sm:$0xff]  ;;  %v61_v38 = vld [vmem:[%s7340_s7 + $0x58] sm:$0xff] }
 0x52c   :  { %5888 = vrsqrt.f32 %v3453_v45  ;;  %v3446_v51 = vmul.f32 0.0046296297, %v3441_v49 }
 0x52e   :  { %v3450_v50 = vsub.f32 %v3446_v51, %v3448_v0 }
 0x530   :  { %v3452_v47 = vmax.f32 %v3450_v50, 0.0 }
 0x532   :  { %v3454_v37 = vadd.f32 1e-05, %v3452_v47 }
 0x534   :  { %5890 = vrsqrt.f32 %v3454_v37 }
 0x536   :  { %v5889_v48 = vpop.eup %5888 }
 0x537   :  { %v3457_v53 = vmul.f32 %v5889_v48, %v55_v54  ;;  %v3520_v54 = vld [vmem:[%s7336_s3 + $0x8] sm:$0xff]  ;;  %v3521_v48 = vld [vmem:[%s7336_s3 + $0x10] sm:$0xff] }
 0x539   :  { %3471 = vperm.xlu0 %5810, %v3457_v53   ;;  %v3459_v57 = vmul.f32 %v3457_v53, %v3443_v43  ;;  %v3522_v53 = vld [vmem:[%s7336_s3 + $0x18] sm:$0xff] }
 0x53b   :  { %v3461_v1 = vsub.f32 %v57_v56, %v3459_v57 }
 0x53e   :  { %v5891_v59 = vpop.eup %5890 }
 0x53f   :  { %v3458_v60 = vmul.f32 %v5891_v59, %v56_v58 }
 0x541   :  { %3476 = vperm.xlu1 %5809, %v3458_v60   ;;  %v3460_v63 = vmul.f32 %v3458_v60, %v3444_v44  ;;  %v3519_v44 = vld [vmem:[%s7336_s3] sm:$0xff] }
 0x542   :  { %5505 = vmatprep.mubr.msk.f32.mxu0 %vm3563_vm1, %v3519_v44 }
 0x543   :  { %v3462_v31 = vsub.f32 %v58_v10, %v3460_v63 }
 0x545   :  { %3483 = vperm.xlu1 %5809, %v3461_v1   ;;  %3488 = vperm.xlu0 %5810, %v3462_v31  }
 0x5b8   :  { %v3472_v46 = vpop.permute.xlu0 %3471 }
 0x5b9   :  { %v3479_v34 = vmul.f32 %v3472_v46, %v3467_v5  ;;  %v3501_v52 = vmul.f32 %v3499_v26, %v3472_v46  ;;  %v3513_v23 = vmul.f32 %v3511_v11, %v3472_v46 }
 0x5c0   :  { %v3477_v6 = vpop.permute.xlu1 %3476 }
 0x5c1   :  { %v3480_v16 = vmul.f32 %v3477_v6, %v3468_v2  ;;  %v3502_v41 = vmul.f32 %v3500_v32, %v3477_v6  ;;  %v3514_v3 = vmul.f32 %v3512_v12, %v3477_v6 }
 0x5c4   :  { %v3484_v15 = vpop.permute.xlu1 %3483  ;;  %v3489_v14 = vpop.permute.xlu0 %3488 }
 0x5c5   :  { %v3491_v29 = vadd.f32 %v3484_v15, %v3479_v34  ;;  %v3503_v43 = vadd.f32 %v3501_v52, %v3484_v15  ;;  %v3515_v19 = vadd.f32 %v3513_v23, %v3484_v15  ;;  %v3492_v35 = vadd.f32 %v3489_v14, %v3480_v16 }
 0x5c6   :  { %v3504_v17 = vadd.f32 %v3502_v41, %v3489_v14  ;;  %v3516_v9 = vadd.f32 %v3514_v3, %v3489_v14 }
 0x5c7   :  { %v3493_v55 = vmul.f32 %v6267_v13, %v3491_v29  ;;  %v3505_v28 = vmul.f32 %v6267_v13, %v3503_v43  ;;  %v3517_v25 = vmul.f32 %v6267_v13, %v3515_v19  ;;  %v3494_v62 = vmul.f32 %v6267_v13, %v3492_v35 }
 0x5c8   :  { %v3506_v20 = vmul.f32 %v6267_v13, %v3504_v17  ;;  %v3518_v22 = vmul.f32 %v6267_v13, %v3516_v9 }
 0x5c9   :  { %v6759_v21 = vpack.c.bf16 %v3494_v62, %v3493_v55  ;;  %v5826_v61 = vpack.i.bf16 %v3494_v62, %v3493_v55 }
 0x5ca   :  { %v6761_v24 = vpack.c.bf16 %v3506_v20, %v3505_v28  ;;  %v6763_v42 = vpack.c.bf16 %v3518_v22, %v3517_v25  ;;  %v5821_v27 = vpack.i.bf16 %v3518_v22, %v3517_v25  ;;  %v5816_v18 = vpack.i.bf16 %v3506_v20, %v3505_v28 }
 0x5cc   :  { %5822 = vrot.lane.b32.xlu0 %v5821_v27, %s5949_s10  ;;  %5817 = vrot.lane.b32.xlu1 %v5816_v18, %s5949_s10  ;;  %s5955_s10 = smov 126  }
 0x5d0   :  { %5832 = vrot.lane.b32.xlu0 %v5816_v18, %s5948_s9  ;;  %5827 = vrot.lane.b32.xlu1 %v5826_v61, %s5948_s9 }
 0x5d4   :  { %3550 = vperm.xlu0 %5810, %v60_v30   ;;  %3545 = vperm.xlu1 %5809, %v59_v36  }
 0x5d8   :  { %3560 = vperm.xlu0 %5810, %v62_v39   ;;  %3555 = vperm.xlu1 %5809, %v61_v38  }
 0x63e   :  { %v5823_v33 = vpop.permute.xlu0 %5822  ;;  %v5818_v45 = vpop.permute.xlu1 %5817 }
 0x63f   :  { %v5825_v49 = vunpack.i.h.bf16 %v5823_v33  ;;  %v5824_v0 = vunpack.i.l.bf16 %v5823_v33  ;;  %v5820_v51 = vunpack.i.h.bf16 %v5818_v45  ;;  %v5819_v50 = vunpack.i.l.bf16 %v5818_v45 }
 0x641   :  { %v5663_v47 = vpack.c.bf16 %v5820_v51, %v5819_v50  ;;  %v5669_v37 = vpack.c.bf16 %v5825_v49, %v5824_v0 }
 0x642   :  { %v5828_v58 = vpop.permute.xlu1 %5827  ;;  %v5833_v56 = vpop.permute.xlu0 %5832 }
 0x643   :  { %5665 = vmatprep.subr.msk.bf16.mxu0 %vm6576_vm13, %v5663_v47  ;;  %v5830_v59 = vunpack.i.h.bf16 %v5828_v58  ;;  %v5829_v40 = vunpack.i.l.bf16 %v5828_v58  ;;  %v5835_v10 = vunpack.i.h.bf16 %v5833_v56  ;;  %v5834_v63 = vunpack.i.l.bf16 %v5833_v56 }
 0x644   :  { %5668 = vmatpush3.bf16.msk.msra.mxu0 %vm6576_vm13, %v5663_v47 }
 0x645   :  { %5671 = vmatprep.subr.msk.bf16.mxu0 %vm6576_vm13, %v5669_v37  ;;  %v5705_v60 = vpack.c.bf16 %v5830_v59, %v5829_v40  ;;  %v5729_v1 = vpack.c.bf16 %v5835_v10, %v5834_v63 }
 0x648   :  { %5674 = vmatpush3.bf16.msk.msra.mxu0 %vm6576_vm13, %v5669_v37 }
 0x649   :  { %5676 = vmatprep.subr.bf16.mxu0 %v6759_v21 }
 0x64c   :  { %5678 = vmatpush3.bf16.msra.mxu0 %v6759_v21 }
 0x64d   :  { %5680 = vmatprep.subr.bf16.mxu0 %v6761_v24 }
 0x650   :  { %5682 = vmatpush3.bf16.msra.mxu0 %v6761_v24 }
 0x651   :  { %5684 = vmatprep.subr.bf16.mxu0 %v6763_v42 }
 0x653   :  { %v6853_v31 = vpop.permute.xlu0 %3550  ;;  %v6855_v46 = vpop.permute.xlu1 %3545 }
 0x654   :  { %5686 = vmatpush3.bf16.msra.mxu0 %v6763_v42 }
 0x655   :  { %5689 = vmatprep.subr.msk.bf16.mxu0 %vm6576_vm13, %v5669_v37 }
 0x657   :  { %5506 = vmatmul.mubr.msk.f32.vlgmr.msra.gmra.mrb[36].mxu0 %vm3563_vm1, %v3520_v54  ;;  %v6859_v32 = vpop.permute.xlu0 %3560  ;;  %v6861_v52 = vpop.permute.xlu1 %3555 }
 0x658   :  { %5692 = vmatpush3.bf16.msk.msra.mxu0 %vm6576_vm13, %v5669_v37  ;;  %5508 = vmatprep.mubr.msk.f32.mxu0 %vm3563_vm1, %v3521_v48  ;;  %vm47_vm13 = vcmp.eq.s32.totalorder %v36_v8, 0 }
 0x659   :  { %5694 = vmatprep.subr.bf16.mxu0 %v6759_v21 }
 0x65b   :  { %5509 = vmatmul.mubr.msk.f32.gmra.mrb[38].mxu0 %vm3563_vm1, %v3522_v53 }
 0x65c   :  { %5696 = vmatpush3.bf16.msra.mxu0 %v6759_v21  ;;  %5531 = vmatprep.mubr.msk.f32.mxu0 %vm3563_vm1, %v3519_v44 }
 0x65d   :  { %5698 = vmatprep.subr.bf16.mxu0 %v6761_v24 }
 0x660   :  { %5700 = vmatpush3.bf16.msra.mxu0 %v6761_v24 }
 0x661   :  { %5702 = vmatprep.subr.bf16.mxu0 %v6763_v42 }
 0x664   :  { %5704 = vmatpush3.bf16.msra.mxu0 %v6763_v42 }
 0x665   :  { %5707 = vmatprep.subr.msk.bf16.mxu0 %vm6823_vm2, %v5705_v60 }
 0x668   :  { %5710 = vmatpush3.bf16.msk.msra.mxu0 %vm6823_vm2, %v5705_v60 }
 0x669   :  { %5712 = vmatprep.subr.bf16.mxu0 %v6759_v21 }
 0x66b   :  { %5532 = vmatmul.mubr.msk.f32.vlgmr.msra.gmra.mrb[40].mxu0 %vm3563_vm1, %v3520_v54 }
 0x66c   :  { %5714 = vmatpush3.bf16.msra.mxu0 %v6759_v21  ;;  %5534 = vmatprep.mubr.msk.f32.mxu0 %vm3563_vm1, %v3521_v48 }
 0x66d   :  { %5716 = vmatprep.subr.bf16.mxu0 %v6761_v24 }
 0x66f   :  { %5535 = vmatmul.mubr.msk.f32.gmra.mrb[42].mxu0 %vm3563_vm1, %v3522_v53 }
 0x670   :  { %5718 = vmatpush3.bf16.msra.mxu0 %v6761_v24  ;;  %5557 = vmatprep.mubr.msk.f32.mxu0 %vm3563_vm1, %v3519_v44 }
 0x671   :  { %5720 = vmatprep.subr.bf16.mxu0 %v6763_v42 }
 0x674   :  { %5722 = vmatpush3.bf16.msra.mxu0 %v6763_v42 }
 0x675   :  { %5725 = vmatprep.subr.msk.bf16.mxu0 %vm6823_vm2, %v5705_v60 }
 0x678   :  { %5728 = vmatpush3.bf16.msk.msra.mxu0 %vm6823_vm2, %v5705_v60 }
 0x679   :  { %5731 = vmatprep.subr.msk.bf16.mxu0 %vm6823_vm2, %v5729_v1 }
 0x67c   :  { %5734 = vmatpush3.bf16.msk.msra.mxu0 %vm6823_vm2, %v5729_v1 }
 0x67f   :  { %5558 = vmatmul.mubr.msk.f32.vlgmr.msra.gmra.mrb[44].mxu0 %vm3563_vm1, %v3520_v54 }
 0x680   :  { %5560 = vmatprep.mubr.msk.f32.mxu0 %vm3563_vm1, %v3521_v48 }
 0x683   :  { %5561 = vmatmul.mubr.msk.f32.gmra.mrb[46].mxu0 %vm3563_vm1, %v3522_v53 }
 0x72a   :  { %v5507_v2 = vpop.f32.mrb[36].mxu0 }
 0x72b   :  { %v3648_v6 = vadd.f32 %v5507_v2, %v6853_v31  ;;  %v3642_v5 = vpop.f32.mrb[37].mxu0 }
 0x72c   :  { %v3643_v26 = vadd.f32 %v3642_v5, %v6855_v46 }
 0x72d   :  { %v3662_v11 = vmax.f32 %v3648_v6, 0.0 }
 0x72e   :  { %v3661_v12 = vmax.f32 %v3643_v26, 0.0  ;;  %v5510_v34 = vpop.f32.mrb[38].mxu0 }
 0x72f   :  { %v3666_v23 = vmul.f32 %v6267_v13, %v3662_v11  ;;  %v3658_v16 = vadd.f32 %v5510_v34, %v6859_v32  ;;  %v3652_v41 = vpop.f32.mrb[39].mxu0 }
 0x730   :  { %v3665_v3 = vmul.f32 %v6267_v13, %v3661_v12  ;;  %v3653_v15 = vadd.f32 %v3652_v41, %v6861_v52 }
 0x731   :  { %v3664_v14 = vmax.f32 %v3658_v16, 0.0  ;;  %v3672_v29 = vsel %vm224_vm10, %v3666_v23, 0.0  ;;  %v3686_v17 = vmul.f32 %v3666_v23, %v3666_v23 }
 0x732   :  { %v3663_v43 = vmax.f32 %v3653_v15, 0.0  ;;  %3673 = vadd.xlane.f32.xlu0 %v3672_v29  ;;  %v3669_v19 = vsel %vm224_vm10, %v3665_v3, 0.0  ;;  %v3685_v35 = vmul.f32 %v3665_v3, %v3665_v3 }
 0x733   :  { %3670 = vadd.xlane.f32.xlu1 %v3669_v19  ;;  %v3668_v28 = vmul.f32 %v6267_v13, %v3664_v14  ;;  %v3692_v25 = vsel %vm224_vm10, %v3686_v17, 0.0 }
 0x734   :  { %v3689_v9 = vsel %vm224_vm10, %v3685_v35, 0.0  ;;  %v3667_v55 = vmul.f32 %v6267_v13, %v3663_v43 }
 0x735   :  { %v3678_v22 = vsel %vm224_vm10, %v3668_v28, 0.0  ;;  %v3688_v21 = vmul.f32 %v3668_v28, %v3668_v28 }
 0x736   :  { %3690 = vadd.xlane.f32.xlu0 %v3689_v9  ;;  %v3675_v62 = vsel %vm224_vm10, %v3667_v55, 0.0  ;;  %v3687_v20 = vmul.f32 %v3667_v55, %v3667_v55 }
 0x737   :  { %3693 = vadd.xlane.f32.xlu1 %v3692_v25  ;;  %v3698_v42 = vsel %vm224_vm10, %v3688_v21, 0.0 }
 0x738   :  { %v3695_v61 = vsel %vm224_vm10, %v3687_v20, 0.0 }
 0x73a   :  { %3676 = vadd.xlane.f32.xlu0 %v3675_v62 }
 0x73b   :  { %3679 = vadd.xlane.f32.xlu1 %v3678_v22 }
 0x73e   :  { %v5533_v24 = vpop.f32.mrb[40].mxu0  ;;  %3696 = vadd.xlane.f32.xlu0 %v3695_v61 }
 0x73f   :  { %v3787_v27 = vadd.f32 %v5533_v24, %v6853_v31  ;;  %v3781_v18 = vpop.f32.mrb[41].mxu0  ;;  %3699 = vadd.xlane.f32.xlu1 %v3698_v42 }
 0x740   :  { %v3782_v30 = vadd.f32 %v3781_v18, %v6855_v46 }
 0x741   :  { %v3801_v36 = vmax.f32 %v3787_v27, 0.0 }
 0x742   :  { %v3800_v39 = vmax.f32 %v3782_v30, 0.0  ;;  %v5536_v38 = vpop.f32.mrb[42].mxu0 }
 0x743   :  { %v3805_v44 = vmul.f32 %v6267_v13, %v3801_v36  ;;  %v3797_v33 = vadd.f32 %v5536_v38, %v6859_v32  ;;  %v3791_v45 = vpop.f32.mrb[43].mxu0 }
 0x744   :  { %v3804_v49 = vmul.f32 %v6267_v13, %v3800_v39  ;;  %v3792_v0 = vadd.f32 %v3791_v45, %v6861_v52 }
 0x745   :  { %v3803_v51 = vmax.f32 %v3797_v33, 0.0  ;;  %v3811_v50 = vsel %vm224_vm10, %v3805_v44, 0.0  ;;  %v3825_v47 = vmul.f32 %v3805_v44, %v3805_v44  ;;  %v4023_v37 = vadd.f32 %v3805_v44, %v3666_v23 }
 0x746   :  { %v3802_v54 = vmax.f32 %v3792_v0, 0.0  ;;  %3812 = vadd.xlane.f32.xlu1 %v3811_v50  ;;  %v3808_v48 = vsel %vm224_vm10, %v3804_v49, 0.0  ;;  %v3824_v53 = vmul.f32 %v3804_v49, %v3804_v49  ;;  %v4022_v58 = vadd.f32 %v3804_v49, %v3665_v3 }
 0x747   :  { %v3807_v59 = vmul.f32 %v6267_v13, %v3803_v51  ;;  %3809 = vadd.xlane.f32.xlu0 %v3808_v48  ;;  %v3831_v60 = vsel %vm224_vm10, %v3825_v47, 0.0 }
 0x748   :  { %v3806_v40 = vmul.f32 %v6267_v13, %v3802_v54  ;;  %v3828_v10 = vsel %vm224_vm10, %v3824_v53, 0.0 }
 0x749   :  { %v4025_v56 = vadd.f32 %v3807_v59, %v3668_v28  ;;  %v3817_v1 = vsel %vm224_vm10, %v3807_v59, 0.0  ;;  %v3827_v2 = vmul.f32 %v3807_v59, %v3807_v59 }
 0x74a   :  { %3832 = vadd.xlane.f32.xlu1 %v3831_v60  ;;  %v4024_v63 = vadd.f32 %v3806_v40, %v3667_v55  ;;  %v3814_v6 = vsel %vm224_vm10, %v3806_v40, 0.0  ;;  %v3826_v5 = vmul.f32 %v3806_v40, %v3806_v40 }
 0x74b   :  { %3829 = vadd.xlane.f32.xlu0 %v3828_v10  ;;  %v3837_v26 = vsel %vm224_vm10, %v3827_v2, 0.0 }
 0x74c   :  { %v3834_v12 = vsel %vm224_vm10, %v3826_v5, 0.0 }
 0x74e   :  { %3818 = vadd.xlane.f32.xlu1 %v3817_v1 }
 0x74f   :  { %3815 = vadd.xlane.f32.xlu0 %v3814_v6 }
 0x752   :  { %v5559_v11 = vpop.f32.mrb[44].mxu0  ;;  %3838 = vadd.xlane.f32.xlu1 %v3837_v26 }
 0x753   :  { %v3924_v34 = vadd.f32 %v5559_v11, %v6853_v31  ;;  %v3918_v23 = vpop.f32.mrb[45].mxu0  ;;  %3835 = vadd.xlane.f32.xlu0 %v3834_v12 }
 0x754   :  { %v3919_v16 = vadd.f32 %v3918_v23, %v6855_v46 }
 0x755   :  { %v3938_v41 = vmax.f32 %v3924_v34, 0.0 }
 0x756   :  { %v3937_v3 = vmax.f32 %v3919_v16, 0.0  ;;  %v5562_v15 = vpop.f32.mrb[46].mxu0 }
 0x757   :  { %v3942_v14 = vmul.f32 %v6267_v13, %v3938_v41  ;;  %v3934_v29 = vadd.f32 %v5562_v15, %v6859_v32  ;;  %v3928_v43 = vpop.f32.mrb[47].mxu0 }
 0x758   :  { %v3941_v19 = vmul.f32 %v6267_v13, %v3937_v3  ;;  %v3929_v35 = vadd.f32 %v3928_v43, %v6861_v52 }
 0x759   :  { %v3940_v17 = vmax.f32 %v3934_v29, 0.0  ;;  %v3948_v9 = vsel %vm224_vm10, %v3942_v14, 0.0  ;;  %v3962_v31 = vmul.f32 %v3942_v14, %v3942_v14  ;;  %v6900_v55 = vadd.f32 %v4023_v37, %v3942_v14 }
 0x75a   :  { %v3939_v28 = vmax.f32 %v3929_v35, 0.0  ;;  %3949 = vadd.xlane.f32.xlu1 %v3948_v9  ;;  %v3945_v46 = vsel %vm224_vm10, %v3941_v19, 0.0  ;;  %v3961_v25 = vmul.f32 %v3941_v19, %v3941_v19  ;;  %v6903_v62 = vadd.f32 %v4022_v58, %v3941_v19 }
 0x75b   :  { %v3944_v32 = vmul.f32 %v6267_v13, %v3940_v17  ;;  %3946 = vadd.xlane.f32.xlu0 %v3945_v46  ;;  %v3968_v52 = vsel %vm224_vm10, %v3962_v31, 0.0 }
 0x75c   :  { %v3943_v20 = vmul.f32 %v6267_v13, %v3939_v28  ;;  %v3965_v21 = vsel %vm224_vm10, %v3961_v25, 0.0 }
 0x75d   :  { %v6908_v22 = vadd.f32 %v4025_v56, %v3944_v32  ;;  %v3954_v24 = vsel %vm224_vm10, %v3944_v32, 0.0  ;;  %v3964_v42 = vmul.f32 %v3944_v32, %v3944_v32 }
 0x75e   :  { %3969 = vadd.xlane.f32.xlu1 %v3968_v52  ;;  %v6911_v61 = vadd.f32 %v4024_v63, %v3943_v20  ;;  %v3951_v27 = vsel %vm224_vm10, %v3943_v20, 0.0  ;;  %v3963_v18 = vmul.f32 %v3943_v20, %v3943_v20 }
 0x75f   :  { %3966 = vadd.xlane.f32.xlu0 %v3965_v21  ;;  %v3974_v30 = vsel %vm224_vm10, %v3964_v42, 0.0 }
 0x760   :  { %v3971_v36 = vsel %vm224_vm10, %v3963_v18, 0.0 }
 0x762   :  { %3955 = vadd.xlane.f32.xlu1 %v3954_v24 }
 0x763   :  { %3952 = vadd.xlane.f32.xlu0 %v3951_v27 }
 0x766   :  { %3975 = vadd.xlane.f32.xlu1 %v3974_v30 }
 0x767   :  { %3972 = vadd.xlane.f32.xlu0 %v3971_v36 }
 0x7bf   :  { %v3674_v39 = vpop.xlane.xlu0 %3673 }
 0x7c0   :  { %v3671_v38 = vpop.xlane.xlu1 %3670 }
 0x7c3   :  { %v3691_v44 = vpop.xlane.xlu0 %3690 }
 0x7c4   :  { %v3694_v33 = vpop.xlane.xlu1 %3693 }
 0x7c7   :  { %v3677_v49 = vpop.xlane.xlu0 %3676 }
 0x7c8   :  { %v3680_v45 = vpop.xlane.xlu1 %3679 }
 0x7cb   :  { %v3697_v51 = vpop.xlane.xlu0 %3696 }
 0x7cc   :  { %v3700_v0 = vpop.xlane.xlu1 %3699 }
 0x7d3   :  { %v3813_v50 = vpop.xlane.xlu1 %3812 }
 0x7d4   :  { %v3810_v47 = vpop.xlane.xlu0 %3809  ;;  %v3821_v40 = vadd.f32 %v3813_v50, %v3674_v39 }
 0x7d5   :  { %v3820_v60 = vadd.f32 %v3810_v47, %v3671_v38  ;;  %v64_v47 = vld [vmem:[%s7340_s7 + $0x70] sm:$0xff] }
 0x7d7   :  { %v3833_v37 = vpop.xlane.xlu1 %3832 }
 0x7d8   :  { %v3830_v54 = vpop.xlane.xlu0 %3829  ;;  %v3841_v2 = vadd.f32 %v3833_v37, %v3694_v33  ;;  %v63_v37 = vld [vmem:[%s7340_s7 + $0x68] sm:$0xff] }
 0x7d9   :  { %v3840_v5 = vadd.f32 %v3830_v54, %v3691_v44 }
 0x7db   :  { %v3819_v48 = vpop.xlane.xlu1 %3818 }
 0x7dc   :  { %v3816_v53 = vpop.xlane.xlu0 %3815  ;;  %v3823_v16 = vadd.f32 %v3819_v48, %v3680_v45 }
 0x7dd   :  { %v3822_v15 = vadd.f32 %v3816_v53, %v3677_v49 }
 0x7df   :  { %v3839_v58 = vpop.xlane.xlu1 %3838 }
 0x7e0   :  { %v3836_v59 = vpop.xlane.xlu0 %3835  ;;  %v3843_v28 = vadd.f32 %v3839_v58, %v3700_v0 }
 0x7e1   :  { %v3842_v32 = vadd.f32 %v3836_v59, %v3697_v51  ;;  %v68_v59 = vld [vmem:[%s7340_s7 + $0x90] sm:$0xff] }
 0x7e7   :  { %v3950_v56 = vpop.xlane.xlu1 %3949 }
 0x7e8   :  { %v3958_v10 = vadd.f32 %v3950_v56, %v3821_v40  ;;  %v3947_v63 = vpop.xlane.xlu0 %3946  ;;  %v67_v40 = vld [vmem:[%s7340_s7 + $0x88] sm:$0xff] }
 0x7e9   :  { %v3957_v1 = vadd.f32 %v3947_v63, %v3820_v60 }
 0x7ea   :  { %v3983_v6 = vmul.f32 0.013888889, %v3958_v10 }
 0x7eb   :  { %v3982_v26 = vmul.f32 0.013888889, %v3957_v1  ;;  %v3970_v11 = vpop.xlane.xlu1 %3969  ;;  %v66_v1 = vld [vmem:[%s7340_s7 + $0x80] sm:$0xff] }
 0x7ec   :  { %v3978_v12 = vadd.f32 %v3970_v11, %v3841_v2  ;;  %v3967_v34 = vpop.xlane.xlu0 %3966  ;;  %v3991_v41 = vmul.f32 %v3983_v6, %v3983_v6  ;;  %v65_v2 = vld [vmem:[%s7340_s7 + $0x78] sm:$0xff] }
 0x7ed   :  { %v3977_v23 = vadd.f32 %v3967_v34, %v3840_v5  ;;  %v3990_v14 = vmul.f32 %v3982_v26, %v3982_v26 }
 0x7ee   :  { %v3987_v3 = vmul.f32 0.013888889, %v3978_v12 }
 0x7ef   :  { %v3986_v29 = vmul.f32 0.013888889, %v3977_v23  ;;  %v3956_v43 = vpop.xlane.xlu1 %3955 }
 0x7f0   :  { %v3995_v19 = vsub.f32 %v3987_v3, %v3991_v41  ;;  %v3960_v35 = vadd.f32 %v3956_v43, %v3823_v16  ;;  %v3953_v17 = vpop.xlane.xlu0 %3952  ;;  %v5954_v3 = vmov 0.0|0.0   ;;  %v4031_v43 = vmul.f32 0.33333334, %v6900_v55 }
 0x7f1   :  { %v3994_v9 = vsub.f32 %v3986_v29, %v3990_v14  ;;  %v3959_v31 = vadd.f32 %v3953_v17, %v3822_v15  ;;  %5735 = vmatprep.subr.bf16.mxu1 %v5954_v3 }
 0x7f2   :  { %v3999_v46 = vmax.f32 %v3995_v19, 0.0  ;;  %v3985_v25 = vmul.f32 0.013888889, %v3960_v35  ;;  %v4030_v19 = vmul.f32 0.33333334, %v6903_v62 }
 0x7f3   :  { %v3998_v20 = vmax.f32 %v3994_v9, 0.0  ;;  %v3984_v52 = vmul.f32 0.013888889, %v3959_v31  ;;  %v3976_v21 = vpop.xlane.xlu1 %3975 }
 0x7f4   :  { %v4003_v24 = vadd.f32 1e-05, %v3999_v46  ;;  %v3980_v42 = vadd.f32 %v3976_v21, %v3843_v28  ;;  %v3973_v27 = vpop.xlane.xlu0 %3972  ;;  %v3993_v36 = vmul.f32 %v3985_v25, %v3985_v25  ;;  %v4033_v21 = vmul.f32 0.33333334, %v6908_v22 }
 0x7f5   :  { %v4002_v18 = vadd.f32 1e-05, %v3998_v20  ;;  %v3979_v30 = vadd.f32 %v3973_v27, %v3842_v32  ;;  %v3992_v38 = vmul.f32 %v3984_v52, %v3984_v52 }
 0x7f6   :  { %5892 = vrsqrt.f32 %v4003_v24  ;;  %v3989_v39 = vmul.f32 0.013888889, %v3980_v42  ;;  %v4032_v24 = vmul.f32 0.33333334, %v6911_v61 }
 0x7f7   :  { %5894 = vrsqrt.f32 %v4002_v18  ;;  %v3988_v44 = vmul.f32 0.013888889, %v3979_v30 }
 0x7f8   :  { %v3997_v33 = vsub.f32 %v3989_v39, %v3993_v36 }
 0x7f9   :  { %v3996_v45 = vsub.f32 %v3988_v44, %v3992_v38 }
 0x7fa   :  { %v4001_v49 = vmax.f32 %v3997_v33, 0.0  ;;  %v73_v33 = vld [vmem:[%s7340_s7 + $0xb8] sm:$0xff] }
 0x7fb   :  { %v4000_v0 = vmax.f32 %v3996_v45, 0.0  ;;  %v75_v45 = vld [vmem:[%s7340_s7 + $0xc8] sm:$0xff] }
 0x7fc   :  { %v4005_v50 = vadd.f32 1e-05, %v4001_v49  ;;  %v72_v49 = vld [vmem:[%s7340_s7 + $0xb0] sm:$0xff] }
 0x7fd   :  { %v4004_v51 = vadd.f32 1e-05, %v4000_v0  ;;  %v77_v0 = vld [vmem:[%s7340_s7 + $0xd8] sm:$0xff] }
 0x7fe   :  { %5896 = vrsqrt.f32 %v4005_v50  ;;  %v74_v50 = vld [vmem:[%s7340_s7 + $0xc0] sm:$0xff] }
 0x7ff   :  { %5898 = vrsqrt.f32 %v4004_v51  ;;  %v4175_v51 = vld [vmem:[%s7337_s4 + $0x8] sm:$0xff] }
 0x800   :  { %v5893_v54 = vpop.eup %5892  ;;  %5050 = vmatprep.mubr.msk.f32.mxu1 %vm4230_vm3, %v4175_v51 }
 0x801   :  { %v5895_v48 = vpop.eup %5894  ;;  %v4011_v53 = vmul.f32 %v5893_v54, %v64_v47  ;;  %v76_v47 = vld [vmem:[%s7340_s7 + $0xd0] sm:$0xff] }
 0x802   :  { %v4010_v58 = vmul.f32 %v5895_v48, %v63_v37  ;;  %v78_v37 = vld [vmem:[%s7340_s7 + $0xe0] sm:$0xff] }
 0x803   :  { %4041 = vperm.xlu1 %5809, %v4011_v53   ;;  %v4015_v60 = vmul.f32 %v4011_v53, %v3983_v6  ;;  %v70_v6 = vld [vmem:[%s7340_s7 + $0xa0] sm:$0xff] }
 0x804   :  { %4036 = vperm.xlu0 %5810, %v4010_v58   ;;  %v4014_v56 = vmul.f32 %v4010_v58, %v3982_v26  ;;  %v69_v26 = vld [vmem:[%s7340_s7 + $0x98] sm:$0xff] }
 0x805   :  { %v4019_v10 = vsub.f32 %v68_v59, %v4015_v60 }
 0x806   :  { %v4018_v63 = vsub.f32 %v67_v40, %v4014_v56 }
 0x808   :  { %v5897_v5 = vpop.eup %5896  ;;  %4060 = vperm.xlu1 %5809, %v4018_v63   ;;  %4065 = vperm.xlu0 %5810, %v4019_v10  }
 0x809   :  { %v5899_v11 = vpop.eup %5898  ;;  %v4013_v12 = vmul.f32 %v5897_v5, %v66_v1 }
 0x80a   :  { %v4012_v34 = vmul.f32 %v5899_v11, %v65_v2 }
 0x80b   :  { %v4017_v23 = vmul.f32 %v4013_v12, %v3985_v25 }
 0x80c   :  { %4046 = vperm.xlu1 %5809, %v4012_v34   ;;  %4051 = vperm.xlu0 %5810, %v4013_v12   ;;  %v4016_v16 = vmul.f32 %v4012_v34, %v3984_v52 }
 0x80d   :  { %v4021_v41 = vsub.f32 %v70_v6, %v4017_v23 }
 0x80e   :  { %v4020_v15 = vsub.f32 %v69_v26, %v4016_v16 }
 0x810   :  { %4070 = vperm.xlu1 %5809, %v4020_v15   ;;  %4075 = vperm.xlu0 %5810, %v4021_v41  }
 0x882   :  { %v4042_v14 = vpop.permute.xlu1 %4041 }
 0x883   :  { %v4037_v29 = vpop.permute.xlu0 %4036  ;;  %v4055_v35 = vmul.f32 %v4042_v14, %v4031_v43 }
 0x884   :  { %v4054_v17 = vmul.f32 %v4037_v29, %v4030_v19 }
 0x887   :  { %v4066_v9 = vpop.permute.xlu0 %4065  ;;  %v4061_v31 = vpop.permute.xlu1 %4060 }
 0x888   :  { %v4079_v28 = vadd.f32 %v4066_v9, %v4055_v35  ;;  %v4078_v46 = vadd.f32 %v4061_v31, %v4054_v17 }
 0x88a   :  { %v4083_v25 = vmul.f32 %v6267_v13, %v4079_v28  ;;  %v4082_v32 = vmul.f32 %v6267_v13, %v4078_v46 }
 0x88b   :  { %v4052_v20 = vpop.permute.xlu0 %4051  ;;  %v4047_v52 = vpop.permute.xlu1 %4046 }
 0x88c   :  { %v5836_v42 = vpack.i.bf16 %v4083_v25, %v4082_v32  ;;  %v5736_v55 = vpack.c.bf16 %v4083_v25, %v4082_v32  ;;  %v4057_v27 = vmul.f32 %v4052_v20, %v4033_v21  ;;  %v4056_v62 = vmul.f32 %v4047_v52, %v4032_v24 }
 0x88e   :  { %5837 = vrot.lane.b32.xlu1 %v5836_v42, %s5948_s9  ;;  %5737 = vmatpush1.bf16.msra.mxu1 %v5736_v55  ;;  %v4174_v55 = vld [vmem:[%s7337_s4] sm:$0xff] }
 0x88f   :  { %v4076_v18 = vpop.permute.xlu0 %4075  ;;  %v4071_v30 = vpop.permute.xlu1 %4070  ;;  %5738 = vmatprep.subr.bf16.mxu1 %v5954_v3 }
 0x890   :  { %v4081_v36 = vadd.f32 %v4076_v18, %v4057_v27  ;;  %v4080_v39 = vadd.f32 %v4071_v30, %v4056_v62  ;;  %v4177_v27 = vld [vmem:[%s7337_s4 + $0x18] sm:$0xff]  ;;  %v4176_v62 = vld [vmem:[%s7337_s4 + $0x10] sm:$0xff]  ;;  %v4178_v18 = vld [vmem:[%s7337_s4 + $0x20] sm:$0xff] }
 0x891   :  { %v4181_v30 = vld [vmem:[%s7337_s4 + $0x38] sm:$0xff] }
 0x892   :  { %v4085_v38 = vmul.f32 %v6267_v13, %v4081_v36  ;;  %v4084_v44 = vmul.f32 %v6267_v13, %v4080_v39  ;;  %5847 = vrot.lane.b32.xlu1 %v5836_v42, %s5955_s10  ;;  %v71_v13 = vld [vmem:[%s7340_s7 + $0xa8] sm:$0xff]  ;;  %v4180_v36 = vld [vmem:[%s7337_s4 + $0x30] sm:$0xff] }
 0x893   :  { %v4183_v39 = vld [vmem:[%s7337_s4 + $0x48] sm:$0xff] }
 0x894   :  { %v5841_v22 = vpack.i.bf16 %v4085_v38, %v4084_v44  ;;  %v5739_v61 = vpack.c.bf16 %v4085_v38, %v4084_v44  ;;  %v4182_v38 = vld [vmem:[%s7337_s4 + $0x40] sm:$0xff]  ;;  %v4185_v44 = vld [vmem:[%s7337_s4 + $0x58] sm:$0xff] }
 0x896   :  { %5857 = vrot.lane.b32.xlu1 %v5836_v42, %s5956_s21  ;;  %5842 = vrot.lane.b32.xlu0 %v5841_v22, %s5948_s9 }
 0x897   :  { %5740 = vmatpush1.bf16.msra.mxu1 %v5739_v61  ;;  %v4187_v61 = vld [vmem:[%s7337_s4 + $0x68] sm:$0xff] }
 0x898   :  { %5741 = vmatprep.subr.bf16.mxu1 %v5954_v3 }
 0x89a   :  { %5867 = vrot.lane.b32.xlu1 %v5836_v42, %s5957_s22  ;;  %5852 = vrot.lane.b32.xlu0 %v5841_v22, %s5955_s10 }
 0x89e   :  { %5877 = vrot.lane.b32.xlu1 %v5836_v42, %s5958_s23  ;;  %5862 = vrot.lane.b32.xlu0 %v5841_v22, %s5956_s21 }
 0x8a2   :  { %4192 = vperm.xlu1 %5809, %v71_v13   ;;  %5872 = vrot.lane.b32.xlu0 %v5841_v22, %s5957_s22  ;;  %v4186_v13 = vld [vmem:[%s7337_s4 + $0x60] sm:$0xff] }
 0x8a6   :  { %4202 = vperm.xlu1 %5809, %v73_v33   ;;  %5882 = vrot.lane.b32.xlu0 %v5841_v22, %s5958_s23  ;;  %v4184_v22 = vld [vmem:[%s7337_s4 + $0x50] sm:$0xff]  ;;  %v4189_v33 = vld [vmem:[%s7337_s4 + $0x78] sm:$0xff] }
 0x8aa   :  { %4212 = vperm.xlu1 %5809, %v75_v45   ;;  %4197 = vperm.xlu0 %5810, %v72_v49   ;;  %v4188_v45 = vld [vmem:[%s7337_s4 + $0x70] sm:$0xff] }
 0x8ae   :  { %4222 = vperm.xlu1 %5809, %v77_v0   ;;  %4207 = vperm.xlu0 %5810, %v74_v50  }
 0x8b2   :  { %4217 = vperm.xlu0 %5810, %v76_v47   ;;  %v7052_v47 = vsel %vm47_vm13, 1.0, %v5950_v4 }
 0x8b6   :  { %4227 = vperm.xlu0 %5810, %v78_v37  }
 0x900   :  { %v5838_v54 = vpop.permute.xlu1 %5837 }
 0x901   :  { %v5840_v48 = vunpack.i.h.bf16 %v5838_v54  ;;  %v5839_v53 = vunpack.i.l.bf16 %v5838_v54 }
 0x903   :  { %v5742_v58 = vpack.c.bf16 %v5840_v48, %v5839_v53 }
 0x904   :  { %v5848_v59 = vpop.permute.xlu1 %5847 }
 0x905   :  { %5744 = vmatpush1.bf16.msk.msra.mxu1 %vm6823_vm2, %v5742_v58  ;;  %v5850_v10 = vunpack.i.h.bf16 %v5848_v59  ;;  %v5849_v63 = vunpack.i.l.bf16 %v5848_v59 }
 0x906   :  { %5745 = vmatprep.subr.bf16.mxu1 %v5954_v3 }
 0x907   :  { %v5750_v5 = vpack.c.bf16 %v5850_v10, %v5849_v63 }
 0x908   :  { %v5843_v40 = vpop.permute.xlu0 %5842  ;;  %v5858_v34 = vpop.permute.xlu1 %5857 }
 0x909   :  { %v5845_v60 = vunpack.i.h.bf16 %v5843_v40  ;;  %v5844_v56 = vunpack.i.l.bf16 %v5843_v40  ;;  %v5860_v6 = vunpack.i.h.bf16 %v5858_v34  ;;  %v5859_v26 = vunpack.i.l.bf16 %v5858_v34 }
 0x90b   :  { %v5746_v1 = vpack.c.bf16 %v5845_v60, %v5844_v56  ;;  %v5758_v57 = vpack.c.bf16 %v5860_v6, %v5859_v26 }
 0x90c   :  { %v5853_v2 = vpop.permute.xlu0 %5852  ;;  %v5868_v14 = vpop.permute.xlu1 %5867 }
 0x90d   :  { %5748 = vmatpush1.bf16.msk.msra.mxu1 %vm6823_vm2, %v5746_v1  ;;  %v5855_v11 = vunpack.i.h.bf16 %v5853_v2  ;;  %v5854_v12 = vunpack.i.l.bf16 %v5853_v2  ;;  %v5870_v29 = vunpack.i.h.bf16 %v5868_v14  ;;  %v5869_v43 = vunpack.i.l.bf16 %v5868_v14 }
 0x90e   :  { %5749 = vmatprep.subr.bf16.mxu1 %v5954_v3 }
 0x90f   :  { %v5754_v23 = vpack.c.bf16 %v5855_v11, %v5854_v12  ;;  %v5766_v17 = vpack.c.bf16 %v5870_v29, %v5869_v43 }
 0x910   :  { %v5863_v16 = vpop.permute.xlu0 %5862  ;;  %v5878_v28 = vpop.permute.xlu1 %5877 }
 0x911   :  { %5752 = vmatpush1.bf16.msk.msra.mxu1 %vm5751_vm5, %v5750_v5  ;;  %v5865_v41 = vunpack.i.h.bf16 %v5863_v16  ;;  %v5864_v15 = vunpack.i.l.bf16 %v5863_v16  ;;  %v5880_v46 = vunpack.i.h.bf16 %v5878_v28  ;;  %v5879_v25 = vunpack.i.l.bf16 %v5878_v28 }
 0x912   :  { %5753 = vmatprep.subr.bf16.mxu1 %v5954_v3 }
 0x913   :  { %v5762_v19 = vpack.c.bf16 %v5865_v41, %v5864_v15  ;;  %v5774_v52 = vpack.c.bf16 %v5880_v46, %v5879_v25 }
 0x914   :  { %v5873_v35 = vpop.permute.xlu0 %5872 }
 0x915   :  { %5756 = vmatpush1.bf16.msk.msra.mxu1 %vm5751_vm5, %v5754_v23  ;;  %v5875_v9 = vunpack.i.h.bf16 %v5873_v35  ;;  %v5874_v31 = vunpack.i.l.bf16 %v5873_v35 }
 0x916   :  { %5757 = vmatprep.subr.bf16.mxu1 %v5954_v3 }
 0x917   :  { %v5770_v32 = vpack.c.bf16 %v5875_v9, %v5874_v31 }
 0x918   :  { %v5883_v20 = vpop.permute.xlu0 %5882 }
 0x919   :  { %5760 = vmatpush1.bf16.msk.msra.mxu1 %vm5759_vm7, %v5758_v57  ;;  %v5885_v21 = vunpack.i.h.bf16 %v5883_v20  ;;  %v5884_v24 = vunpack.i.l.bf16 %v5883_v20 }
 0x91a   :  { %5761 = vmatprep.subr.bf16.mxu1 %v5954_v3 }
 0x91b   :  { %v5778_v42 = vpack.c.bf16 %v5885_v21, %v5884_v24 }
 0x91d   :  { %5764 = vmatpush1.bf16.msk.msra.mxu1 %vm5759_vm7, %v5762_v19 }
 0x91e   :  { %5765 = vmatprep.subr.bf16.mxu1 %v5954_v3 }
 0x921   :  { %5768 = vmatpush1.bf16.msk.msra.mxu1 %vm5767_vm9, %v5766_v17  ;;  %v4193_v49 = vpop.permute.xlu1 %4192 }
 0x922   :  { %5769 = vmatprep.subr.bf16.mxu1 %v5954_v3 }
 0x925   :  { %5772 = vmatpush1.bf16.msk.msra.mxu1 %vm5767_vm9, %v5770_v32  ;;  %v4203_v60 = vpop.permute.xlu1 %4202 }
 0x926   :  { %5773 = vmatprep.subr.bf16.mxu1 %v5954_v3 }
 0x929   :  { %5776 = vmatpush1.bf16.msk.msra.mxu1 %vm5775_vm12, %v5774_v52  ;;  %v4198_v54 = vpop.permute.xlu0 %4197  ;;  %v4213_v41 = vpop.permute.xlu1 %4212 }
 0x92a   :  { %5777 = vmatprep.subr.bf16.mxu1 %v5954_v3  ;;  %v4179_v3 = vld [vmem:[%s7337_s4 + $0x28] sm:$0xff] }
 0x92d   :  { %5780 = vmatpush1.bf16.msk.msra.mxu1 %vm5775_vm12, %v5778_v42  ;;  %v4208_v11 = vpop.permute.xlu0 %4207  ;;  %v4223_v42 = vpop.permute.xlu1 %4222 }
 0x930   :  { %4320 = vmatmul.mubr.f32.vlgmr.msra.gmra.mrb[36].mxu1 %v4174_v55 }
 0x931   :  { %5051 = vmatprep.mubr.msk.f32.mxu1 %vm4230_vm3, %v4177_v27  ;;  %v4218_v28 = vpop.permute.xlu0 %4217 }
 0x934   :  { %4325 = vmatmul.mubr.f32.gmra.mrb[38].mxu1 %v4176_v62 }
 0x935   :  { %5052 = vmatprep.mubr.msk.f32.mxu1 %vm4230_vm3, %v4179_v3 }
 0x938   :  { %4330 = vmatmul.mubr.f32.gmra.mrb[40].mxu1 %v4178_v18 }
 0x939   :  { %5053 = vmatprep.mubr.msk.f32.mxu1 %vm4230_vm3, %v4181_v30 }
 0x93c   :  { %4335 = vmatmul.mubr.f32.gmra.mrb[42].mxu1 %v4180_v36 }
 0x93d   :  { %5054 = vmatprep.mubr.msk.f32.mxu1 %vm4230_vm3, %v4183_v39 }
 0x940   :  { %4340 = vmatmul.mubr.f32.gmra.mrb[44].mxu1 %v4182_v38 }
 0x941   :  { %5055 = vmatprep.mubr.msk.f32.mxu1 %vm4230_vm3, %v4185_v44  ;;  %v4228_v44 = vpop.permute.xlu0 %4227 }
 0x944   :  { %4345 = vmatmul.mubr.f32.gmra.mrb[46].mxu1 %v4184_v22 }
 0x945   :  { %5056 = vmatprep.mubr.msk.f32.mxu1 %vm4230_vm3, %v4187_v61 }
 0x948   :  { %4350 = vmatmul.mubr.f32.gmra.mrb[48].mxu1 %v4186_v13 }
 0x949   :  { %5057 = vmatprep.mubr.msk.f32.mxu1 %vm4230_vm3, %v4189_v33 }
 0x94c   :  { %4355 = vmatmul.mubr.f32.gmra.mrb[50].mxu1 %v4188_v45 }
 0xa03   :  { %v4321_v0 = vpop.f32.mrb[36].mxu1 }
 0xa04   :  { %v7049_v50 = vadd.f32 %v4321_v0, %v4193_v49  ;;  %v4323_v51 = vpop.f32.mrb[37].mxu1 }
 0xa06   :  { %v4360_v37 = vmax.f32 %v7049_v50, 0.0 }
 0xa07   :  { %v4326_v48 = vpop.f32.mrb[38].mxu1 }
 0xa08   :  { %v4368_v53 = vmul.f32 %v7052_v47, %v4360_v37  ;;  %v7058_v58 = vadd.f32 %v4326_v48, %v4198_v54  ;;  %v4328_v7 = vpop.f32.mrb[39].mxu1 }
 0xa0a   :  { %v4361_v8 = vmax.f32 %v7058_v58, 0.0  ;;  %v4376_v59 = vsel %vm224_vm10, %v4368_v53, 0.0  ;;  %v4409_v40 = vmul.f32 %v4368_v53, %v4368_v53 }
 0xa0b   :  { %v4331_v56 = vpop.f32.mrb[40].mxu1  ;;  %4377 = vadd.xlane.f32.xlu1 %v4376_v59 }
 0xa0c   :  { %v4369_v4 = vmul.f32 %v7052_v47, %v4361_v8  ;;  %v7065_v10 = vadd.f32 %v4331_v56, %v4203_v60  ;;  %v4333_v63 = vpop.f32.mrb[41].mxu1  ;;  %v4417_v1 = vsel %vm224_vm10, %v4409_v40, 0.0 }
 0xa0d   :  { %4418 = vadd.xlane.f32.xlu0 %v4417_v1 }
 0xa0e   :  { %v4362_v2 = vmax.f32 %v7065_v10, 0.0  ;;  %v4410_v5 = vmul.f32 %v4369_v4, %v4369_v4  ;;  %v4379_v23 = vsel %vm224_vm10, %v4369_v4, 0.0 }
 0xa0f   :  { %v4336_v12 = vpop.f32.mrb[42].mxu1 }
 0xa10   :  { %v4370_v34 = vmul.f32 %v7052_v47, %v4362_v2  ;;  %v7072_v6 = vadd.f32 %v4336_v12, %v4208_v11  ;;  %v4338_v26 = vpop.f32.mrb[43].mxu1  ;;  %v4420_v16 = vsel %vm224_vm10, %v4410_v5, 0.0 }
 0xa11   :  { %4380 = vadd.xlane.f32.xlu0 %v4379_v23  ;;  %4421 = vadd.xlane.f32.xlu1 %v4420_v16 }
 0xa12   :  { %v4363_v57 = vmax.f32 %v7072_v6, 0.0  ;;  %v4382_v19 = vsel %vm224_vm10, %v4370_v34, 0.0  ;;  %v4411_v35 = vmul.f32 %v4370_v34, %v4370_v34 }
 0xa13   :  { %v4341_v15 = vpop.f32.mrb[44].mxu1 }
 0xa14   :  { %v4371_v14 = vmul.f32 %v7052_v47, %v4363_v57  ;;  %v7080_v29 = vadd.f32 %v4341_v15, %v4213_v41  ;;  %v4343_v43 = vpop.f32.mrb[45].mxu1  ;;  %v4423_v52 = vsel %vm224_vm10, %v4411_v35, 0.0 }
 0xa15   :  { %4383 = vadd.xlane.f32.xlu0 %v4382_v19 }
 0xa16   :  { %v4364_v17 = vmax.f32 %v7080_v29, 0.0  ;;  %v4385_v9 = vsel %vm224_vm10, %v4371_v14, 0.0  ;;  %v4412_v31 = vmul.f32 %v4371_v14, %v4371_v14 }
 0xa17   :  { %v4346_v46 = vpop.f32.mrb[46].mxu1  ;;  %4386 = vadd.xlane.f32.xlu1 %v4385_v9 }
 0xa18   :  { %v4372_v25 = vmul.f32 %v7052_v47, %v4364_v17  ;;  %v7088_v32 = vadd.f32 %v4346_v46, %v4218_v28  ;;  %v4348_v20 = vpop.f32.mrb[47].mxu1  ;;  %v4426_v24 = vsel %vm224_vm10, %v4412_v31, 0.0 }
 0xa19   :  { %4424 = vadd.xlane.f32.xlu0 %v4423_v52 }
 0xa1a   :  { %v4365_v21 = vmax.f32 %v7088_v32, 0.0  ;;  %v4388_v18 = vsel %vm224_vm10, %v4372_v25, 0.0  ;;  %v4413_v30 = vmul.f32 %v4372_v25, %v4372_v25 }
 0xa1b   :  { %v4351_v55 = vpop.f32.mrb[48].mxu1  ;;  %4427 = vadd.xlane.f32.xlu1 %v4426_v24 }
 0xa1c   :  { %v4373_v27 = vmul.f32 %v7052_v47, %v4365_v21  ;;  %v7096_v62 = vadd.f32 %v4351_v55, %v4223_v42  ;;  %v4353_v3 = vpop.f32.mrb[49].mxu1  ;;  %v4429_v45 = vsel %vm224_vm10, %v4413_v30, 0.0  ;;  %v79_v30 = vld [vmem:[%s7340_s7 + $0xe8] sm:$0xff] }
 0xa1d   :  { %4389 = vadd.xlane.f32.xlu0 %v4388_v18 }
 0xa1e   :  { %v4366_v36 = vmax.f32 %v7096_v62, 0.0  ;;  %v4391_v39 = vsel %vm224_vm10, %v4373_v27, 0.0  ;;  %v4414_v38 = vmul.f32 %v4373_v27, %v4373_v27  ;;  %v4612_v62 = vld [vmem:[%s7338_s5 + $0x18] sm:$0xff] }
 0xa1f   :  { %v4356_v22 = vpop.f32.mrb[50].mxu1  ;;  %4392 = vadd.xlane.f32.xlu1 %v4391_v39 }
 0xa20   :  { %v4374_v61 = vmul.f32 %v7052_v47, %v4366_v36  ;;  %v7104_v13 = vadd.f32 %v4356_v22, %v4228_v44  ;;  %v4358_v33 = vpop.f32.mrb[51].mxu1  ;;  %v4432_v0 = vsel %vm224_vm10, %v4414_v38, 0.0 }
 0xa21   :  { %4430 = vadd.xlane.f32.xlu0 %v4429_v45 }
 0xa22   :  { %v4367_v49 = vmax.f32 %v7104_v13, 0.0  ;;  %v4394_v54 = vsel %vm224_vm10, %v4374_v61, 0.0  ;;  %v4415_v48 = vmul.f32 %v4374_v61, %v4374_v61 }
 0xa23   :  { %4433 = vadd.xlane.f32.xlu1 %v4432_v0 }
 0xa24   :  { %v4375_v51 = vmul.f32 %v7052_v47, %v4367_v49  ;;  %v4435_v59 = vsel %vm224_vm10, %v4415_v48, 0.0 }
 0xa25   :  { %4395 = vadd.xlane.f32.xlu0 %v4394_v54 }
 0xa26   :  { %v4397_v53 = vsel %vm224_vm10, %v4375_v51, 0.0  ;;  %v4416_v7 = vmul.f32 %v4375_v51, %v4375_v51 }
 0xa27   :  { %4398 = vadd.xlane.f32.xlu1 %v4397_v53 }
 0xa28   :  { %v4438_v40 = vsel %vm224_vm10, %v4416_v7, 0.0 }
 0xa29   :  { %4436 = vadd.xlane.f32.xlu0 %v4435_v59 }
 0xa2b   :  { %4439 = vadd.xlane.f32.xlu1 %v4438_v40  ;;  %v80_v40 = vld [vmem:[%s7340_s7 + $0xf0] sm:$0xff] }
 0xa98   :  { %v4378_v60 = vpop.xlane.xlu1 %4377 }
 0xa99   :  { %v4401_v56 = vmul.f32 0.25, %v4378_v60 }
 0xa9a   :  { %v4419_v4 = vpop.xlane.xlu0 %4418 }
 0xa9b   :  { %v4449_v63 = vmul.f32 %v4401_v56, %v4401_v56  ;;  %v4441_v1 = vmul.f32 0.25, %v4419_v4 }
 0xa9d   :  { %v4457_v5 = vsub.f32 %v4441_v1, %v4449_v63 }
 0xa9e   :  { %v4381_v11 = vpop.xlane.xlu0 %4380  ;;  %v4422_v12 = vpop.xlane.xlu1 %4421 }
 0xa9f   :  { %v4465_v34 = vmax.f32 %v4457_v5, 0.0  ;;  %v4402_v26 = vmul.f32 0.25, %v4381_v11  ;;  %v4442_v41 = vmul.f32 0.25, %v4422_v12 }
 0xaa1   :  { %v4473_v23 = vadd.f32 1e-05, %v4465_v34  ;;  %v4450_v16 = vmul.f32 %v4402_v26, %v4402_v26 }
 0xaa2   :  { %v4384_v15 = vpop.xlane.xlu0 %4383 }
 0xaa3   :  { %5900 = vrsqrt.f32 %v4473_v23  ;;  %v4458_v14 = vsub.f32 %v4442_v41, %v4450_v16  ;;  %v7116_v43 = vmul.f32 0.25, %v4384_v15  ;;  %v87_v15 = vld [vmem:[%s7340_s7 + $0x128] sm:$0xff] }
 0xaa4   :  { %v4387_v19 = vpop.xlane.xlu1 %4386 }
 0xaa5   :  { %v4466_v35 = vmax.f32 %v4458_v14, 0.0  ;;  %v7118_v9 = vmul.f32 0.25, %v4387_v19  ;;  %v4451_v46 = vmul.f32 %v7116_v43, %v7116_v43  ;;  %v88_v14 = vld [vmem:[%s7340_s7 + $0x130] sm:$0xff] }
 0xaa6   :  { %v4425_v31 = vpop.xlane.xlu0 %4424 }
 0xaa7   :  { %v4474_v28 = vadd.f32 1e-05, %v4466_v35  ;;  %v4443_v25 = vmul.f32 0.25, %v4425_v31  ;;  %v4452_v52 = vmul.f32 %v7118_v9, %v7118_v9 }
 0xaa8   :  { %v4428_v20 = vpop.xlane.xlu1 %4427 }
 0xaa9   :  { %5902 = vrsqrt.f32 %v4474_v28  ;;  %v4459_v24 = vsub.f32 %v4443_v25, %v4451_v46  ;;  %v4444_v42 = vmul.f32 0.25, %v4428_v20  ;;  %v81_v46 = vld [vmem:[%s7340_s7 + $0xf8] sm:$0xff] }
 0xaaa   :  { %v4390_v55 = vpop.xlane.xlu0 %4389 }
 0xaab   :  { %v4467_v27 = vmax.f32 %v4459_v24, 0.0  ;;  %v4460_v3 = vsub.f32 %v4444_v42, %v4452_v52  ;;  %v7124_v18 = vmul.f32 0.25, %v4390_v55 }
 0xaac   :  { %v4393_v39 = vpop.xlane.xlu1 %4392 }
 0xaad   :  { %v5901_v38 = vpop.eup %5900  ;;  %v4475_v44 = vadd.f32 1e-05, %v4467_v27  ;;  %v4468_v22 = vmax.f32 %v4460_v3, 0.0  ;;  %v7129_v61 = vmul.f32 0.25, %v4393_v39  ;;  %v4453_v51 = vmul.f32 %v7124_v18, %v7124_v18  ;;  %v82_v27 = vld [vmem:[%s7340_s7 + $0x100] sm:$0xff] }
 0xaae   :  { %v4431_v33 = vpop.xlane.xlu0 %4430  ;;  %v4489_v45 = vmul.f32 %v5901_v38, %v79_v30 }
 0xaaf   :  { %5904 = vrsqrt.f32 %v4475_v44  ;;  %v4476_v0 = vadd.f32 1e-05, %v4468_v22  ;;  %v4445_v54 = vmul.f32 0.25, %v4431_v33  ;;  %v4454_v53 = vmul.f32 %v7129_v61, %v7129_v61 }
 0xab0   :  { %4499 = vperm.xlu0 %5810, %v4489_v45   ;;  %v4434_v48 = vpop.xlane.xlu1 %4433  ;;  %v4545_v34 = vmul.f32 %v4489_v45, %v4401_v56 }
 0xab1   :  { %5906 = vrsqrt.f32 %v4476_v0  ;;  %v4461_v7 = vsub.f32 %v4445_v54, %v4453_v51  ;;  %v4446_v59 = vmul.f32 0.25, %v4434_v48  ;;  %v89_v0 = vld [vmem:[%s7340_s7 + $0x138] sm:$0xff]  ;;  %v90_v51 = vld [vmem:[%s7340_s7 + $0x140] sm:$0xff] }
 0xab2   :  { %v4396_v60 = vpop.xlane.xlu0 %4395  ;;  %v4553_v20 = vsub.f32 %v87_v15, %v4545_v34  ;;  %v85_v34 = vld [vmem:[%s7340_s7 + $0x118] sm:$0xff] }
 0xab3   :  { %v5903_v4 = vpop.eup %5902  ;;  %v4469_v63 = vmax.f32 %v4461_v7, 0.0  ;;  %v4462_v1 = vsub.f32 %v4446_v59, %v4454_v53  ;;  %v7138_v5 = vmul.f32 0.25, %v4396_v60 }
 0xab4   :  { %v4399_v11 = vpop.xlane.xlu1 %4398  ;;  %v4490_v12 = vmul.f32 %v5903_v4, %v80_v40  ;;  %v84_v40 = vld [vmem:[%s7340_s7 + $0x110] sm:$0xff] }
 0xab5   :  { %v4477_v23 = vadd.f32 1e-05, %v4469_v63  ;;  %v4470_v16 = vmax.f32 %v4462_v1, 0.0  ;;  %v7140_v41 = vmul.f32 0.25, %v4399_v11  ;;  %v4455_v56 = vmul.f32 %v7138_v5, %v7138_v5  ;;  %v91_v1 = vld [vmem:[%s7340_s7 + $0x148] sm:$0xff]  ;;  %v92_v11 = vld [vmem:[%s7340_s7 + $0x150] sm:$0xff] }
 0xab6   :  { %v4437_v19 = vpop.xlane.xlu0 %4436  ;;  %4504 = vperm.xlu1 %5809, %v4490_v12   ;;  %v4546_v35 = vmul.f32 %v4490_v12, %v4402_v26 }
 0xab7   :  { %5908 = vrsqrt.f32 %v4477_v23  ;;  %v4478_v31 = vadd.f32 1e-05, %v4470_v16  ;;  %v4447_v28 = vmul.f32 0.25, %v4437_v19  ;;  %v4456_v42 = vmul.f32 %v7140_v41, %v7140_v41 }
 0xab8   :  { %v4440_v25 = vpop.xlane.xlu1 %4439  ;;  %v4554_v52 = vsub.f32 %v88_v14, %v4546_v35 }
 0xab9   :  { %v5905_v24 = vpop.eup %5904  ;;  %5910 = vrsqrt.f32 %v4478_v31  ;;  %v4463_v55 = vsub.f32 %v4447_v28, %v4455_v56  ;;  %v4448_v26 = vmul.f32 0.25, %v4440_v25  ;;  %v94_v56 = vld [vmem:[%s7340_s7 + $0x160] sm:$0xff] }
 0xaba   :  { %4563 = vperm.xlu1 %5809, %v4553_v20   ;;  %4568 = vperm.xlu0 %5810, %v4554_v52   ;;  %v4491_v3 = vmul.f32 %v5905_v24, %v81_v46  ;;  %v96_v20 = vld [vmem:[%s7340_s7 + $0x170] sm:$0xff]  ;;  %v97_v52 = vld [vmem:[%s7340_s7 + $0x178] sm:$0xff]  ;;  %v4609_v24 = vld [vmem:[%s7338_s5] sm:$0xff] }
 0xabb   :  { %v5907_v30 = vpop.eup %5906  ;;  %v4471_v39 = vmax.f32 %v4463_v55, 0.0  ;;  %v4464_v38 = vsub.f32 %v4448_v26, %v4456_v42  ;;  %5579 = vmatprep.mubr.msk.f32.mxu0 %vm4230_vm3, %v4609_v24 }
 0xabc   :  { %v4492_v44 = vmul.f32 %v5907_v30, %v82_v27  ;;  %v4547_v22 = vmul.f32 %v4491_v3, %v7116_v43  ;;  %v83_v43 = vld [vmem:[%s7340_s7 + $0x108] sm:$0xff] }
 0xabd   :  { %v4479_v33 = vadd.f32 1e-05, %v4471_v39  ;;  %v4472_v45 = vmax.f32 %v4464_v38, 0.0 }
 0xabe   :  { %4509 = vperm.xlu1 %5809, %v4491_v3   ;;  %4514 = vperm.xlu0 %5810, %v4492_v44   ;;  %v4548_v54 = vmul.f32 %v4492_v44, %v7118_v9  ;;  %v4555_v53 = vsub.f32 %v89_v0, %v4547_v22 }
 0xabf   :  { %5912 = vrsqrt.f32 %v4479_v33  ;;  %v4480_v48 = vadd.f32 1e-05, %v4472_v45 }
 0xac0   :  { %v4556_v7 = vsub.f32 %v90_v51, %v4548_v54 }
 0xac1   :  { %v5909_v59 = vpop.eup %5908  ;;  %5914 = vrsqrt.f32 %v4480_v48 }
 0xac2   :  { %4573 = vperm.xlu1 %5809, %v4555_v53   ;;  %4578 = vperm.xlu0 %5810, %v4556_v7   ;;  %v4493_v60 = vmul.f32 %v5909_v59, %v83_v43 }
 0xac3   :  { %v5911_v4 = vpop.eup %5910 }
 0xac4   :  { %v4494_v63 = vmul.f32 %v5911_v4, %v84_v40  ;;  %v4549_v9 = vmul.f32 %v4493_v60, %v7124_v18  ;;  %v86_v18 = vld [vmem:[%s7340_s7 + $0x120] sm:$0xff] }
 0xac6   :  { %4519 = vperm.xlu1 %5809, %v4493_v60   ;;  %4524 = vperm.xlu0 %5810, %v4494_v63   ;;  %v4550_v12 = vmul.f32 %v4494_v63, %v7129_v61  ;;  %v4557_v23 = vsub.f32 %v91_v1, %v4549_v9  ;;  %v93_v61 = vld [vmem:[%s7340_s7 + $0x158] sm:$0xff]  ;;  %v4610_v9 = vld [vmem:[%s7338_s5 + $0x8] sm:$0xff]  ;;  %v4611_v1 = vld [vmem:[%s7338_s5 + $0x10] sm:$0xff] }
 0xac8   :  { %v4558_v16 = vsub.f32 %v92_v11, %v4550_v12 }
 0xac9   :  { %v5913_v15 = vpop.eup %5912 }
 0xaca   :  { %4583 = vperm.xlu1 %5809, %v4557_v23   ;;  %4588 = vperm.xlu0 %5810, %v4558_v16   ;;  %v4495_v14 = vmul.f32 %v5913_v15, %v85_v34 }
 0xacb   :  { %v5915_v19 = vpop.eup %5914 }
 0xacc   :  { %v4496_v35 = vmul.f32 %v5915_v19, %v86_v18  ;;  %v4551_v31 = vmul.f32 %v4495_v14, %v7138_v5  ;;  %v95_v5 = vld [vmem:[%s7340_s7 + $0x168] sm:$0xff] }
 0xace   :  { %4529 = vperm.xlu1 %5809, %v4495_v14   ;;  %4534 = vperm.xlu0 %5810, %v4496_v35   ;;  %v4552_v28 = vmul.f32 %v4496_v35, %v7140_v41  ;;  %v4559_v46 = vsub.f32 %v93_v61, %v4551_v31  ;;  %v98_v41 = vld [vmem:[%s7340_s7 + $0x180] sm:$0xff] }
 0xad0   :  { %v4560_v25 = vsub.f32 %v94_v56, %v4552_v28 }
 0xad2   :  { %4593 = vperm.xlu1 %5809, %v4559_v46   ;;  %4598 = vperm.xlu0 %5810, %v4560_v25  }
 0xad6   :  { %4615 = vperm.xlu1 %5809, %v95_v5   ;;  %4620 = vperm.xlu0 %5810, %v96_v20  }
 0xada   :  { %4625 = vperm.xlu1 %5809, %v97_v52   ;;  %4630 = vperm.xlu0 %5810, %v98_v41  }
 0xb2f   :  { %v4500_v42 = vpop.permute.xlu0 %4499 }
 0xb30   :  { %v4537_v26 = vmul.f32 %v4500_v42, %v4360_v37 }
 0xb35   :  { %v4505_v55 = vpop.permute.xlu1 %4504 }
 0xb36   :  { %v4538_v27 = vmul.f32 %v4505_v55, %v4361_v8 }
 0xb39   :  { %v4569_v3 = vpop.permute.xlu0 %4568  ;;  %v4564_v30 = vpop.permute.xlu1 %4563 }
 0xb3a   :  { %v4602_v39 = vadd.f32 %v4569_v3, %v4538_v27  ;;  %v4601_v38 = vadd.f32 %v4564_v30, %v4537_v26 }
 0xb3c   :  { %v5781_v44 = vpack.c.bf16 %v4602_v39, %v4601_v38 }
 0xb3d   :  { %v4515_v22 = vpop.permute.xlu0 %4514  ;;  %v4510_v33 = vpop.permute.xlu1 %4509 }
 0xb3e   :  { %5782 = vmatprep.subr.bf16.mxu0 %v5781_v44  ;;  %v4540_v45 = vmul.f32 %v4515_v22, %v4363_v57  ;;  %v4539_v0 = vmul.f32 %v4510_v33, %v4362_v2 }
 0xb3f   :  { %5784 = vmatpush3.bf16.msra.mxu0 %v5781_v44  ;;  %v4855_v44 = vld [vmem:[%s7339_s6 + $0x8] sm:$0xff] }
 0xb41   :  { %v4579_v50 = vpop.permute.xlu0 %4578  ;;  %v4574_v37 = vpop.permute.xlu1 %4573 }
 0xb42   :  { %v4604_v51 = vadd.f32 %v4579_v50, %v4540_v45  ;;  %v4603_v58 = vadd.f32 %v4574_v37, %v4539_v0 }
 0xb44   :  { %v5785_v8 = vpack.c.bf16 %v4604_v51, %v4603_v58 }
 0xb45   :  { %v4525_v54 = vpop.permute.xlu0 %4524  ;;  %v4520_v48 = vpop.permute.xlu1 %4519 }
 0xb46   :  { %5786 = vmatprep.subr.bf16.mxu0 %v5785_v8  ;;  %v4542_v43 = vmul.f32 %v4525_v54, %v4365_v21  ;;  %v4541_v53 = vmul.f32 %v4520_v48, %v4364_v17 }
 0xb47   :  { %5788 = vmatpush3.bf16.msra.mxu0 %v5785_v8 }
 0xb49   :  { %v4589_v6 = vpop.permute.xlu0 %4588  ;;  %v4584_v57 = vpop.permute.xlu1 %4583 }
 0xb4a   :  { %v4606_v7 = vadd.f32 %v4589_v6, %v4542_v43  ;;  %v4605_v10 = vadd.f32 %v4584_v57, %v4541_v53 }
 0xb4c   :  { %v5789_v2 = vpack.c.bf16 %v4606_v7, %v4605_v10 }
 0xb4d   :  { %v4535_v59 = vpop.permute.xlu0 %4534  ;;  %v4530_v40 = vpop.permute.xlu1 %4529 }
 0xb4e   :  { %5790 = vmatprep.subr.bf16.mxu0 %v5789_v2  ;;  %v4544_v60 = vmul.f32 %v4535_v59, %v4367_v49  ;;  %v4543_v4 = vmul.f32 %v4530_v40, %v4366_v36 }
 0xb4f   :  { %5792 = vmatpush3.bf16.msra.mxu0 %v5789_v2 }
 0xb51   :  { %v4599_v32 = vpop.permute.xlu0 %4598  ;;  %v4594_v21 = vpop.permute.xlu1 %4593 }
 0xb52   :  { %v4608_v63 = vadd.f32 %v4599_v32, %v4544_v60  ;;  %v4607_v29 = vadd.f32 %v4594_v21, %v4543_v4 }
 0xb54   :  { %v5793_v17 = vpack.c.bf16 %v4608_v63, %v4607_v29 }
 0xb55   :  { %v4621_v36 = vpop.permute.xlu0 %4620  ;;  %v4616_v13 = vpop.permute.xlu1 %4615 }
 0xb56   :  { %5794 = vmatprep.subr.bf16.mxu0 %v5793_v17 }
 0xb57   :  { %5796 = vmatpush3.bf16.msra.mxu0 %v5793_v17 }
 0xb59   :  { %v4631_v16 = vpop.permute.xlu0 %4630  ;;  %v4626_v14 = vpop.permute.xlu1 %4625 }
 0xb5a   :  { %5580 = vmatmul.mubr.msk.f32.vlgmr.msra.gmra.mrb[48].mxu0 %vm4230_vm3, %v4610_v9 }
 0xb5b   :  { %5582 = vmatprep.mubr.msk.f32.mxu0 %vm4230_vm3, %v4611_v1 }
 0xb5e   :  { %5583 = vmatmul.mubr.msk.f32.gmra.mrb[50].mxu0 %vm4230_vm3, %v4612_v62 }
 0xc2d   :  { %v5581_v49 = vpop.f32.mrb[48].mxu0 }
 0xc2e   :  { %v7238_v11 = vadd.f32 %v5581_v49, %v4621_v36  ;;  %v4711_v12 = vpop.f32.mrb[49].mxu0  ;;  %v99_v49 = vld [vmem:[%s7340_s7 + $0x188] sm:$0xff] }
 0xc2f   :  { %v7240_v34 = vadd.f32 %v4711_v12, %v4616_v13  ;;  %v100_v12 = vld [vmem:[%s7340_s7 + $0x190] sm:$0xff] }
 0xc30   :  { %v4731_v23 = vmax.f32 %v7238_v11, 0.0 }
 0xc31   :  { %v4730_v15 = vmax.f32 %v7240_v34, 0.0  ;;  %v5584_v18 = vpop.f32.mrb[50].mxu0 }
 0xc32   :  { %v4735_v19 = vmul.f32 %v7052_v47, %v4731_v23  ;;  %v7247_v35 = vadd.f32 %v5584_v18, %v4631_v16  ;;  %v4721_v31 = vpop.f32.mrb[51].mxu0 }
 0xc33   :  { %v4734_v61 = vmul.f32 %v7052_v47, %v4730_v15  ;;  %v7252_v56 = vadd.f32 %v4721_v31, %v4626_v14  ;;  %v101_v31 = vld [vmem:[%s7340_s7 + $0x198] sm:$0xff] }
 0xc34   :  { %v4733_v28 = vmax.f32 %v7247_v35, 0.0  ;;  %v4741_v46 = vsel %vm224_vm10, %v4735_v19, 0.0  ;;  %v4755_v52 = vmul.f32 %v4735_v19, %v4735_v19 }
 0xc35   :  { %v4732_v25 = vmax.f32 %v7252_v56, 0.0  ;;  %4742 = vadd.xlane.f32.xlu0 %v4741_v46  ;;  %v4738_v5 = vsel %vm224_vm10, %v4734_v61, 0.0  ;;  %v4754_v20 = vmul.f32 %v4734_v61, %v4734_v61  ;;  %v102_v61 = vld [vmem:[%s7340_s7 + $0x1a0] sm:$0xff] }
 0xc36   :  { %4739 = vadd.xlane.f32.xlu1 %v4738_v5  ;;  %v4737_v42 = vmul.f32 %v7052_v47, %v4733_v28  ;;  %v4761_v55 = vsel %vm224_vm10, %v4755_v52, 0.0 }
 0xc37   :  { %v4758_v41 = vsel %vm224_vm10, %v4754_v20, 0.0  ;;  %v4736_v24 = vmul.f32 %v7052_v47, %v4732_v25  ;;  %v4854_v47 = vld [vmem:[%s7339_s6] sm:$0xff] }
 0xc38   :  { %v4747_v3 = vsel %vm224_vm10, %v4737_v42, 0.0  ;;  %v4757_v30 = vmul.f32 %v4737_v42, %v4737_v42 }
 0xc39   :  { %4759 = vadd.xlane.f32.xlu0 %v4758_v41  ;;  %v4744_v26 = vsel %vm224_vm10, %v4736_v24, 0.0  ;;  %v4756_v27 = vmul.f32 %v4736_v24, %v4736_v24  ;;  %v103_v24 = vld [vmem:[%s7340_s7 + $0x1a8] sm:$0xff] }
 0xc3a   :  { %4762 = vadd.xlane.f32.xlu1 %v4761_v55  ;;  %v4767_v38 = vsel %vm224_vm10, %v4757_v30, 0.0  ;;  %v104_v55 = vld [vmem:[%s7340_s7 + $0x1b0] sm:$0xff]  ;;  %v105_v30 = vld [vmem:[%s7340_s7 + $0x1b8] sm:$0xff] }
 0xc3b   :  { %v4764_v39 = vsel %vm224_vm10, %v4756_v27, 0.0 }
 0xc3d   :  { %4745 = vadd.xlane.f32.xlu0 %v4744_v26 }
 0xc3e   :  { %4748 = vadd.xlane.f32.xlu1 %v4747_v3 }
 0xc41   :  { %4765 = vadd.xlane.f32.xlu0 %v4764_v39 }
 0xc42   :  { %4768 = vadd.xlane.f32.xlu1 %v4767_v38  ;;  %v106_v38 = vld [vmem:[%s7340_s7 + $0x1c0] sm:$0xff] }
 0xc53   :  { %4860 = vperm.xlu1 %5809, %v4854_v47  }
 0xc57   :  { %4865 = vperm.xlu0 %5810, %v4855_v44  }
 0xcc2   :  { %v4743_v22 = vpop.xlane.xlu0 %4742 }
 0xcc3   :  { %v4740_v33 = vpop.xlane.xlu1 %4739  ;;  %v4751_v45 = vmul.f32 0.25, %v4743_v22  ;;  %v4856_v22 = vld [vmem:[%s7339_s6 + $0x10] sm:$0xff] }
 0xcc4   :  { %v4750_v0 = vmul.f32 0.25, %v4740_v33  ;;  %v4857_v33 = vld [vmem:[%s7339_s6 + $0x18] sm:$0xff]  ;;  %s5959_s6 = smov [#allocation2]  }
 0xcc5   :  { %v4775_v8 = vmul.f32 %v4751_v45, %v4751_v45 }
 0xcc6   :  { %v4774_v50 = vmul.f32 %v4750_v0, %v4750_v0  ;;  %v4760_v37 = vpop.xlane.xlu0 %4759 }
 0xcc7   :  { %v4770_v51 = vmul.f32 0.25, %v4760_v37  ;;  %v4763_v58 = vpop.xlane.xlu1 %4762 }
 0xcc8   :  { %v4771_v54 = vmul.f32 0.25, %v4763_v58 }
 0xcc9   :  { %v4778_v48 = vsub.f32 %v4770_v51, %v4774_v50 }
 0xcca   :  { %v4779_v43 = vsub.f32 %v4771_v54, %v4775_v8  ;;  %v4746_v53 = vpop.xlane.xlu0 %4745 }
 0xccb   :  { %v4782_v6 = vmax.f32 %v4778_v48, 0.0  ;;  %v4752_v57 = vmul.f32 0.25, %v4746_v53  ;;  %v4749_v7 = vpop.xlane.xlu1 %4748 }
 0xccc   :  { %v4783_v10 = vmax.f32 %v4779_v43, 0.0  ;;  %v4753_v2 = vmul.f32 0.25, %v4749_v7 }
 0xccd   :  { %v4786_v59 = vadd.f32 1e-05, %v4782_v6  ;;  %v4776_v4 = vmul.f32 %v4752_v57, %v4752_v57 }
 0xcce   :  { %v4787_v40 = vadd.f32 1e-05, %v4783_v10  ;;  %v4766_v60 = vpop.xlane.xlu0 %4765  ;;  %v4777_v63 = vmul.f32 %v4753_v2, %v4753_v2 }
 0xccf   :  { %5916 = vrsqrt.f32 %v4786_v59  ;;  %v4772_v32 = vmul.f32 0.25, %v4766_v60  ;;  %v4769_v21 = vpop.xlane.xlu1 %4768 }
 0xcd0   :  { %5918 = vrsqrt.f32 %v4787_v40  ;;  %v4773_v29 = vmul.f32 0.25, %v4769_v21 }
 0xcd1   :  { %v4780_v17 = vsub.f32 %v4772_v32, %v4776_v4 }
 0xcd2   :  { %v4781_v9 = vsub.f32 %v4773_v29, %v4777_v63 }
 0xcd3   :  { %v4784_v1 = vmax.f32 %v4780_v17, 0.0 }
 0xcd4   :  { %v4785_v62 = vmax.f32 %v4781_v9, 0.0 }
 0xcd5   :  { %v4788_v36 = vadd.f32 1e-05, %v4784_v1 }
 0xcd6   :  { %v4789_v13 = vadd.f32 1e-05, %v4785_v62  ;;  %v4866_v50 = vpop.permute.xlu0 %4865 }
 0xcd7   :  { %5920 = vrsqrt.f32 %v4788_v36 }
 0xcd8   :  { %5922 = vrsqrt.f32 %v4789_v13 }
 0xcd9   :  { %v5917_v16 = vpop.eup %5916 }
 0xcda   :  { %v5919_v18 = vpop.eup %5918  ;;  %v4794_v14 = vmul.f32 %v5917_v16, %v99_v49 }
 0xcdb   :  { %v4795_v19 = vmul.f32 %v5919_v18, %v100_v12 }
 0xcdc   :  { %4800 = vperm.xlu0 %5810, %v4794_v14   ;;  %v4822_v52 = vmul.f32 %v4794_v14, %v4750_v0  ;;  %v4861_v0 = vpop.permute.xlu1 %4860 }
 0xcdd   :  { %4805 = vperm.xlu1 %5809, %v4795_v19   ;;  %v4823_v42 = vmul.f32 %v4795_v19, %v4751_v45  ;;  %v107_v45 = vld [vmem:[%s7340_s7 + $0x1c8] sm:$0x1]  ;;  %s4909_s7 = sshll.u32 %s5959_s6, 4  ;;  %s4910_s7 = int_to_ptr.vmem [resolvable:$true] %s4909_s7 }
 0xcde   :  { %v4826_v26 = vsub.f32 %v103_v24, %v4822_v52  ;;  %s5924_s1 = scalar_lea.vmem %s4910_s7, 16  ;;  %s5928_s15 = scalar_lea.vmem %s4910_s7, 32 }
 0xcdf   :  { %v4827_v3 = vsub.f32 %v104_v55, %v4823_v42  ;;  %p5925_p0 = scmp.ne.s32.totalorder %s4910_s7, %s5924_s1  ;;  %p5929_p1 = scmp.lt.s32.totalorder %s4910_s7, %s4910_s7 }
 0xce0   :  { %p5930_p2 = scmp.lt.s32.totalorder %s5928_s15, %s5924_s1 }
 0xce1   :  { %v5921_v46 = vpop.eup %5920 }
 0xce2   :  { %v5923_v5 = vpop.eup %5922  ;;  %v4796_v20 = vmul.f32 %v5921_v46, %v101_v31  ;;  %p5931_p3 = por %p5930_p2, %p5929_p1 }
 0xce3   :  { %v4797_v41 = vmul.f32 %v5923_v5, %v102_v61 }
 0xce4   :  { %4810 = vperm.xlu1 %5809, %v4796_v20   ;;  %v4824_v27 = vmul.f32 %v4796_v20, %v4752_v57  ;;  %p5932_p4 = pnand %p5931_p3, %p5925_p0 }
 0xce5   :  { %4815 = vperm.xlu0 %5810, %v4797_v41   ;;  %v4825_v39 = vmul.f32 %v4797_v41, %v4753_v2 }
 0xce6   :  { %v4828_v47 = vsub.f32 %v105_v30, %v4824_v27 }
 0xce7   :  { %v4829_v44 = vsub.f32 %v106_v38, %v4825_v39 }
 0xce8   :  { %4832 = vperm.xlu1 %5809, %v4826_v26  }
 0xce9   :  { %4837 = vperm.xlu0 %5810, %v4827_v3  }
 0xcec   :  { %4842 = vperm.xlu1 %5809, %v4828_v47  }
 0xced   :  { %4847 = vperm.xlu0 %5810, %v4829_v44  }
 0xcf0   :  { %4870 = vperm.xlu1 %5809, %v4856_v22  }
 0xcf1   :  { %4875 = vperm.xlu0 %5810, %v4857_v33  }
 0xcf4   :  { %4897 = vperm.xlu1 %5809, %v107_v45  }
 0xd5b   :  { %v4801_v51 = vpop.permute.xlu0 %4800 }
 0xd5c   :  { %v4806_v37 = vpop.permute.xlu1 %4805  ;;  %v4818_v54 = vmul.f32 %v4801_v51, %v4730_v15 }
 0xd5d   :  { %v4819_v48 = vmul.f32 %v4806_v37, %v4731_v23 }
 0xd63   :  { %v4811_v58 = vpop.permute.xlu1 %4810 }
 0xd64   :  { %v4816_v8 = vpop.permute.xlu0 %4815  ;;  %v4820_v59 = vmul.f32 %v4811_v58, %v4732_v25 }
 0xd65   :  { %v4821_v60 = vmul.f32 %v4816_v8, %v4733_v28 }
 0xd67   :  { %v4833_v43 = vpop.permute.xlu1 %4832 }
 0xd68   :  { %v4850_v53 = vadd.f32 %v4833_v43, %v4818_v54  ;;  %v4838_v6 = vpop.permute.xlu0 %4837 }
 0xd69   :  { %v4851_v57 = vadd.f32 %v4838_v6, %v4819_v48 }
 0xd6a   :  { %v4878_v7 = vmul.f32 %v4861_v0, %v4850_v53 }
 0xd6b   :  { %v4879_v10 = vmul.f32 %v4866_v50, %v4851_v57  ;;  %v4843_v2 = vpop.permute.xlu1 %4842 }
 0xd6c   :  { %v4848_v40 = vpop.permute.xlu0 %4847  ;;  %v4882_v34 = vsel %vm224_vm10, %v4878_v7, 0.0  ;;  %v4852_v11 = vadd.f32 %v4843_v2, %v4820_v59 }
 0xd6d   :  { %v4883_v15 = vsel %vm224_vm10, %v4879_v10, 0.0  ;;  %v4853_v23 = vadd.f32 %v4848_v40, %v4821_v60 }
 0xd6e   :  { %v4884_v63 = vadd.f32 %v4883_v15, %v4882_v34 }
 0xd6f   :  { %v4871_v4 = vpop.permute.xlu1 %4870 }
 0xd70   :  { %v4880_v32 = vmul.f32 %v4871_v4, %v4852_v11  ;;  %v4876_v21 = vpop.permute.xlu0 %4875 }
 0xd71   :  { %v4881_v29 = vmul.f32 %v4876_v21, %v4853_v23 }
 0xd72   :  { %v4885_v17 = vsel %vm224_vm10, %v4880_v32, 0.0 }
 0xd73   :  { %v4886_v9 = vadd.f32 %v4885_v17, %v4884_v63  ;;  %v4887_v56 = vsel %vm224_vm10, %v4881_v29, 0.0  ;;  %v4898_v49 = vpop.permute.xlu1 %4897 }
 0xd75   :  { %v4888_v25 = vadd.f32 %v4887_v56, %v4886_v9 }
 0xd77   :  { %v4889_v1 = vrot.slane %v4888_v25, 4 }
 0xd79   :  { %v4890_v35 = vadd.f32 %v4889_v1, %v4888_v25 }
 0xd7b   :  { %v4891_v28 = vrot.slane %v4890_v35, 2 }
 0xd7d   :  { %v4892_v62 = vadd.f32 %v4891_v28, %v4890_v35 }
 0xd7f   :  { %v4893_v36 = vrot.slane %v4892_v62, 1 }
 0xd81   :  { %v4894_v13 = vadd.f32 %v4893_v36, %v4892_v62 }
 0xd83   :  { %v4900_v12 = vadd.f32 %v4898_v49, %v4894_v13 }
 0xd85   :  { %4902 = vst.msk [vmem:[#allocation2] sm:$0x1] %vm4901_vm14, %v4900_v12 }
 0xd86   :  { %5935 = shalt.err (!%p5932_p4)
}
 0xd87   :  { %s5936_s17 = scalar_lea.hbm %s7341_s8, 16 }
 0xd88   :  { %p5937_p5 = scmp.ne.s32.totalorder %s7341_s8, %s5936_s17  ;;  %p5940_p6 = scmp.lt.u32.totalorder %s5936_s17, %s7341_s8 }
 0xd8a   :  { %p5942_p7 = pnand %p5940_p6, %p5937_p5 }
 0xd8c   :  { %5945 = shalt.err (!%p5942_p7)
}
 0xd8d   :  { %4912 = dma.vmem_to_hbm [thread:$0]  %s4910_s7, 16, %s7341_s8, [#allocation3]  }
 0xd8e   :  { %5946 = dma.done.wait [#allocation3], 16  }
 0xd8f   :  { %5947 = vsyncadd [#allocation3], 4294967280 }
 0xd90   :  { %4916 = vsyncpa [#allocation3], 1 }

</bundles_post_ra>
